<compile_context>
chip_gen: v7x
topology: tpu7x:2x2x1
jax: 0.10.0
libtpu: 0.0.40
codegen_flags: <defaults>
</compile_context>

<pallas_src>
import functools

import jax
import jax.numpy as jnp
from jax import lax
from jax.experimental import pallas as pl
from jax.experimental.pallas import tpu as pltpu


def _round_up(a, b):
    return (a + b - 1) // b * b


def _fused_double_partial_conv_kernel(
        x_ref, m_ref, border_ref,
        w1_ref, s1_ref, b1_ref,
        w2_ref, s2_ref, b2_ref,
        y_ref, mupd_ref,
        xm_s, msum_s, y1_s, m1_s,
        *, offs, pad, sp_c, c_mid, c_out, slide1, slide2):
    f32 = jnp.float32

    x = x_ref[0]                          # [c_in, l_in]  f32
    m = m_ref[0].astype(f32)              # [c_in, l_in]  bf16 -> f32
    border = border_ref[...]              # [1, sp_c]  1.0 interior / 0.0 pad-ring & tail

    # Masked input and channel-summed mask, computed once into VMEM scratch.
    xm_s[...] = x * m
    msum_s[...] = jnp.sum(m, axis=0, keepdims=True)

    def silu(v):
        return v * (1.0 / (1.0 + jnp.exp(-v)))

    def fast_recip(v):
        # EUP approximate reciprocal + one Newton step (keeps the divide off the VALU).
        r = pl.reciprocal(v, approx=True)
        return r * (2.0 - v * r)

    # ------------------- PartialConv3d #1 (3x3x3, bias=False) -------------------
    acc = jnp.zeros((c_mid, sp_c), f32)
    sm = jnp.zeros((1, sp_c), f32)
    for t, off in enumerate(offs):                       # 27 static taps
        sl = pl.ds(pad + off, sp_c)
        acc = acc + jnp.dot(w1_ref[t], xm_s[:, sl], preferred_element_type=f32)
        sm = sm + msum_s[:, sl]
    upd1 = jnp.clip(sm, 0.0, 1.0)
    ratio1 = slide1 * fast_recip(sm + 1e-8) * upd1
    y1 = acc * ratio1                                    # partial-conv renorm (no bias)
    y1 = y1 * s1_ref[...] + b1_ref[...]                  # folded BatchNorm3d
    y1 = silu(y1)                                        # nn.SiLU
    y1 = y1 * border                                     # re-create zero padding ring

    # Stage the intermediate activation / mask in padded-flat layout for conv #2.
    y1_s[...] = jnp.zeros_like(y1_s)
    m1_s[...] = jnp.zeros_like(m1_s)
    y1_s[:, pl.ds(pad, sp_c)] = y1
    m1_s[:, pl.ds(pad, sp_c)] = upd1 * border            # single-channel update mask

    # ------------------- PartialConv3d #2 (3x3x3, bias=False) -------------------
    acc2 = jnp.zeros((c_out, sp_c), f32)
    sm2 = jnp.zeros((1, sp_c), f32)
    for t, off in enumerate(offs):
        sl = pl.ds(pad + off, sp_c)
        acc2 = acc2 + jnp.dot(w2_ref[t], y1_s[:, sl], preferred_element_type=f32)
        sm2 = sm2 + m1_s[:, sl]
    sm2 = sm2 * float(c_mid)               # mask channels are identical -> scale by c_mid
    upd2 = jnp.clip(sm2, 0.0, 1.0)
    ratio2 = slide2 * fast_recip(sm2 + 1e-8) * upd2
    y2 = acc2 * ratio2
    y2 = y2 * s2_ref[...] + b2_ref[...]
    y2 = silu(y2)

    y_ref[0] = y2.astype(y_ref.dtype)
    mupd_ref[0] = upd2.astype(mupd_ref.dtype)


def _fold_bn(gamma, beta, mean, var, eps):
    scale = gamma / jnp.sqrt(var + eps)
    shift = beta - mean * scale
    return (scale.reshape(-1, 1).astype(jnp.float32),
            shift.reshape(-1, 1).astype(jnp.float32))


def inpainting_double_conv3d(x, mask_in, params):
    """Forward of InpaintingDoubleConv3D (inference-mode BatchNorm).

    x, mask_in : [N, C_in, D, H, W] float32
    params: {"w1": [C_mid,C_in,3,3,3], "w2": [C_out,C_mid,3,3,3],
             "bn1"/"bn2": (gamma, beta, running_mean, running_var), "bn_eps": float}
    Returns (y [N,C_out,D,H,W], mask_out [N,C_out,D,H,W]).
    """
    n, c_in, d, h, w = x.shape
    w1, w2 = params["w1"], params["w2"]
    c_mid, c_out = w1.shape[0], w2.shape[0]
    eps = params.get("bn_eps", 1e-5)

    dp, hp, wp = d + 2, h + 2, w + 2
    sp = dp * hp * wp
    max_off = hp * wp + wp + 1                    # |largest tap offset| in flat coords
    pad = _round_up(max_off, 128)                 # lane-aligned halo on both sides
    sp_c = _round_up(sp, 128)                     # lane-dense compute / output width
    l_in = pad + sp_c + pad                       # multiple of 128

    # Zero-padded, flattened inputs: payload occupies flat range [pad, pad + sp).
    def to_flat(a, dtype):
        ap = jnp.pad(a, ((0, 0), (0, 0), (1, 1), (1, 1), (1, 1))).reshape(n, -1, sp)
        return jnp.pad(ap, ((0, 0), (0, 0), (pad, l_in - pad - sp))).astype(dtype)

    xbuf = to_flat(x, jnp.float32)
    mbuf = to_flat(mask_in, jnp.bfloat16)         # binary masks are exact in bf16

    # Interior indicator in padded-flat coordinates (also zeroes the [sp, sp_c) tail).
    bord = jnp.zeros((dp, hp, wp), jnp.float32).at[1:-1, 1:-1, 1:-1].set(1.0).reshape(sp)
    border = jnp.zeros((1, sp_c), jnp.float32).at[0, :sp].set(bord)

    # Flat tap offsets and matching [27, C_out, C_in] weight layout.
    offs = tuple((kd - 1) * hp * wp + (kh - 1) * wp + (kw - 1)
                 for kd in range(3) for kh in range(3) for kw in range(3))
    w1r = jnp.transpose(w1, (2, 3, 4, 0, 1)).reshape(27, c_mid, c_in).astype(jnp.float32)
    w2r = jnp.transpose(w2, (2, 3, 4, 0, 1)).reshape(27, c_out, c_mid).astype(jnp.float32)

    s1, b1 = _fold_bn(*params["bn1"], eps)
    s2, b2 = _fold_bn(*params["bn2"], eps)

    kernel = functools.partial(
        _fused_double_partial_conv_kernel,
        offs=offs, pad=pad, sp_c=sp_c, c_mid=c_mid, c_out=c_out,
        slide1=float(c_in * 27), slide2=float(c_mid * 27))

    y_flat, m_flat = pl.pallas_call(
        kernel,
        out_shape=(jax.ShapeDtypeStruct((n, c_out, sp_c), jnp.float32),
                   jax.ShapeDtypeStruct((n, 1, sp_c), jnp.float32)),
        grid=(n,),
        in_specs=[
            pl.BlockSpec((1, c_in, l_in), lambda i: (i, 0, 0)),      # x (padded, flat)
            pl.BlockSpec((1, c_in, l_in), lambda i: (i, 0, 0)),      # mask (bf16)
            pl.BlockSpec((1, sp_c), lambda i: (0, 0)),               # interior mask
            pl.BlockSpec((27, c_mid, c_in), lambda i: (0, 0, 0)),    # conv1 weights
            pl.BlockSpec((c_mid, 1), lambda i: (0, 0)),              # bn1 scale
            pl.BlockSpec((c_mid, 1), lambda i: (0, 0)),              # bn1 shift
            pl.BlockSpec((27, c_out, c_mid), lambda i: (0, 0, 0)),   # conv2 weights
            pl.BlockSpec((c_out, 1), lambda i: (0, 0)),              # bn2 scale
            pl.BlockSpec((c_out, 1), lambda i: (0, 0)),              # bn2 shift
        ],
        out_specs=(
            pl.BlockSpec((1, c_out, sp_c), lambda i: (i, 0, 0)),
            pl.BlockSpec((1, 1, sp_c), lambda i: (i, 0, 0)),
        ),
        scratch_shapes=[
            pltpu.VMEM((c_in, l_in), jnp.float32),    # x * mask
            pltpu.VMEM((1, l_in), jnp.float32),       # channel-summed mask
            pltpu.VMEM((c_mid, l_in), jnp.float32),   # intermediate activation
            pltpu.VMEM((1, l_in), jnp.float32),       # intermediate update mask
        ],
        compiler_params=pltpu.CompilerParams(
            dimension_semantics=("parallel",),
            vmem_limit_bytes=48 * 1024 * 1024,        # headroom beyond v5e's 16 MiB default
        ),
    )(xbuf, mbuf, border, w1r, s1, b1, w2r, s2, b2)

    y = y_flat[:, :, :sp].reshape(n, c_out, dp, hp, wp)[:, :, 1:-1, 1:-1, 1:-1]
    m1 = m_flat[:, :, :sp].reshape(n, 1, dp, hp, wp)[:, :, 1:-1, 1:-1, 1:-1]
    mask_out = jnp.broadcast_to(m1, (n, c_out, d, h, w))
    return y, mask_out


# ----------------------------- pure-JAX reference -----------------------------

def _partial_conv3d_ref(x, mask, weight):
    dn = ('NCDHW', 'OIDHW', 'NCDHW')
    pad3 = [(1, 1)] * 3
    raw = lax.conv_general_dilated(x * mask, weight, (1, 1, 1), pad3,
                                   dimension_numbers=dn,
                                   precision=lax.Precision.HIGHEST)
    summ = lax.conv_general_dilated(mask, jnp.ones_like(weight), (1, 1, 1), pad3,
                                    dimension_numbers=dn,
                                    precision=lax.Precision.HIGHEST)
    slide = float(weight.shape[1] * 27)
    ratio = slide / (summ + 1e-8)
    upd = jnp.clip(summ, 0.0, 1.0)
    return raw * (ratio * upd), upd          # bias=False branch of PartialConv3d


def _bn_silu_ref(x, bn, eps):
    gamma, beta, mean, var = bn
    xn = (x - mean[None, :, None, None, None]) * lax.rsqrt(
        var[None, :, None, None, None] + eps)
    xn = xn * gamma[None, :, None, None, None] + beta[None, :, None, None, None]
    return xn * jax.nn.sigmoid(xn)


def _reference(x, mask_in, params):
    eps = params.get("bn_eps", 1e-5)
    y, m = _partial_conv3d_ref(x, mask_in, params["w1"])
    y = _bn_silu_ref(y, params["bn1"], eps)
    y, m = _partial_conv3d_ref(y, m, params["w2"])
    y = _bn_silu_ref(y, params["bn2"], eps)
    return y, m


if __name__ == "__main__":
    key = jax.random.PRNGKey(0)
    ks = jax.random.split(key, 10)

    N, C_IN, C_OUT = 2, 4, 4          # mid_channels defaults to out_channels
    C_MID = C_OUT
    D, H, W = 4, 8, 8

    x = jax.random.normal(ks[0], (N, C_IN, D, H, W), dtype=jnp.float32)
    mask = (jax.random.uniform(ks[1], (N, C_IN, D, H, W)) > 0.3).astype(jnp.float32)

    params = {
        "w1": jax.random.normal(ks[2], (C_MID, C_IN, 3, 3, 3), jnp.float32) * 0.15,
        "w2": jax.random.normal(ks[3], (C_OUT, C_MID, 3, 3, 3), jnp.float32) * 0.15,
        "bn1": (1.0 + 0.1 * jax.random.normal(ks[4], (C_MID,), jnp.float32),
                0.1 * jax.random.normal(ks[5], (C_MID,), jnp.float32),
                0.1 * jax.random.normal(ks[6], (C_MID,), jnp.float32),
                1.0 + 0.1 * jax.random.uniform(ks[7], (C_MID,), jnp.float32)),
        "bn2": (1.0 + 0.1 * jax.random.normal(ks[8], (C_OUT,), jnp.float32),
                0.1 * jax.random.normal(ks[9], (C_OUT,), jnp.float32),
                jnp.zeros((C_OUT,), jnp.float32),
                jnp.ones((C_OUT,), jnp.float32)),
        "bn_eps": 1e-5,
    }

    fwd = jax.jit(inpainting_double_conv3d)
    y, m_out = fwd(x, mask, params)
    y = jax.block_until_ready(y)
    m_out = jax.block_until_ready(m_out)

    y_ref, m_ref = _reference(x, mask, params)
    assert y.shape == (N, C_OUT, D, H, W)
    assert m_out.shape == (N, C_OUT, D, H, W)
    assert jnp.allclose(y, y_ref, atol=1e-3, rtol=1e-3), \
        float(jnp.max(jnp.abs(y - y_ref)))
    assert jnp.allclose(m_out, m_ref, atol=1e-6)

    print("KERNEL_OK")
</pallas_src>

<mosaic_0001>
module attributes {stable_mosaic.version = 11 : i64} {
  func.func @_fused_double_partial_conv_kernel(%arg0: i32, %arg1: memref<1x4x896xf32, #tpu.memory_space<vmem>>, %arg2: memref<1x4x896xbf16, #tpu.memory_space<vmem>>, %arg3: memref<1x640xf32, #tpu.memory_space<vmem>>, %arg4: memref<27x4x4xf32, #tpu.memory_space<vmem>>, %arg5: memref<4x1xf32, #tpu.memory_space<vmem>>, %arg6: memref<4x1xf32, #tpu.memory_space<vmem>>, %arg7: memref<27x4x4xf32, #tpu.memory_space<vmem>>, %arg8: memref<4x1xf32, #tpu.memory_space<vmem>>, %arg9: memref<4x1xf32, #tpu.memory_space<vmem>>, %arg10: memref<1x4x640xf32, #tpu.memory_space<vmem>>, %arg11: memref<1x1x640xf32, #tpu.memory_space<vmem>>, %arg12: memref<4x896xf32, #tpu.memory_space<vmem>>, %arg13: memref<1x896xf32, #tpu.memory_space<vmem>>, %arg14: memref<4x896xf32, #tpu.memory_space<vmem>>, %arg15: memref<1x896xf32, #tpu.memory_space<vmem>>) attributes {dimension_semantics = [#tpu.dimension_semantics<parallel>], iteration_bounds = array<i64: 2>, scalar_prefetch = 0 : i64, scratch_operands = 4 : i64, tpu.core_type = #tpu.core_type<tc>, window_params = [{transform_indices = @transform_0, window_bounds = array<i64: 1, 4, 896>}, {transform_indices = @transform_1, window_bounds = array<i64: 1, 4, 896>}, {pipeline_mode = #tpu.pipeline_mode<synchronous>, transform_indices = @transform_2, window_bounds = array<i64: 1, 640>}, {pipeline_mode = #tpu.pipeline_mode<synchronous>, transform_indices = @transform_3, window_bounds = array<i64: 27, 4, 4>}, {pipeline_mode = #tpu.pipeline_mode<synchronous>, transform_indices = @transform_4, window_bounds = array<i64: 4, 1>}, {pipeline_mode = #tpu.pipeline_mode<synchronous>, transform_indices = @transform_5, window_bounds = array<i64: 4, 1>}, {pipeline_mode = #tpu.pipeline_mode<synchronous>, transform_indices = @transform_6, window_bounds = array<i64: 27, 4, 4>}, {pipeline_mode = #tpu.pipeline_mode<synchronous>, transform_indices = @transform_7, window_bounds = array<i64: 4, 1>}, {pipeline_mode = #tpu.pipeline_mode<synchronous>, transform_indices = @transform_8, window_bounds = array<i64: 4, 1>}, {transform_indices = @transform_9, window_bounds = array<i64: 1, 4, 640>}, {transform_indices = @transform_10, window_bounds = array<i64: 1, 1, 640>}]} {
    %c0 = arith.constant 0 : index
    %c0_0 = arith.constant 0 : index
    %c0_1 = arith.constant 0 : index
    %0 = vector.load %arg1[%c0, %c0_0, %c0_1] : memref<1x4x896xf32, #tpu.memory_space<vmem>>, vector<1x4x896xf32>
    %1 = vector.shape_cast %0 : vector<1x4x896xf32> to vector<4x896xf32>
    %c0_2 = arith.constant 0 : index
    %c0_3 = arith.constant 0 : index
    %c0_4 = arith.constant 0 : index
    %2 = vector.load %arg2[%c0_2, %c0_3, %c0_4] : memref<1x4x896xbf16, #tpu.memory_space<vmem>>, vector<1x4x896xbf16>
    %3 = vector.shape_cast %2 : vector<1x4x896xbf16> to vector<4x896xbf16>
    %4 = arith.extf %3 : vector<4x896xbf16> to vector<4x896xf32>
    %c0_5 = arith.constant 0 : index
    %c0_6 = arith.constant 0 : index
    %5 = vector.load %arg3[%c0_5, %c0_6] : memref<1x640xf32, #tpu.memory_space<vmem>>, vector<1x640xf32>
    %6 = arith.mulf %1, %4 : vector<4x896xf32>
    %c0_7 = arith.constant 0 : index
    %c0_8 = arith.constant 0 : index
    %7 = vector.load %arg12[%c0_7, %c0_8] : memref<4x896xf32, #tpu.memory_space<vmem>>, vector<4x896xf32>
    tpu.vector_store %arg12[%c0_7, %c0_8], %6 {strides = array<i32>} : memref<4x896xf32, #tpu.memory_space<vmem>>, vector<4x896xf32>,
    %cst = arith.constant dense<0.000000e+00> : vector<896xf32>
    %8 = vector.multi_reduction <add>, %4, %cst [0] : vector<4x896xf32> to vector<896xf32>
    %9 = vector.shape_cast %8 : vector<896xf32> to vector<1x896xf32>
    %c0_9 = arith.constant 0 : index
    %c0_10 = arith.constant 0 : index
    %10 = vector.load %arg13[%c0_9, %c0_10] : memref<1x896xf32, #tpu.memory_space<vmem>>, vector<1x896xf32>
    tpu.vector_store %arg13[%c0_9, %c0_10], %9 {strides = array<i32>} : memref<1x896xf32, #tpu.memory_space<vmem>>, vector<1x896xf32>,
    %cst_11 = arith.constant 0.000000e+00 : f32
    %11 = vector.broadcast %cst_11 : f32 to vector<4x640xf32>
    %cst_12 = arith.constant 0.000000e+00 : f32
    %12 = vector.broadcast %cst_12 : f32 to vector<1x640xf32>
    %c0_13 = arith.constant 0 : index
    %c0_14 = arith.constant 0 : index
    %c0_15 = arith.constant 0 : index
    %13 = vector.load %arg4[%c0_13, %c0_14, %c0_15] : memref<27x4x4xf32, #tpu.memory_space<vmem>>, vector<1x4x4xf32>
    %14 = vector.shape_cast %13 : vector<1x4x4xf32> to vector<4x4xf32>
    %c0_16 = arith.constant 0 : index
    %c17 = arith.constant 17 : index
    %15 = vector.load %arg12[%c0_16, %c17] : memref<4x896xf32, #tpu.memory_space<vmem>>, vector<4x640xf32>
    %cst_17 = arith.constant dense<0.000000e+00> : vector<4x640xf32>
    %16 = tpu.matmul %14, %15, %cst_17 {dimension_numbers = #tpu.dot_dimension_numbers<[1], [0], [0], [1], [0, 0, 1, 1], [], []>} : vector<4x4xf32>, vector<4x640xf32>, vector<4x640xf32> -> vector<4x640xf32>
    %17 = arith.addf %11, %16 : vector<4x640xf32>
    %c0_18 = arith.constant 0 : index
    %c17_19 = arith.constant 17 : index
    %18 = vector.load %arg13[%c0_18, %c17_19] : memref<1x896xf32, #tpu.memory_space<vmem>>, vector<1x640xf32>
    %19 = arith.addf %12, %18 : vector<1x640xf32>
    %c1 = arith.constant 1 : index
    %c0_20 = arith.constant 0 : index
    %c0_21 = arith.constant 0 : index
    %20 = vector.load %arg4[%c1, %c0_20, %c0_21] : memref<27x4x4xf32, #tpu.memory_space<vmem>>, vector<1x4x4xf32>
    %21 = vector.shape_cast %20 : vector<1x4x4xf32> to vector<4x4xf32>
    %c0_22 = arith.constant 0 : index
    %c18 = arith.constant 18 : index
    %22 = vector.load %arg12[%c0_22, %c18] : memref<4x896xf32, #tpu.memory_space<vmem>>, vector<4x640xf32>
    %cst_23 = arith.constant dense<0.000000e+00> : vector<4x640xf32>
    %23 = tpu.matmul %21, %22, %cst_23 {dimension_numbers = #tpu.dot_dimension_numbers<[1], [0], [0], [1], [0, 0, 1, 1], [], []>} : vector<4x4xf32>, vector<4x640xf32>, vector<4x640xf32> -> vector<4x640xf32>
    %24 = arith.addf %17, %23 : vector<4x640xf32>
    %c0_24 = arith.constant 0 : index
    %c18_25 = arith.constant 18 : index
    %25 = vector.load %arg13[%c0_24, %c18_25] : memref<1x896xf32, #tpu.memory_space<vmem>>, vector<1x640xf32>
    %26 = arith.addf %19, %25 : vector<1x640xf32>
    %c2 = arith.constant 2 : index
    %c0_26 = arith.constant 0 : index
    %c0_27 = arith.constant 0 : index
    %27 = vector.load %arg4[%c2, %c0_26, %c0_27] : memref<27x4x4xf32, #tpu.memory_space<vmem>>, vector<1x4x4xf32>
    %28 = vector.shape_cast %27 : vector<1x4x4xf32> to vector<4x4xf32>
    %c0_28 = arith.constant 0 : index
    %c19 = arith.constant 19 : index
    %29 = vector.load %arg12[%c0_28, %c19] : memref<4x896xf32, #tpu.memory_space<vmem>>, vector<4x640xf32>
    %cst_29 = arith.constant dense<0.000000e+00> : vector<4x640xf32>
    %30 = tpu.matmul %28, %29, %cst_29 {dimension_numbers = #tpu.dot_dimension_numbers<[1], [0], [0], [1], [0, 0, 1, 1], [], []>} : vector<4x4xf32>, vector<4x640xf32>, vector<4x640xf32> -> vector<4x640xf32>
    %31 = arith.addf %24, %30 : vector<4x640xf32>
    %c0_30 = arith.constant 0 : index
    %c19_31 = arith.constant 19 : index
    %32 = vector.load %arg13[%c0_30, %c19_31] : memref<1x896xf32, #tpu.memory_space<vmem>>, vector<1x640xf32>
    %33 = arith.addf %26, %32 : vector<1x640xf32>
    %c3 = arith.constant 3 : index
    %c0_32 = arith.constant 0 : index
    %c0_33 = arith.constant 0 : index
    %34 = vector.load %arg4[%c3, %c0_32, %c0_33] : memref<27x4x4xf32, #tpu.memory_space<vmem>>, vector<1x4x4xf32>
    %35 = vector.shape_cast %34 : vector<1x4x4xf32> to vector<4x4xf32>
    %c0_34 = arith.constant 0 : index
    %c27 = arith.constant 27 : index
    %36 = vector.load %arg12[%c0_34, %c27] : memref<4x896xf32, #tpu.memory_space<vmem>>, vector<4x640xf32>
    %cst_35 = arith.constant dense<0.000000e+00> : vector<4x640xf32>
    %37 = tpu.matmul %35, %36, %cst_35 {dimension_numbers = #tpu.dot_dimension_numbers<[1], [0], [0], [1], [0, 0, 1, 1], [], []>} : vector<4x4xf32>, vector<4x640xf32>, vector<4x640xf32> -> vector<4x640xf32>
    %38 = arith.addf %31, %37 : vector<4x640xf32>
    %c0_36 = arith.constant 0 : index
    %c27_37 = arith.constant 27 : index
    %39 = vector.load %arg13[%c0_36, %c27_37] : memref<1x896xf32, #tpu.memory_space<vmem>>, vector<1x640xf32>
    %40 = arith.addf %33, %39 : vector<1x640xf32>
    %c4 = arith.constant 4 : index
    %c0_38 = arith.constant 0 : index
    %c0_39 = arith.constant 0 : index
    %41 = vector.load %arg4[%c4, %c0_38, %c0_39] : memref<27x4x4xf32, #tpu.memory_space<vmem>>, vector<1x4x4xf32>
    %42 = vector.shape_cast %41 : vector<1x4x4xf32> to vector<4x4xf32>
    %c0_40 = arith.constant 0 : index
    %c28 = arith.constant 28 : index
    %43 = vector.load %arg12[%c0_40, %c28] : memref<4x896xf32, #tpu.memory_space<vmem>>, vector<4x640xf32>
    %cst_41 = arith.constant dense<0.000000e+00> : vector<4x640xf32>
    %44 = tpu.matmul %42, %43, %cst_41 {dimension_numbers = #tpu.dot_dimension_numbers<[1], [0], [0], [1], [0, 0, 1, 1], [], []>} : vector<4x4xf32>, vector<4x640xf32>, vector<4x640xf32> -> vector<4x640xf32>
    %45 = arith.addf %38, %44 : vector<4x640xf32>
    %c0_42 = arith.constant 0 : index
    %c28_43 = arith.constant 28 : index
    %46 = vector.load %arg13[%c0_42, %c28_43] : memref<1x896xf32, #tpu.memory_space<vmem>>, vector<1x640xf32>
    %47 = arith.addf %40, %46 : vector<1x640xf32>
    %c5 = arith.constant 5 : index
    %c0_44 = arith.constant 0 : index
    %c0_45 = arith.constant 0 : index
    %48 = vector.load %arg4[%c5, %c0_44, %c0_45] : memref<27x4x4xf32, #tpu.memory_space<vmem>>, vector<1x4x4xf32>
    %49 = vector.shape_cast %48 : vector<1x4x4xf32> to vector<4x4xf32>
    %c0_46 = arith.constant 0 : index
    %c29 = arith.constant 29 : index
    %50 = vector.load %arg12[%c0_46, %c29] : memref<4x896xf32, #tpu.memory_space<vmem>>, vector<4x640xf32>
    %cst_47 = arith.constant dense<0.000000e+00> : vector<4x640xf32>
    %51 = tpu.matmul %49, %50, %cst_47 {dimension_numbers = #tpu.dot_dimension_numbers<[1], [0], [0], [1], [0, 0, 1, 1], [], []>} : vector<4x4xf32>, vector<4x640xf32>, vector<4x640xf32> -> vector<4x640xf32>
    %52 = arith.addf %45, %51 : vector<4x640xf32>
    %c0_48 = arith.constant 0 : index
    %c29_49 = arith.constant 29 : index
    %53 = vector.load %arg13[%c0_48, %c29_49] : memref<1x896xf32, #tpu.memory_space<vmem>>, vector<1x640xf32>
    %54 = arith.addf %47, %53 : vector<1x640xf32>
    %c6 = arith.constant 6 : index
    %c0_50 = arith.constant 0 : index
    %c0_51 = arith.constant 0 : index
    %55 = vector.load %arg4[%c6, %c0_50, %c0_51] : memref<27x4x4xf32, #tpu.memory_space<vmem>>, vector<1x4x4xf32>
    %56 = vector.shape_cast %55 : vector<1x4x4xf32> to vector<4x4xf32>
    %c0_52 = arith.constant 0 : index
    %c37 = arith.constant 37 : index
    %57 = vector.load %arg12[%c0_52, %c37] : memref<4x896xf32, #tpu.memory_space<vmem>>, vector<4x640xf32>
    %cst_53 = arith.constant dense<0.000000e+00> : vector<4x640xf32>
    %58 = tpu.matmul %56, %57, %cst_53 {dimension_numbers = #tpu.dot_dimension_numbers<[1], [0], [0], [1], [0, 0, 1, 1], [], []>} : vector<4x4xf32>, vector<4x640xf32>, vector<4x640xf32> -> vector<4x640xf32>
    %59 = arith.addf %52, %58 : vector<4x640xf32>
    %c0_54 = arith.constant 0 : index
    %c37_55 = arith.constant 37 : index
    %60 = vector.load %arg13[%c0_54, %c37_55] : memref<1x896xf32, #tpu.memory_space<vmem>>, vector<1x640xf32>
    %61 = arith.addf %54, %60 : vector<1x640xf32>
    %c7 = arith.constant 7 : index
    %c0_56 = arith.constant 0 : index
    %c0_57 = arith.constant 0 : index
    %62 = vector.load %arg4[%c7, %c0_56, %c0_57] : memref<27x4x4xf32, #tpu.memory_space<vmem>>, vector<1x4x4xf32>
    %63 = vector.shape_cast %62 : vector<1x4x4xf32> to vector<4x4xf32>
    %c0_58 = arith.constant 0 : index
    %c38 = arith.constant 38 : index
    %64 = vector.load %arg12[%c0_58, %c38] : memref<4x896xf32, #tpu.memory_space<vmem>>, vector<4x640xf32>
    %cst_59 = arith.constant dense<0.000000e+00> : vector<4x640xf32>
    %65 = tpu.matmul %63, %64, %cst_59 {dimension_numbers = #tpu.dot_dimension_numbers<[1], [0], [0], [1], [0, 0, 1, 1], [], []>} : vector<4x4xf32>, vector<4x640xf32>, vector<4x640xf32> -> vector<4x640xf32>
    %66 = arith.addf %59, %65 : vector<4x640xf32>
    %c0_60 = arith.constant 0 : index
    %c38_61 = arith.constant 38 : index
    %67 = vector.load %arg13[%c0_60, %c38_61] : memref<1x896xf32, #tpu.memory_space<vmem>>, vector<1x640xf32>
    %68 = arith.addf %61, %67 : vector<1x640xf32>
    %c8 = arith.constant 8 : index
    %c0_62 = arith.constant 0 : index
    %c0_63 = arith.constant 0 : index
    %69 = vector.load %arg4[%c8, %c0_62, %c0_63] : memref<27x4x4xf32, #tpu.memory_space<vmem>>, vector<1x4x4xf32>
    %70 = vector.shape_cast %69 : vector<1x4x4xf32> to vector<4x4xf32>
    %c0_64 = arith.constant 0 : index
    %c39 = arith.constant 39 : index
    %71 = vector.load %arg12[%c0_64, %c39] : memref<4x896xf32, #tpu.memory_space<vmem>>, vector<4x640xf32>
    %cst_65 = arith.constant dense<0.000000e+00> : vector<4x640xf32>
    %72 = tpu.matmul %70, %71, %cst_65 {dimension_numbers = #tpu.dot_dimension_numbers<[1], [0], [0], [1], [0, 0, 1, 1], [], []>} : vector<4x4xf32>, vector<4x640xf32>, vector<4x640xf32> -> vector<4x640xf32>
    %73 = arith.addf %66, %72 : vector<4x640xf32>
    %c0_66 = arith.constant 0 : index
    %c39_67 = arith.constant 39 : index
    %74 = vector.load %arg13[%c0_66, %c39_67] : memref<1x896xf32, #tpu.memory_space<vmem>>, vector<1x640xf32>
    %75 = arith.addf %68, %74 : vector<1x640xf32>
    %c9 = arith.constant 9 : index
    %c0_68 = arith.constant 0 : index
    %c0_69 = arith.constant 0 : index
    %76 = vector.load %arg4[%c9, %c0_68, %c0_69] : memref<27x4x4xf32, #tpu.memory_space<vmem>>, vector<1x4x4xf32>
    %77 = vector.shape_cast %76 : vector<1x4x4xf32> to vector<4x4xf32>
    %c0_70 = arith.constant 0 : index
    %c117 = arith.constant 117 : index
    %78 = vector.load %arg12[%c0_70, %c117] : memref<4x896xf32, #tpu.memory_space<vmem>>, vector<4x640xf32>
    %cst_71 = arith.constant dense<0.000000e+00> : vector<4x640xf32>
    %79 = tpu.matmul %77, %78, %cst_71 {dimension_numbers = #tpu.dot_dimension_numbers<[1], [0], [0], [1], [0, 0, 1, 1], [], []>} : vector<4x4xf32>, vector<4x640xf32>, vector<4x640xf32> -> vector<4x640xf32>
    %80 = arith.addf %73, %79 : vector<4x640xf32>
    %c0_72 = arith.constant 0 : index
    %c117_73 = arith.constant 117 : index
    %81 = vector.load %arg13[%c0_72, %c117_73] : memref<1x896xf32, #tpu.memory_space<vmem>>, vector<1x640xf32>
    %82 = arith.addf %75, %81 : vector<1x640xf32>
    %c10 = arith.constant 10 : index
    %c0_74 = arith.constant 0 : index
    %c0_75 = arith.constant 0 : index
    %83 = vector.load %arg4[%c10, %c0_74, %c0_75] : memref<27x4x4xf32, #tpu.memory_space<vmem>>, vector<1x4x4xf32>
    %84 = vector.shape_cast %83 : vector<1x4x4xf32> to vector<4x4xf32>
    %c0_76 = arith.constant 0 : index
    %c118 = arith.constant 118 : index
    %85 = vector.load %arg12[%c0_76, %c118] : memref<4x896xf32, #tpu.memory_space<vmem>>, vector<4x640xf32>
    %cst_77 = arith.constant dense<0.000000e+00> : vector<4x640xf32>
    %86 = tpu.matmul %84, %85, %cst_77 {dimension_numbers = #tpu.dot_dimension_numbers<[1], [0], [0], [1], [0, 0, 1, 1], [], []>} : vector<4x4xf32>, vector<4x640xf32>, vector<4x640xf32> -> vector<4x640xf32>
    %87 = arith.addf %80, %86 : vector<4x640xf32>
    %c0_78 = arith.constant 0 : index
    %c118_79 = arith.constant 118 : index
    %88 = vector.load %arg13[%c0_78, %c118_79] : memref<1x896xf32, #tpu.memory_space<vmem>>, vector<1x640xf32>
    %89 = arith.addf %82, %88 : vector<1x640xf32>
    %c11 = arith.constant 11 : index
    %c0_80 = arith.constant 0 : index
    %c0_81 = arith.constant 0 : index
    %90 = vector.load %arg4[%c11, %c0_80, %c0_81] : memref<27x4x4xf32, #tpu.memory_space<vmem>>, vector<1x4x4xf32>
    %91 = vector.shape_cast %90 : vector<1x4x4xf32> to vector<4x4xf32>
    %c0_82 = arith.constant 0 : index
    %c119 = arith.constant 119 : index
    %92 = vector.load %arg12[%c0_82, %c119] : memref<4x896xf32, #tpu.memory_space<vmem>>, vector<4x640xf32>
    %cst_83 = arith.constant dense<0.000000e+00> : vector<4x640xf32>
    %93 = tpu.matmul %91, %92, %cst_83 {dimension_numbers = #tpu.dot_dimension_numbers<[1], [0], [0], [1], [0, 0, 1, 1], [], []>} : vector<4x4xf32>, vector<4x640xf32>, vector<4x640xf32> -> vector<4x640xf32>
    %94 = arith.addf %87, %93 : vector<4x640xf32>
    %c0_84 = arith.constant 0 : index
    %c119_85 = arith.constant 119 : index
    %95 = vector.load %arg13[%c0_84, %c119_85] : memref<1x896xf32, #tpu.memory_space<vmem>>, vector<1x640xf32>
    %96 = arith.addf %89, %95 : vector<1x640xf32>
    %c12 = arith.constant 12 : index
    %c0_86 = arith.constant 0 : index
    %c0_87 = arith.constant 0 : index
    %97 = vector.load %arg4[%c12, %c0_86, %c0_87] : memref<27x4x4xf32, #tpu.memory_space<vmem>>, vector<1x4x4xf32>
    %98 = vector.shape_cast %97 : vector<1x4x4xf32> to vector<4x4xf32>
    %c0_88 = arith.constant 0 : index
    %c127 = arith.constant 127 : index
    %99 = vector.load %arg12[%c0_88, %c127] : memref<4x896xf32, #tpu.memory_space<vmem>>, vector<4x640xf32>
    %cst_89 = arith.constant dense<0.000000e+00> : vector<4x640xf32>
    %100 = tpu.matmul %98, %99, %cst_89 {dimension_numbers = #tpu.dot_dimension_numbers<[1], [0], [0], [1], [0, 0, 1, 1], [], []>} : vector<4x4xf32>, vector<4x640xf32>, vector<4x640xf32> -> vector<4x640xf32>
    %101 = arith.addf %94, %100 : vector<4x640xf32>
    %c0_90 = arith.constant 0 : index
    %c127_91 = arith.constant 127 : index
    %102 = vector.load %arg13[%c0_90, %c127_91] : memref<1x896xf32, #tpu.memory_space<vmem>>, vector<1x640xf32>
    %103 = arith.addf %96, %102 : vector<1x640xf32>
    %c13 = arith.constant 13 : index
    %c0_92 = arith.constant 0 : index
    %c0_93 = arith.constant 0 : index
    %104 = vector.load %arg4[%c13, %c0_92, %c0_93] : memref<27x4x4xf32, #tpu.memory_space<vmem>>, vector<1x4x4xf32>
    %105 = vector.shape_cast %104 : vector<1x4x4xf32> to vector<4x4xf32>
    %c0_94 = arith.constant 0 : index
    %c128 = arith.constant 128 : index
    %106 = vector.load %arg12[%c0_94, %c128] : memref<4x896xf32, #tpu.memory_space<vmem>>, vector<4x640xf32>
    %cst_95 = arith.constant dense<0.000000e+00> : vector<4x640xf32>
    %107 = tpu.matmul %105, %106, %cst_95 {dimension_numbers = #tpu.dot_dimension_numbers<[1], [0], [0], [1], [0, 0, 1, 1], [], []>} : vector<4x4xf32>, vector<4x640xf32>, vector<4x640xf32> -> vector<4x640xf32>
    %108 = arith.addf %101, %107 : vector<4x640xf32>
    %c0_96 = arith.constant 0 : index
    %c128_97 = arith.constant 128 : index
    %109 = vector.load %arg13[%c0_96, %c128_97] : memref<1x896xf32, #tpu.memory_space<vmem>>, vector<1x640xf32>
    %110 = arith.addf %103, %109 : vector<1x640xf32>
    %c14 = arith.constant 14 : index
    %c0_98 = arith.constant 0 : index
    %c0_99 = arith.constant 0 : index
    %111 = vector.load %arg4[%c14, %c0_98, %c0_99] : memref<27x4x4xf32, #tpu.memory_space<vmem>>, vector<1x4x4xf32>
    %112 = vector.shape_cast %111 : vector<1x4x4xf32> to vector<4x4xf32>
    %c0_100 = arith.constant 0 : index
    %c129 = arith.constant 129 : index
    %113 = vector.load %arg12[%c0_100, %c129] : memref<4x896xf32, #tpu.memory_space<vmem>>, vector<4x640xf32>
    %cst_101 = arith.constant dense<0.000000e+00> : vector<4x640xf32>
    %114 = tpu.matmul %112, %113, %cst_101 {dimension_numbers = #tpu.dot_dimension_numbers<[1], [0], [0], [1], [0, 0, 1, 1], [], []>} : vector<4x4xf32>, vector<4x640xf32>, vector<4x640xf32> -> vector<4x640xf32>
    %115 = arith.addf %108, %114 : vector<4x640xf32>
    %c0_102 = arith.constant 0 : index
    %c129_103 = arith.constant 129 : index
    %116 = vector.load %arg13[%c0_102, %c129_103] : memref<1x896xf32, #tpu.memory_space<vmem>>, vector<1x640xf32>
    %117 = arith.addf %110, %116 : vector<1x640xf32>
    %c15 = arith.constant 15 : index
    %c0_104 = arith.constant 0 : index
    %c0_105 = arith.constant 0 : index
    %118 = vector.load %arg4[%c15, %c0_104, %c0_105] : memref<27x4x4xf32, #tpu.memory_space<vmem>>, vector<1x4x4xf32>
    %119 = vector.shape_cast %118 : vector<1x4x4xf32> to vector<4x4xf32>
    %c0_106 = arith.constant 0 : index
    %c137 = arith.constant 137 : index
    %120 = vector.load %arg12[%c0_106, %c137] : memref<4x896xf32, #tpu.memory_space<vmem>>, vector<4x640xf32>
    %cst_107 = arith.constant dense<0.000000e+00> : vector<4x640xf32>
    %121 = tpu.matmul %119, %120, %cst_107 {dimension_numbers = #tpu.dot_dimension_numbers<[1], [0], [0], [1], [0, 0, 1, 1], [], []>} : vector<4x4xf32>, vector<4x640xf32>, vector<4x640xf32> -> vector<4x640xf32>
    %122 = arith.addf %115, %121 : vector<4x640xf32>
    %c0_108 = arith.constant 0 : index
    %c137_109 = arith.constant 137 : index
    %123 = vector.load %arg13[%c0_108, %c137_109] : memref<1x896xf32, #tpu.memory_space<vmem>>, vector<1x640xf32>
    %124 = arith.addf %117, %123 : vector<1x640xf32>
    %c16 = arith.constant 16 : index
    %c0_110 = arith.constant 0 : index
    %c0_111 = arith.constant 0 : index
    %125 = vector.load %arg4[%c16, %c0_110, %c0_111] : memref<27x4x4xf32, #tpu.memory_space<vmem>>, vector<1x4x4xf32>
    %126 = vector.shape_cast %125 : vector<1x4x4xf32> to vector<4x4xf32>
    %c0_112 = arith.constant 0 : index
    %c138 = arith.constant 138 : index
    %127 = vector.load %arg12[%c0_112, %c138] : memref<4x896xf32, #tpu.memory_space<vmem>>, vector<4x640xf32>
    %cst_113 = arith.constant dense<0.000000e+00> : vector<4x640xf32>
    %128 = tpu.matmul %126, %127, %cst_113 {dimension_numbers = #tpu.dot_dimension_numbers<[1], [0], [0], [1], [0, 0, 1, 1], [], []>} : vector<4x4xf32>, vector<4x640xf32>, vector<4x640xf32> -> vector<4x640xf32>
    %129 = arith.addf %122, %128 : vector<4x640xf32>
    %c0_114 = arith.constant 0 : index
    %c138_115 = arith.constant 138 : index
    %130 = vector.load %arg13[%c0_114, %c138_115] : memref<1x896xf32, #tpu.memory_space<vmem>>, vector<1x640xf32>
    %131 = arith.addf %124, %130 : vector<1x640xf32>
    %c17_116 = arith.constant 17 : index
    %c0_117 = arith.constant 0 : index
    %c0_118 = arith.constant 0 : index
    %132 = vector.load %arg4[%c17_116, %c0_117, %c0_118] : memref<27x4x4xf32, #tpu.memory_space<vmem>>, vector<1x4x4xf32>
    %133 = vector.shape_cast %132 : vector<1x4x4xf32> to vector<4x4xf32>
    %c0_119 = arith.constant 0 : index
    %c139 = arith.constant 139 : index
    %134 = vector.load %arg12[%c0_119, %c139] : memref<4x896xf32, #tpu.memory_space<vmem>>, vector<4x640xf32>
    %cst_120 = arith.constant dense<0.000000e+00> : vector<4x640xf32>
    %135 = tpu.matmul %133, %134, %cst_120 {dimension_numbers = #tpu.dot_dimension_numbers<[1], [0], [0], [1], [0, 0, 1, 1], [], []>} : vector<4x4xf32>, vector<4x640xf32>, vector<4x640xf32> -> vector<4x640xf32>
    %136 = arith.addf %129, %135 : vector<4x640xf32>
    %c0_121 = arith.constant 0 : index
    %c139_122 = arith.constant 139 : index
    %137 = vector.load %arg13[%c0_121, %c139_122] : memref<1x896xf32, #tpu.memory_space<vmem>>, vector<1x640xf32>
    %138 = arith.addf %131, %137 : vector<1x640xf32>
    %c18_123 = arith.constant 18 : index
    %c0_124 = arith.constant 0 : index
    %c0_125 = arith.constant 0 : index
    %139 = vector.load %arg4[%c18_123, %c0_124, %c0_125] : memref<27x4x4xf32, #tpu.memory_space<vmem>>, vector<1x4x4xf32>
    %140 = vector.shape_cast %139 : vector<1x4x4xf32> to vector<4x4xf32>
    %c0_126 = arith.constant 0 : index
    %c217 = arith.constant 217 : index
    %141 = vector.load %arg12[%c0_126, %c217] : memref<4x896xf32, #tpu.memory_space<vmem>>, vector<4x640xf32>
    %cst_127 = arith.constant dense<0.000000e+00> : vector<4x640xf32>
    %142 = tpu.matmul %140, %141, %cst_127 {dimension_numbers = #tpu.dot_dimension_numbers<[1], [0], [0], [1], [0, 0, 1, 1], [], []>} : vector<4x4xf32>, vector<4x640xf32>, vector<4x640xf32> -> vector<4x640xf32>
    %143 = arith.addf %136, %142 : vector<4x640xf32>
    %c0_128 = arith.constant 0 : index
    %c217_129 = arith.constant 217 : index
    %144 = vector.load %arg13[%c0_128, %c217_129] : memref<1x896xf32, #tpu.memory_space<vmem>>, vector<1x640xf32>
    %145 = arith.addf %138, %144 : vector<1x640xf32>
    %c19_130 = arith.constant 19 : index
    %c0_131 = arith.constant 0 : index
    %c0_132 = arith.constant 0 : index
    %146 = vector.load %arg4[%c19_130, %c0_131, %c0_132] : memref<27x4x4xf32, #tpu.memory_space<vmem>>, vector<1x4x4xf32>
    %147 = vector.shape_cast %146 : vector<1x4x4xf32> to vector<4x4xf32>
    %c0_133 = arith.constant 0 : index
    %c218 = arith.constant 218 : index
    %148 = vector.load %arg12[%c0_133, %c218] : memref<4x896xf32, #tpu.memory_space<vmem>>, vector<4x640xf32>
    %cst_134 = arith.constant dense<0.000000e+00> : vector<4x640xf32>
    %149 = tpu.matmul %147, %148, %cst_134 {dimension_numbers = #tpu.dot_dimension_numbers<[1], [0], [0], [1], [0, 0, 1, 1], [], []>} : vector<4x4xf32>, vector<4x640xf32>, vector<4x640xf32> -> vector<4x640xf32>
    %150 = arith.addf %143, %149 : vector<4x640xf32>
    %c0_135 = arith.constant 0 : index
    %c218_136 = arith.constant 218 : index
    %151 = vector.load %arg13[%c0_135, %c218_136] : memref<1x896xf32, #tpu.memory_space<vmem>>, vector<1x640xf32>
    %152 = arith.addf %145, %151 : vector<1x640xf32>
    %c20 = arith.constant 20 : index
    %c0_137 = arith.constant 0 : index
    %c0_138 = arith.constant 0 : index
    %153 = vector.load %arg4[%c20, %c0_137, %c0_138] : memref<27x4x4xf32, #tpu.memory_space<vmem>>, vector<1x4x4xf32>
    %154 = vector.shape_cast %153 : vector<1x4x4xf32> to vector<4x4xf32>
    %c0_139 = arith.constant 0 : index
    %c219 = arith.constant 219 : index
    %155 = vector.load %arg12[%c0_139, %c219] : memref<4x896xf32, #tpu.memory_space<vmem>>, vector<4x640xf32>
    %cst_140 = arith.constant dense<0.000000e+00> : vector<4x640xf32>
    %156 = tpu.matmul %154, %155, %cst_140 {dimension_numbers = #tpu.dot_dimension_numbers<[1], [0], [0], [1], [0, 0, 1, 1], [], []>} : vector<4x4xf32>, vector<4x640xf32>, vector<4x640xf32> -> vector<4x640xf32>
    %157 = arith.addf %150, %156 : vector<4x640xf32>
    %c0_141 = arith.constant 0 : index
    %c219_142 = arith.constant 219 : index
    %158 = vector.load %arg13[%c0_141, %c219_142] : memref<1x896xf32, #tpu.memory_space<vmem>>, vector<1x640xf32>
    %159 = arith.addf %152, %158 : vector<1x640xf32>
    %c21 = arith.constant 21 : index
    %c0_143 = arith.constant 0 : index
    %c0_144 = arith.constant 0 : index
    %160 = vector.load %arg4[%c21, %c0_143, %c0_144] : memref<27x4x4xf32, #tpu.memory_space<vmem>>, vector<1x4x4xf32>
    %161 = vector.shape_cast %160 : vector<1x4x4xf32> to vector<4x4xf32>
    %c0_145 = arith.constant 0 : index
    %c227 = arith.constant 227 : index
    %162 = vector.load %arg12[%c0_145, %c227] : memref<4x896xf32, #tpu.memory_space<vmem>>, vector<4x640xf32>
    %cst_146 = arith.constant dense<0.000000e+00> : vector<4x640xf32>
    %163 = tpu.matmul %161, %162, %cst_146 {dimension_numbers = #tpu.dot_dimension_numbers<[1], [0], [0], [1], [0, 0, 1, 1], [], []>} : vector<4x4xf32>, vector<4x640xf32>, vector<4x640xf32> -> vector<4x640xf32>
    %164 = arith.addf %157, %163 : vector<4x640xf32>
    %c0_147 = arith.constant 0 : index
    %c227_148 = arith.constant 227 : index
    %165 = vector.load %arg13[%c0_147, %c227_148] : memref<1x896xf32, #tpu.memory_space<vmem>>, vector<1x640xf32>
    %166 = arith.addf %159, %165 : vector<1x640xf32>
    %c22 = arith.constant 22 : index
    %c0_149 = arith.constant 0 : index
    %c0_150 = arith.constant 0 : index
    %167 = vector.load %arg4[%c22, %c0_149, %c0_150] : memref<27x4x4xf32, #tpu.memory_space<vmem>>, vector<1x4x4xf32>
    %168 = vector.shape_cast %167 : vector<1x4x4xf32> to vector<4x4xf32>
    %c0_151 = arith.constant 0 : index
    %c228 = arith.constant 228 : index
    %169 = vector.load %arg12[%c0_151, %c228] : memref<4x896xf32, #tpu.memory_space<vmem>>, vector<4x640xf32>
    %cst_152 = arith.constant dense<0.000000e+00> : vector<4x640xf32>
    %170 = tpu.matmul %168, %169, %cst_152 {dimension_numbers = #tpu.dot_dimension_numbers<[1], [0], [0], [1], [0, 0, 1, 1], [], []>} : vector<4x4xf32>, vector<4x640xf32>, vector<4x640xf32> -> vector<4x640xf32>
    %171 = arith.addf %164, %170 : vector<4x640xf32>
    %c0_153 = arith.constant 0 : index
    %c228_154 = arith.constant 228 : index
    %172 = vector.load %arg13[%c0_153, %c228_154] : memref<1x896xf32, #tpu.memory_space<vmem>>, vector<1x640xf32>
    %173 = arith.addf %166, %172 : vector<1x640xf32>
    %c23 = arith.constant 23 : index
    %c0_155 = arith.constant 0 : index
    %c0_156 = arith.constant 0 : index
    %174 = vector.load %arg4[%c23, %c0_155, %c0_156] : memref<27x4x4xf32, #tpu.memory_space<vmem>>, vector<1x4x4xf32>
    %175 = vector.shape_cast %174 : vector<1x4x4xf32> to vector<4x4xf32>
    %c0_157 = arith.constant 0 : index
    %c229 = arith.constant 229 : index
    %176 = vector.load %arg12[%c0_157, %c229] : memref<4x896xf32, #tpu.memory_space<vmem>>, vector<4x640xf32>
    %cst_158 = arith.constant dense<0.000000e+00> : vector<4x640xf32>
    %177 = tpu.matmul %175, %176, %cst_158 {dimension_numbers = #tpu.dot_dimension_numbers<[1], [0], [0], [1], [0, 0, 1, 1], [], []>} : vector<4x4xf32>, vector<4x640xf32>, vector<4x640xf32> -> vector<4x640xf32>
    %178 = arith.addf %171, %177 : vector<4x640xf32>
    %c0_159 = arith.constant 0 : index
    %c229_160 = arith.constant 229 : index
    %179 = vector.load %arg13[%c0_159, %c229_160] : memref<1x896xf32, #tpu.memory_space<vmem>>, vector<1x640xf32>
    %180 = arith.addf %173, %179 : vector<1x640xf32>
    %c24 = arith.constant 24 : index
    %c0_161 = arith.constant 0 : index
    %c0_162 = arith.constant 0 : index
    %181 = vector.load %arg4[%c24, %c0_161, %c0_162] : memref<27x4x4xf32, #tpu.memory_space<vmem>>, vector<1x4x4xf32>
    %182 = vector.shape_cast %181 : vector<1x4x4xf32> to vector<4x4xf32>
    %c0_163 = arith.constant 0 : index
    %c237 = arith.constant 237 : index
    %183 = vector.load %arg12[%c0_163, %c237] : memref<4x896xf32, #tpu.memory_space<vmem>>, vector<4x640xf32>
    %cst_164 = arith.constant dense<0.000000e+00> : vector<4x640xf32>
    %184 = tpu.matmul %182, %183, %cst_164 {dimension_numbers = #tpu.dot_dimension_numbers<[1], [0], [0], [1], [0, 0, 1, 1], [], []>} : vector<4x4xf32>, vector<4x640xf32>, vector<4x640xf32> -> vector<4x640xf32>
    %185 = arith.addf %178, %184 : vector<4x640xf32>
    %c0_165 = arith.constant 0 : index
    %c237_166 = arith.constant 237 : index
    %186 = vector.load %arg13[%c0_165, %c237_166] : memref<1x896xf32, #tpu.memory_space<vmem>>, vector<1x640xf32>
    %187 = arith.addf %180, %186 : vector<1x640xf32>
    %c25 = arith.constant 25 : index
    %c0_167 = arith.constant 0 : index
    %c0_168 = arith.constant 0 : index
    %188 = vector.load %arg4[%c25, %c0_167, %c0_168] : memref<27x4x4xf32, #tpu.memory_space<vmem>>, vector<1x4x4xf32>
    %189 = vector.shape_cast %188 : vector<1x4x4xf32> to vector<4x4xf32>
    %c0_169 = arith.constant 0 : index
    %c238 = arith.constant 238 : index
    %190 = vector.load %arg12[%c0_169, %c238] : memref<4x896xf32, #tpu.memory_space<vmem>>, vector<4x640xf32>
    %cst_170 = arith.constant dense<0.000000e+00> : vector<4x640xf32>
    %191 = tpu.matmul %189, %190, %cst_170 {dimension_numbers = #tpu.dot_dimension_numbers<[1], [0], [0], [1], [0, 0, 1, 1], [], []>} : vector<4x4xf32>, vector<4x640xf32>, vector<4x640xf32> -> vector<4x640xf32>
    %192 = arith.addf %185, %191 : vector<4x640xf32>
    %c0_171 = arith.constant 0 : index
    %c238_172 = arith.constant 238 : index
    %193 = vector.load %arg13[%c0_171, %c238_172] : memref<1x896xf32, #tpu.memory_space<vmem>>, vector<1x640xf32>
    %194 = arith.addf %187, %193 : vector<1x640xf32>
    %c26 = arith.constant 26 : index
    %c0_173 = arith.constant 0 : index
    %c0_174 = arith.constant 0 : index
    %195 = vector.load %arg4[%c26, %c0_173, %c0_174] : memref<27x4x4xf32, #tpu.memory_space<vmem>>, vector<1x4x4xf32>
    %196 = vector.shape_cast %195 : vector<1x4x4xf32> to vector<4x4xf32>
    %c0_175 = arith.constant 0 : index
    %c239 = arith.constant 239 : index
    %197 = vector.load %arg12[%c0_175, %c239] : memref<4x896xf32, #tpu.memory_space<vmem>>, vector<4x640xf32>
    %cst_176 = arith.constant dense<0.000000e+00> : vector<4x640xf32>
    %198 = tpu.matmul %196, %197, %cst_176 {dimension_numbers = #tpu.dot_dimension_numbers<[1], [0], [0], [1], [0, 0, 1, 1], [], []>} : vector<4x4xf32>, vector<4x640xf32>, vector<4x640xf32> -> vector<4x640xf32>
    %199 = arith.addf %192, %198 : vector<4x640xf32>
    %c0_177 = arith.constant 0 : index
    %c239_178 = arith.constant 239 : index
    %200 = vector.load %arg13[%c0_177, %c239_178] : memref<1x896xf32, #tpu.memory_space<vmem>>, vector<1x640xf32>
    %201 = arith.addf %194, %200 : vector<1x640xf32>
    %cst_179 = arith.constant 0.000000e+00 : f32
    %cst_180 = arith.constant 1.000000e+00 : f32
    %202 = vector.broadcast %cst_179 : f32 to vector<1x640xf32>
    %203 = arith.maximumf %202, %201 : vector<1x640xf32>
    %204 = vector.broadcast %cst_180 : f32 to vector<1x640xf32>
    %205 = arith.minimumf %204, %203 : vector<1x640xf32>
    %cst_181 = arith.constant 9.99999993E-9 : f32
    %206 = vector.broadcast %cst_181 : f32 to vector<1x640xf32>
    %207 = arith.addf %201, %206 : vector<1x640xf32>
    %208 = tpu.reciprocal %207 {approx = true} : vector<1x640xf32> -> vector<1x640xf32>
    %209 = arith.mulf %207, %208 : vector<1x640xf32>
    %cst_182 = arith.constant 2.000000e+00 : f32
    %210 = vector.broadcast %cst_182 : f32 to vector<1x640xf32>
    %211 = arith.subf %210, %209 : vector<1x640xf32>
    %212 = arith.mulf %208, %211 : vector<1x640xf32>
    %cst_183 = arith.constant 1.080000e+02 : f32
    %213 = vector.broadcast %cst_183 : f32 to vector<1x640xf32>
    %214 = arith.mulf %213, %212 : vector<1x640xf32>
    %215 = arith.mulf %214, %205 : vector<1x640xf32>
    %216 = vector.broadcast %215 : vector<1x640xf32> to vector<4x640xf32>
    %217 = arith.mulf %199, %216 : vector<4x640xf32>
    %c0_184 = arith.constant 0 : index
    %c0_185 = arith.constant 0 : index
    %218 = vector.load %arg5[%c0_184, %c0_185] : memref<4x1xf32, #tpu.memory_space<vmem>>, vector<4x1xf32>
    %219 = vector.broadcast %218 : vector<4x1xf32> to vector<4x640xf32>
    %220 = arith.mulf %217, %219 : vector<4x640xf32>
    %c0_186 = arith.constant 0 : index
    %c0_187 = arith.constant 0 : index
    %221 = vector.load %arg6[%c0_186, %c0_187] : memref<4x1xf32, #tpu.memory_space<vmem>>, vector<4x1xf32>
    %222 = vector.broadcast %221 : vector<4x1xf32> to vector<4x640xf32>
    %223 = arith.addf %220, %222 : vector<4x640xf32>
    %cst_188 = arith.constant 0.000000e+00 : f32
    %224 = vector.broadcast %cst_188 : f32 to vector<4x640xf32>
    %225 = arith.subf %224, %223 : vector<4x640xf32>
    %226 = math.exp %225 : vector<4x640xf32>
    %cst_189 = arith.constant 1.000000e+00 : f32
    %227 = vector.broadcast %cst_189 : f32 to vector<4x640xf32>
    %228 = arith.addf %227, %226 : vector<4x640xf32>
    %cst_190 = arith.constant 1.000000e+00 : f32
    %229 = vector.broadcast %cst_190 : f32 to vector<4x640xf32>
    %230 = arith.divf %229, %228 : vector<4x640xf32>
    %231 = arith.mulf %223, %230 : vector<4x640xf32>
    %232 = vector.broadcast %5 : vector<1x640xf32> to vector<4x640xf32>
    %233 = arith.mulf %231, %232 : vector<4x640xf32>
    %cst_191 = arith.constant 0.000000e+00 : f32
    %234 = vector.broadcast %cst_191 : f32 to vector<4x896xf32>
    %c0_192 = arith.constant 0 : index
    %c0_193 = arith.constant 0 : index
    %235 = vector.load %arg14[%c0_192, %c0_193] : memref<4x896xf32, #tpu.memory_space<vmem>>, vector<4x896xf32>
    tpu.vector_store %arg14[%c0_192, %c0_193], %234 {strides = array<i32>} : memref<4x896xf32, #tpu.memory_space<vmem>>, vector<4x896xf32>,
    %cst_194 = arith.constant 0.000000e+00 : f32
    %236 = vector.broadcast %cst_194 : f32 to vector<1x896xf32>
    %c0_195 = arith.constant 0 : index
    %c0_196 = arith.constant 0 : index
    %237 = vector.load %arg15[%c0_195, %c0_196] : memref<1x896xf32, #tpu.memory_space<vmem>>, vector<1x896xf32>
    tpu.vector_store %arg15[%c0_195, %c0_196], %236 {strides = array<i32>} : memref<1x896xf32, #tpu.memory_space<vmem>>, vector<1x896xf32>,
    %c0_197 = arith.constant 0 : index
    %c128_198 = arith.constant 128 : index
    %238 = vector.load %arg14[%c0_197, %c128_198] : memref<4x896xf32, #tpu.memory_space<vmem>>, vector<4x640xf32>
    tpu.vector_store %arg14[%c0_197, %c128_198], %233 {strides = array<i32>} : memref<4x896xf32, #tpu.memory_space<vmem>>, vector<4x640xf32>,
    %239 = arith.mulf %205, %5 : vector<1x640xf32>
    %c0_199 = arith.constant 0 : index
    %c128_200 = arith.constant 128 : index
    %240 = vector.load %arg15[%c0_199, %c128_200] : memref<1x896xf32, #tpu.memory_space<vmem>>, vector<1x640xf32>
    tpu.vector_store %arg15[%c0_199, %c128_200], %239 {strides = array<i32>} : memref<1x896xf32, #tpu.memory_space<vmem>>, vector<1x640xf32>,
    %cst_201 = arith.constant 0.000000e+00 : f32
    %241 = vector.broadcast %cst_201 : f32 to vector<4x640xf32>
    %cst_202 = arith.constant 0.000000e+00 : f32
    %242 = vector.broadcast %cst_202 : f32 to vector<1x640xf32>
    %c0_203 = arith.constant 0 : index
    %c0_204 = arith.constant 0 : index
    %c0_205 = arith.constant 0 : index
    %243 = vector.load %arg7[%c0_203, %c0_204, %c0_205] : memref<27x4x4xf32, #tpu.memory_space<vmem>>, vector<1x4x4xf32>
    %244 = vector.shape_cast %243 : vector<1x4x4xf32> to vector<4x4xf32>
    %c0_206 = arith.constant 0 : index
    %c17_207 = arith.constant 17 : index
    %245 = vector.load %arg14[%c0_206, %c17_207] : memref<4x896xf32, #tpu.memory_space<vmem>>, vector<4x640xf32>
    %cst_208 = arith.constant dense<0.000000e+00> : vector<4x640xf32>
    %246 = tpu.matmul %244, %245, %cst_208 {dimension_numbers = #tpu.dot_dimension_numbers<[1], [0], [0], [1], [0, 0, 1, 1], [], []>} : vector<4x4xf32>, vector<4x640xf32>, vector<4x640xf32> -> vector<4x640xf32>
    %247 = arith.addf %241, %246 : vector<4x640xf32>
    %c0_209 = arith.constant 0 : index
    %c17_210 = arith.constant 17 : index
    %248 = vector.load %arg15[%c0_209, %c17_210] : memref<1x896xf32, #tpu.memory_space<vmem>>, vector<1x640xf32>
    %249 = arith.addf %242, %248 : vector<1x640xf32>
    %c1_211 = arith.constant 1 : index
    %c0_212 = arith.constant 0 : index
    %c0_213 = arith.constant 0 : index
    %250 = vector.load %arg7[%c1_211, %c0_212, %c0_213] : memref<27x4x4xf32, #tpu.memory_space<vmem>>, vector<1x4x4xf32>
    %251 = vector.shape_cast %250 : vector<1x4x4xf32> to vector<4x4xf32>
    %c0_214 = arith.constant 0 : index
    %c18_215 = arith.constant 18 : index
    %252 = vector.load %arg14[%c0_214, %c18_215] : memref<4x896xf32, #tpu.memory_space<vmem>>, vector<4x640xf32>
    %cst_216 = arith.constant dense<0.000000e+00> : vector<4x640xf32>
    %253 = tpu.matmul %251, %252, %cst_216 {dimension_numbers = #tpu.dot_dimension_numbers<[1], [0], [0], [1], [0, 0, 1, 1], [], []>} : vector<4x4xf32>, vector<4x640xf32>, vector<4x640xf32> -> vector<4x640xf32>
    %254 = arith.addf %247, %253 : vector<4x640xf32>
    %c0_217 = arith.constant 0 : index
    %c18_218 = arith.constant 18 : index
    %255 = vector.load %arg15[%c0_217, %c18_218] : memref<1x896xf32, #tpu.memory_space<vmem>>, vector<1x640xf32>
    %256 = arith.addf %249, %255 : vector<1x640xf32>
    %c2_219 = arith.constant 2 : index
    %c0_220 = arith.constant 0 : index
    %c0_221 = arith.constant 0 : index
    %257 = vector.load %arg7[%c2_219, %c0_220, %c0_221] : memref<27x4x4xf32, #tpu.memory_space<vmem>>, vector<1x4x4xf32>
    %258 = vector.shape_cast %257 : vector<1x4x4xf32> to vector<4x4xf32>
    %c0_222 = arith.constant 0 : index
    %c19_223 = arith.constant 19 : index
    %259 = vector.load %arg14[%c0_222, %c19_223] : memref<4x896xf32, #tpu.memory_space<vmem>>, vector<4x640xf32>
    %cst_224 = arith.constant dense<0.000000e+00> : vector<4x640xf32>
    %260 = tpu.matmul %258, %259, %cst_224 {dimension_numbers = #tpu.dot_dimension_numbers<[1], [0], [0], [1], [0, 0, 1, 1], [], []>} : vector<4x4xf32>, vector<4x640xf32>, vector<4x640xf32> -> vector<4x640xf32>
    %261 = arith.addf %254, %260 : vector<4x640xf32>
    %c0_225 = arith.constant 0 : index
    %c19_226 = arith.constant 19 : index
    %262 = vector.load %arg15[%c0_225, %c19_226] : memref<1x896xf32, #tpu.memory_space<vmem>>, vector<1x640xf32>
    %263 = arith.addf %256, %262 : vector<1x640xf32>
    %c3_227 = arith.constant 3 : index
    %c0_228 = arith.constant 0 : index
    %c0_229 = arith.constant 0 : index
    %264 = vector.load %arg7[%c3_227, %c0_228, %c0_229] : memref<27x4x4xf32, #tpu.memory_space<vmem>>, vector<1x4x4xf32>
    %265 = vector.shape_cast %264 : vector<1x4x4xf32> to vector<4x4xf32>
    %c0_230 = arith.constant 0 : index
    %c27_231 = arith.constant 27 : index
    %266 = vector.load %arg14[%c0_230, %c27_231] : memref<4x896xf32, #tpu.memory_space<vmem>>, vector<4x640xf32>
    %cst_232 = arith.constant dense<0.000000e+00> : vector<4x640xf32>
    %267 = tpu.matmul %265, %266, %cst_232 {dimension_numbers = #tpu.dot_dimension_numbers<[1], [0], [0], [1], [0, 0, 1, 1], [], []>} : vector<4x4xf32>, vector<4x640xf32>, vector<4x640xf32> -> vector<4x640xf32>
    %268 = arith.addf %261, %267 : vector<4x640xf32>
    %c0_233 = arith.constant 0 : index
    %c27_234 = arith.constant 27 : index
    %269 = vector.load %arg15[%c0_233, %c27_234] : memref<1x896xf32, #tpu.memory_space<vmem>>, vector<1x640xf32>
    %270 = arith.addf %263, %269 : vector<1x640xf32>
    %c4_235 = arith.constant 4 : index
    %c0_236 = arith.constant 0 : index
    %c0_237 = arith.constant 0 : index
    %271 = vector.load %arg7[%c4_235, %c0_236, %c0_237] : memref<27x4x4xf32, #tpu.memory_space<vmem>>, vector<1x4x4xf32>
    %272 = vector.shape_cast %271 : vector<1x4x4xf32> to vector<4x4xf32>
    %c0_238 = arith.constant 0 : index
    %c28_239 = arith.constant 28 : index
    %273 = vector.load %arg14[%c0_238, %c28_239] : memref<4x896xf32, #tpu.memory_space<vmem>>, vector<4x640xf32>
    %cst_240 = arith.constant dense<0.000000e+00> : vector<4x640xf32>
    %274 = tpu.matmul %272, %273, %cst_240 {dimension_numbers = #tpu.dot_dimension_numbers<[1], [0], [0], [1], [0, 0, 1, 1], [], []>} : vector<4x4xf32>, vector<4x640xf32>, vector<4x640xf32> -> vector<4x640xf32>
    %275 = arith.addf %268, %274 : vector<4x640xf32>
    %c0_241 = arith.constant 0 : index
    %c28_242 = arith.constant 28 : index
    %276 = vector.load %arg15[%c0_241, %c28_242] : memref<1x896xf32, #tpu.memory_space<vmem>>, vector<1x640xf32>
    %277 = arith.addf %270, %276 : vector<1x640xf32>
    %c5_243 = arith.constant 5 : index
    %c0_244 = arith.constant 0 : index
    %c0_245 = arith.constant 0 : index
    %278 = vector.load %arg7[%c5_243, %c0_244, %c0_245] : memref<27x4x4xf32, #tpu.memory_space<vmem>>, vector<1x4x4xf32>
    %279 = vector.shape_cast %278 : vector<1x4x4xf32> to vector<4x4xf32>
    %c0_246 = arith.constant 0 : index
    %c29_247 = arith.constant 29 : index
    %280 = vector.load %arg14[%c0_246, %c29_247] : memref<4x896xf32, #tpu.memory_space<vmem>>, vector<4x640xf32>
    %cst_248 = arith.constant dense<0.000000e+00> : vector<4x640xf32>
    %281 = tpu.matmul %279, %280, %cst_248 {dimension_numbers = #tpu.dot_dimension_numbers<[1], [0], [0], [1], [0, 0, 1, 1], [], []>} : vector<4x4xf32>, vector<4x640xf32>, vector<4x640xf32> -> vector<4x640xf32>
    %282 = arith.addf %275, %281 : vector<4x640xf32>
    %c0_249 = arith.constant 0 : index
    %c29_250 = arith.constant 29 : index
    %283 = vector.load %arg15[%c0_249, %c29_250] : memref<1x896xf32, #tpu.memory_space<vmem>>, vector<1x640xf32>
    %284 = arith.addf %277, %283 : vector<1x640xf32>
    %c6_251 = arith.constant 6 : index
    %c0_252 = arith.constant 0 : index
    %c0_253 = arith.constant 0 : index
    %285 = vector.load %arg7[%c6_251, %c0_252, %c0_253] : memref<27x4x4xf32, #tpu.memory_space<vmem>>, vector<1x4x4xf32>
    %286 = vector.shape_cast %285 : vector<1x4x4xf32> to vector<4x4xf32>
    %c0_254 = arith.constant 0 : index
    %c37_255 = arith.constant 37 : index
    %287 = vector.load %arg14[%c0_254, %c37_255] : memref<4x896xf32, #tpu.memory_space<vmem>>, vector<4x640xf32>
    %cst_256 = arith.constant dense<0.000000e+00> : vector<4x640xf32>
    %288 = tpu.matmul %286, %287, %cst_256 {dimension_numbers = #tpu.dot_dimension_numbers<[1], [0], [0], [1], [0, 0, 1, 1], [], []>} : vector<4x4xf32>, vector<4x640xf32>, vector<4x640xf32> -> vector<4x640xf32>
    %289 = arith.addf %282, %288 : vector<4x640xf32>
    %c0_257 = arith.constant 0 : index
    %c37_258 = arith.constant 37 : index
    %290 = vector.load %arg15[%c0_257, %c37_258] : memref<1x896xf32, #tpu.memory_space<vmem>>, vector<1x640xf32>
    %291 = arith.addf %284, %290 : vector<1x640xf32>
    %c7_259 = arith.constant 7 : index
    %c0_260 = arith.constant 0 : index
    %c0_261 = arith.constant 0 : index
    %292 = vector.load %arg7[%c7_259, %c0_260, %c0_261] : memref<27x4x4xf32, #tpu.memory_space<vmem>>, vector<1x4x4xf32>
    %293 = vector.shape_cast %292 : vector<1x4x4xf32> to vector<4x4xf32>
    %c0_262 = arith.constant 0 : index
    %c38_263 = arith.constant 38 : index
    %294 = vector.load %arg14[%c0_262, %c38_263] : memref<4x896xf32, #tpu.memory_space<vmem>>, vector<4x640xf32>
    %cst_264 = arith.constant dense<0.000000e+00> : vector<4x640xf32>
    %295 = tpu.matmul %293, %294, %cst_264 {dimension_numbers = #tpu.dot_dimension_numbers<[1], [0], [0], [1], [0, 0, 1, 1], [], []>} : vector<4x4xf32>, vector<4x640xf32>, vector<4x640xf32> -> vector<4x640xf32>
    %296 = arith.addf %289, %295 : vector<4x640xf32>
    %c0_265 = arith.constant 0 : index
    %c38_266 = arith.constant 38 : index
    %297 = vector.load %arg15[%c0_265, %c38_266] : memref<1x896xf32, #tpu.memory_space<vmem>>, vector<1x640xf32>
    %298 = arith.addf %291, %297 : vector<1x640xf32>
    %c8_267 = arith.constant 8 : index
    %c0_268 = arith.constant 0 : index
    %c0_269 = arith.constant 0 : index
    %299 = vector.load %arg7[%c8_267, %c0_268, %c0_269] : memref<27x4x4xf32, #tpu.memory_space<vmem>>, vector<1x4x4xf32>
    %300 = vector.shape_cast %299 : vector<1x4x4xf32> to vector<4x4xf32>
    %c0_270 = arith.constant 0 : index
    %c39_271 = arith.constant 39 : index
    %301 = vector.load %arg14[%c0_270, %c39_271] : memref<4x896xf32, #tpu.memory_space<vmem>>, vector<4x640xf32>
    %cst_272 = arith.constant dense<0.000000e+00> : vector<4x640xf32>
    %302 = tpu.matmul %300, %301, %cst_272 {dimension_numbers = #tpu.dot_dimension_numbers<[1], [0], [0], [1], [0, 0, 1, 1], [], []>} : vector<4x4xf32>, vector<4x640xf32>, vector<4x640xf32> -> vector<4x640xf32>
    %303 = arith.addf %296, %302 : vector<4x640xf32>
    %c0_273 = arith.constant 0 : index
    %c39_274 = arith.constant 39 : index
    %304 = vector.load %arg15[%c0_273, %c39_274] : memref<1x896xf32, #tpu.memory_space<vmem>>, vector<1x640xf32>
    %305 = arith.addf %298, %304 : vector<1x640xf32>
    %c9_275 = arith.constant 9 : index
    %c0_276 = arith.constant 0 : index
    %c0_277 = arith.constant 0 : index
    %306 = vector.load %arg7[%c9_275, %c0_276, %c0_277] : memref<27x4x4xf32, #tpu.memory_space<vmem>>, vector<1x4x4xf32>
    %307 = vector.shape_cast %306 : vector<1x4x4xf32> to vector<4x4xf32>
    %c0_278 = arith.constant 0 : index
    %c117_279 = arith.constant 117 : index
    %308 = vector.load %arg14[%c0_278, %c117_279] : memref<4x896xf32, #tpu.memory_space<vmem>>, vector<4x640xf32>
    %cst_280 = arith.constant dense<0.000000e+00> : vector<4x640xf32>
    %309 = tpu.matmul %307, %308, %cst_280 {dimension_numbers = #tpu.dot_dimension_numbers<[1], [0], [0], [1], [0, 0, 1, 1], [], []>} : vector<4x4xf32>, vector<4x640xf32>, vector<4x640xf32> -> vector<4x640xf32>
    %310 = arith.addf %303, %309 : vector<4x640xf32>
    %c0_281 = arith.constant 0 : index
    %c117_282 = arith.constant 117 : index
    %311 = vector.load %arg15[%c0_281, %c117_282] : memref<1x896xf32, #tpu.memory_space<vmem>>, vector<1x640xf32>
    %312 = arith.addf %305, %311 : vector<1x640xf32>
    %c10_283 = arith.constant 10 : index
    %c0_284 = arith.constant 0 : index
    %c0_285 = arith.constant 0 : index
    %313 = vector.load %arg7[%c10_283, %c0_284, %c0_285] : memref<27x4x4xf32, #tpu.memory_space<vmem>>, vector<1x4x4xf32>
    %314 = vector.shape_cast %313 : vector<1x4x4xf32> to vector<4x4xf32>
    %c0_286 = arith.constant 0 : index
    %c118_287 = arith.constant 118 : index
    %315 = vector.load %arg14[%c0_286, %c118_287] : memref<4x896xf32, #tpu.memory_space<vmem>>, vector<4x640xf32>
    %cst_288 = arith.constant dense<0.000000e+00> : vector<4x640xf32>
    %316 = tpu.matmul %314, %315, %cst_288 {dimension_numbers = #tpu.dot_dimension_numbers<[1], [0], [0], [1], [0, 0, 1, 1], [], []>} : vector<4x4xf32>, vector<4x640xf32>, vector<4x640xf32> -> vector<4x640xf32>
    %317 = arith.addf %310, %316 : vector<4x640xf32>
    %c0_289 = arith.constant 0 : index
    %c118_290 = arith.constant 118 : index
    %318 = vector.load %arg15[%c0_289, %c118_290] : memref<1x896xf32, #tpu.memory_space<vmem>>, vector<1x640xf32>
    %319 = arith.addf %312, %318 : vector<1x640xf32>
    %c11_291 = arith.constant 11 : index
    %c0_292 = arith.constant 0 : index
    %c0_293 = arith.constant 0 : index
    %320 = vector.load %arg7[%c11_291, %c0_292, %c0_293] : memref<27x4x4xf32, #tpu.memory_space<vmem>>, vector<1x4x4xf32>
    %321 = vector.shape_cast %320 : vector<1x4x4xf32> to vector<4x4xf32>
    %c0_294 = arith.constant 0 : index
    %c119_295 = arith.constant 119 : index
    %322 = vector.load %arg14[%c0_294, %c119_295] : memref<4x896xf32, #tpu.memory_space<vmem>>, vector<4x640xf32>
    %cst_296 = arith.constant dense<0.000000e+00> : vector<4x640xf32>
    %323 = tpu.matmul %321, %322, %cst_296 {dimension_numbers = #tpu.dot_dimension_numbers<[1], [0], [0], [1], [0, 0, 1, 1], [], []>} : vector<4x4xf32>, vector<4x640xf32>, vector<4x640xf32> -> vector<4x640xf32>
    %324 = arith.addf %317, %323 : vector<4x640xf32>
    %c0_297 = arith.constant 0 : index
    %c119_298 = arith.constant 119 : index
    %325 = vector.load %arg15[%c0_297, %c119_298] : memref<1x896xf32, #tpu.memory_space<vmem>>, vector<1x640xf32>
    %326 = arith.addf %319, %325 : vector<1x640xf32>
    %c12_299 = arith.constant 12 : index
    %c0_300 = arith.constant 0 : index
    %c0_301 = arith.constant 0 : index
    %327 = vector.load %arg7[%c12_299, %c0_300, %c0_301] : memref<27x4x4xf32, #tpu.memory_space<vmem>>, vector<1x4x4xf32>
    %328 = vector.shape_cast %327 : vector<1x4x4xf32> to vector<4x4xf32>
    %c0_302 = arith.constant 0 : index
    %c127_303 = arith.constant 127 : index
    %329 = vector.load %arg14[%c0_302, %c127_303] : memref<4x896xf32, #tpu.memory_space<vmem>>, vector<4x640xf32>
    %cst_304 = arith.constant dense<0.000000e+00> : vector<4x640xf32>
    %330 = tpu.matmul %328, %329, %cst_304 {dimension_numbers = #tpu.dot_dimension_numbers<[1], [0], [0], [1], [0, 0, 1, 1], [], []>} : vector<4x4xf32>, vector<4x640xf32>, vector<4x640xf32> -> vector<4x640xf32>
    %331 = arith.addf %324, %330 : vector<4x640xf32>
    %c0_305 = arith.constant 0 : index
    %c127_306 = arith.constant 127 : index
    %332 = vector.load %arg15[%c0_305, %c127_306] : memref<1x896xf32, #tpu.memory_space<vmem>>, vector<1x640xf32>
    %333 = arith.addf %326, %332 : vector<1x640xf32>
    %c13_307 = arith.constant 13 : index
    %c0_308 = arith.constant 0 : index
    %c0_309 = arith.constant 0 : index
    %334 = vector.load %arg7[%c13_307, %c0_308, %c0_309] : memref<27x4x4xf32, #tpu.memory_space<vmem>>, vector<1x4x4xf32>
    %335 = vector.shape_cast %334 : vector<1x4x4xf32> to vector<4x4xf32>
    %c0_310 = arith.constant 0 : index
    %c128_311 = arith.constant 128 : index
    %336 = vector.load %arg14[%c0_310, %c128_311] : memref<4x896xf32, #tpu.memory_space<vmem>>, vector<4x640xf32>
    %cst_312 = arith.constant dense<0.000000e+00> : vector<4x640xf32>
    %337 = tpu.matmul %335, %336, %cst_312 {dimension_numbers = #tpu.dot_dimension_numbers<[1], [0], [0], [1], [0, 0, 1, 1], [], []>} : vector<4x4xf32>, vector<4x640xf32>, vector<4x640xf32> -> vector<4x640xf32>
    %338 = arith.addf %331, %337 : vector<4x640xf32>
    %c0_313 = arith.constant 0 : index
    %c128_314 = arith.constant 128 : index
    %339 = vector.load %arg15[%c0_313, %c128_314] : memref<1x896xf32, #tpu.memory_space<vmem>>, vector<1x640xf32>
    %340 = arith.addf %333, %339 : vector<1x640xf32>
    %c14_315 = arith.constant 14 : index
    %c0_316 = arith.constant 0 : index
    %c0_317 = arith.constant 0 : index
    %341 = vector.load %arg7[%c14_315, %c0_316, %c0_317] : memref<27x4x4xf32, #tpu.memory_space<vmem>>, vector<1x4x4xf32>
    %342 = vector.shape_cast %341 : vector<1x4x4xf32> to vector<4x4xf32>
    %c0_318 = arith.constant 0 : index
    %c129_319 = arith.constant 129 : index
    %343 = vector.load %arg14[%c0_318, %c129_319] : memref<4x896xf32, #tpu.memory_space<vmem>>, vector<4x640xf32>
    %cst_320 = arith.constant dense<0.000000e+00> : vector<4x640xf32>
    %344 = tpu.matmul %342, %343, %cst_320 {dimension_numbers = #tpu.dot_dimension_numbers<[1], [0], [0], [1], [0, 0, 1, 1], [], []>} : vector<4x4xf32>, vector<4x640xf32>, vector<4x640xf32> -> vector<4x640xf32>
    %345 = arith.addf %338, %344 : vector<4x640xf32>
    %c0_321 = arith.constant 0 : index
    %c129_322 = arith.constant 129 : index
    %346 = vector.load %arg15[%c0_321, %c129_322] : memref<1x896xf32, #tpu.memory_space<vmem>>, vector<1x640xf32>
    %347 = arith.addf %340, %346 : vector<1x640xf32>
    %c15_323 = arith.constant 15 : index
    %c0_324 = arith.constant 0 : index
    %c0_325 = arith.constant 0 : index
    %348 = vector.load %arg7[%c15_323, %c0_324, %c0_325] : memref<27x4x4xf32, #tpu.memory_space<vmem>>, vector<1x4x4xf32>
    %349 = vector.shape_cast %348 : vector<1x4x4xf32> to vector<4x4xf32>
    %c0_326 = arith.constant 0 : index
    %c137_327 = arith.constant 137 : index
    %350 = vector.load %arg14[%c0_326, %c137_327] : memref<4x896xf32, #tpu.memory_space<vmem>>, vector<4x640xf32>
    %cst_328 = arith.constant dense<0.000000e+00> : vector<4x640xf32>
    %351 = tpu.matmul %349, %350, %cst_328 {dimension_numbers = #tpu.dot_dimension_numbers<[1], [0], [0], [1], [0, 0, 1, 1], [], []>} : vector<4x4xf32>, vector<4x640xf32>, vector<4x640xf32> -> vector<4x640xf32>
    %352 = arith.addf %345, %351 : vector<4x640xf32>
    %c0_329 = arith.constant 0 : index
    %c137_330 = arith.constant 137 : index
    %353 = vector.load %arg15[%c0_329, %c137_330] : memref<1x896xf32, #tpu.memory_space<vmem>>, vector<1x640xf32>
    %354 = arith.addf %347, %353 : vector<1x640xf32>
    %c16_331 = arith.constant 16 : index
    %c0_332 = arith.constant 0 : index
    %c0_333 = arith.constant 0 : index
    %355 = vector.load %arg7[%c16_331, %c0_332, %c0_333] : memref<27x4x4xf32, #tpu.memory_space<vmem>>, vector<1x4x4xf32>
    %356 = vector.shape_cast %355 : vector<1x4x4xf32> to vector<4x4xf32>
    %c0_334 = arith.constant 0 : index
    %c138_335 = arith.constant 138 : index
    %357 = vector.load %arg14[%c0_334, %c138_335] : memref<4x896xf32, #tpu.memory_space<vmem>>, vector<4x640xf32>
    %cst_336 = arith.constant dense<0.000000e+00> : vector<4x640xf32>
    %358 = tpu.matmul %356, %357, %cst_336 {dimension_numbers = #tpu.dot_dimension_numbers<[1], [0], [0], [1], [0, 0, 1, 1], [], []>} : vector<4x4xf32>, vector<4x640xf32>, vector<4x640xf32> -> vector<4x640xf32>
    %359 = arith.addf %352, %358 : vector<4x640xf32>
    %c0_337 = arith.constant 0 : index
    %c138_338 = arith.constant 138 : index
    %360 = vector.load %arg15[%c0_337, %c138_338] : memref<1x896xf32, #tpu.memory_space<vmem>>, vector<1x640xf32>
    %361 = arith.addf %354, %360 : vector<1x640xf32>
    %c17_339 = arith.constant 17 : index
    %c0_340 = arith.constant 0 : index
    %c0_341 = arith.constant 0 : index
    %362 = vector.load %arg7[%c17_339, %c0_340, %c0_341] : memref<27x4x4xf32, #tpu.memory_space<vmem>>, vector<1x4x4xf32>
    %363 = vector.shape_cast %362 : vector<1x4x4xf32> to vector<4x4xf32>
    %c0_342 = arith.constant 0 : index
    %c139_343 = arith.constant 139 : index
    %364 = vector.load %arg14[%c0_342, %c139_343] : memref<4x896xf32, #tpu.memory_space<vmem>>, vector<4x640xf32>
    %cst_344 = arith.constant dense<0.000000e+00> : vector<4x640xf32>
    %365 = tpu.matmul %363, %364, %cst_344 {dimension_numbers = #tpu.dot_dimension_numbers<[1], [0], [0], [1], [0, 0, 1, 1], [], []>} : vector<4x4xf32>, vector<4x640xf32>, vector<4x640xf32> -> vector<4x640xf32>
    %366 = arith.addf %359, %365 : vector<4x640xf32>
    %c0_345 = arith.constant 0 : index
    %c139_346 = arith.constant 139 : index
    %367 = vector.load %arg15[%c0_345, %c139_346] : memref<1x896xf32, #tpu.memory_space<vmem>>, vector<1x640xf32>
    %368 = arith.addf %361, %367 : vector<1x640xf32>
    %c18_347 = arith.constant 18 : index
    %c0_348 = arith.constant 0 : index
    %c0_349 = arith.constant 0 : index
    %369 = vector.load %arg7[%c18_347, %c0_348, %c0_349] : memref<27x4x4xf32, #tpu.memory_space<vmem>>, vector<1x4x4xf32>
    %370 = vector.shape_cast %369 : vector<1x4x4xf32> to vector<4x4xf32>
    %c0_350 = arith.constant 0 : index
    %c217_351 = arith.constant 217 : index
    %371 = vector.load %arg14[%c0_350, %c217_351] : memref<4x896xf32, #tpu.memory_space<vmem>>, vector<4x640xf32>
    %cst_352 = arith.constant dense<0.000000e+00> : vector<4x640xf32>
    %372 = tpu.matmul %370, %371, %cst_352 {dimension_numbers = #tpu.dot_dimension_numbers<[1], [0], [0], [1], [0, 0, 1, 1], [], []>} : vector<4x4xf32>, vector<4x640xf32>, vector<4x640xf32> -> vector<4x640xf32>
    %373 = arith.addf %366, %372 : vector<4x640xf32>
    %c0_353 = arith.constant 0 : index
    %c217_354 = arith.constant 217 : index
    %374 = vector.load %arg15[%c0_353, %c217_354] : memref<1x896xf32, #tpu.memory_space<vmem>>, vector<1x640xf32>
    %375 = arith.addf %368, %374 : vector<1x640xf32>
    %c19_355 = arith.constant 19 : index
    %c0_356 = arith.constant 0 : index
    %c0_357 = arith.constant 0 : index
    %376 = vector.load %arg7[%c19_355, %c0_356, %c0_357] : memref<27x4x4xf32, #tpu.memory_space<vmem>>, vector<1x4x4xf32>
    %377 = vector.shape_cast %376 : vector<1x4x4xf32> to vector<4x4xf32>
    %c0_358 = arith.constant 0 : index
    %c218_359 = arith.constant 218 : index
    %378 = vector.load %arg14[%c0_358, %c218_359] : memref<4x896xf32, #tpu.memory_space<vmem>>, vector<4x640xf32>
    %cst_360 = arith.constant dense<0.000000e+00> : vector<4x640xf32>
    %379 = tpu.matmul %377, %378, %cst_360 {dimension_numbers = #tpu.dot_dimension_numbers<[1], [0], [0], [1], [0, 0, 1, 1], [], []>} : vector<4x4xf32>, vector<4x640xf32>, vector<4x640xf32> -> vector<4x640xf32>
    %380 = arith.addf %373, %379 : vector<4x640xf32>
    %c0_361 = arith.constant 0 : index
    %c218_362 = arith.constant 218 : index
    %381 = vector.load %arg15[%c0_361, %c218_362] : memref<1x896xf32, #tpu.memory_space<vmem>>, vector<1x640xf32>
    %382 = arith.addf %375, %381 : vector<1x640xf32>
    %c20_363 = arith.constant 20 : index
    %c0_364 = arith.constant 0 : index
    %c0_365 = arith.constant 0 : index
    %383 = vector.load %arg7[%c20_363, %c0_364, %c0_365] : memref<27x4x4xf32, #tpu.memory_space<vmem>>, vector<1x4x4xf32>
    %384 = vector.shape_cast %383 : vector<1x4x4xf32> to vector<4x4xf32>
    %c0_366 = arith.constant 0 : index
    %c219_367 = arith.constant 219 : index
    %385 = vector.load %arg14[%c0_366, %c219_367] : memref<4x896xf32, #tpu.memory_space<vmem>>, vector<4x640xf32>
    %cst_368 = arith.constant dense<0.000000e+00> : vector<4x640xf32>
    %386 = tpu.matmul %384, %385, %cst_368 {dimension_numbers = #tpu.dot_dimension_numbers<[1], [0], [0], [1], [0, 0, 1, 1], [], []>} : vector<4x4xf32>, vector<4x640xf32>, vector<4x640xf32> -> vector<4x640xf32>
    %387 = arith.addf %380, %386 : vector<4x640xf32>
    %c0_369 = arith.constant 0 : index
    %c219_370 = arith.constant 219 : index
    %388 = vector.load %arg15[%c0_369, %c219_370] : memref<1x896xf32, #tpu.memory_space<vmem>>, vector<1x640xf32>
    %389 = arith.addf %382, %388 : vector<1x640xf32>
    %c21_371 = arith.constant 21 : index
    %c0_372 = arith.constant 0 : index
    %c0_373 = arith.constant 0 : index
    %390 = vector.load %arg7[%c21_371, %c0_372, %c0_373] : memref<27x4x4xf32, #tpu.memory_space<vmem>>, vector<1x4x4xf32>
    %391 = vector.shape_cast %390 : vector<1x4x4xf32> to vector<4x4xf32>
    %c0_374 = arith.constant 0 : index
    %c227_375 = arith.constant 227 : index
    %392 = vector.load %arg14[%c0_374, %c227_375] : memref<4x896xf32, #tpu.memory_space<vmem>>, vector<4x640xf32>
    %cst_376 = arith.constant dense<0.000000e+00> : vector<4x640xf32>
    %393 = tpu.matmul %391, %392, %cst_376 {dimension_numbers = #tpu.dot_dimension_numbers<[1], [0], [0], [1], [0, 0, 1, 1], [], []>} : vector<4x4xf32>, vector<4x640xf32>, vector<4x640xf32> -> vector<4x640xf32>
    %394 = arith.addf %387, %393 : vector<4x640xf32>
    %c0_377 = arith.constant 0 : index
    %c227_378 = arith.constant 227 : index
    %395 = vector.load %arg15[%c0_377, %c227_378] : memref<1x896xf32, #tpu.memory_space<vmem>>, vector<1x640xf32>
    %396 = arith.addf %389, %395 : vector<1x640xf32>
    %c22_379 = arith.constant 22 : index
    %c0_380 = arith.constant 0 : index
    %c0_381 = arith.constant 0 : index
    %397 = vector.load %arg7[%c22_379, %c0_380, %c0_381] : memref<27x4x4xf32, #tpu.memory_space<vmem>>, vector<1x4x4xf32>
    %398 = vector.shape_cast %397 : vector<1x4x4xf32> to vector<4x4xf32>
    %c0_382 = arith.constant 0 : index
    %c228_383 = arith.constant 228 : index
    %399 = vector.load %arg14[%c0_382, %c228_383] : memref<4x896xf32, #tpu.memory_space<vmem>>, vector<4x640xf32>
    %cst_384 = arith.constant dense<0.000000e+00> : vector<4x640xf32>
    %400 = tpu.matmul %398, %399, %cst_384 {dimension_numbers = #tpu.dot_dimension_numbers<[1], [0], [0], [1], [0, 0, 1, 1], [], []>} : vector<4x4xf32>, vector<4x640xf32>, vector<4x640xf32> -> vector<4x640xf32>
    %401 = arith.addf %394, %400 : vector<4x640xf32>
    %c0_385 = arith.constant 0 : index
    %c228_386 = arith.constant 228 : index
    %402 = vector.load %arg15[%c0_385, %c228_386] : memref<1x896xf32, #tpu.memory_space<vmem>>, vector<1x640xf32>
    %403 = arith.addf %396, %402 : vector<1x640xf32>
    %c23_387 = arith.constant 23 : index
    %c0_388 = arith.constant 0 : index
    %c0_389 = arith.constant 0 : index
    %404 = vector.load %arg7[%c23_387, %c0_388, %c0_389] : memref<27x4x4xf32, #tpu.memory_space<vmem>>, vector<1x4x4xf32>
    %405 = vector.shape_cast %404 : vector<1x4x4xf32> to vector<4x4xf32>
    %c0_390 = arith.constant 0 : index
    %c229_391 = arith.constant 229 : index
    %406 = vector.load %arg14[%c0_390, %c229_391] : memref<4x896xf32, #tpu.memory_space<vmem>>, vector<4x640xf32>
    %cst_392 = arith.constant dense<0.000000e+00> : vector<4x640xf32>
    %407 = tpu.matmul %405, %406, %cst_392 {dimension_numbers = #tpu.dot_dimension_numbers<[1], [0], [0], [1], [0, 0, 1, 1], [], []>} : vector<4x4xf32>, vector<4x640xf32>, vector<4x640xf32> -> vector<4x640xf32>
    %408 = arith.addf %401, %407 : vector<4x640xf32>
    %c0_393 = arith.constant 0 : index
    %c229_394 = arith.constant 229 : index
    %409 = vector.load %arg15[%c0_393, %c229_394] : memref<1x896xf32, #tpu.memory_space<vmem>>, vector<1x640xf32>
    %410 = arith.addf %403, %409 : vector<1x640xf32>
    %c24_395 = arith.constant 24 : index
    %c0_396 = arith.constant 0 : index
    %c0_397 = arith.constant 0 : index
    %411 = vector.load %arg7[%c24_395, %c0_396, %c0_397] : memref<27x4x4xf32, #tpu.memory_space<vmem>>, vector<1x4x4xf32>
    %412 = vector.shape_cast %411 : vector<1x4x4xf32> to vector<4x4xf32>
    %c0_398 = arith.constant 0 : index
    %c237_399 = arith.constant 237 : index
    %413 = vector.load %arg14[%c0_398, %c237_399] : memref<4x896xf32, #tpu.memory_space<vmem>>, vector<4x640xf32>
    %cst_400 = arith.constant dense<0.000000e+00> : vector<4x640xf32>
    %414 = tpu.matmul %412, %413, %cst_400 {dimension_numbers = #tpu.dot_dimension_numbers<[1], [0], [0], [1], [0, 0, 1, 1], [], []>} : vector<4x4xf32>, vector<4x640xf32>, vector<4x640xf32> -> vector<4x640xf32>
    %415 = arith.addf %408, %414 : vector<4x640xf32>
    %c0_401 = arith.constant 0 : index
    %c237_402 = arith.constant 237 : index
    %416 = vector.load %arg15[%c0_401, %c237_402] : memref<1x896xf32, #tpu.memory_space<vmem>>, vector<1x640xf32>
    %417 = arith.addf %410, %416 : vector<1x640xf32>
    %c25_403 = arith.constant 25 : index
    %c0_404 = arith.constant 0 : index
    %c0_405 = arith.constant 0 : index
    %418 = vector.load %arg7[%c25_403, %c0_404, %c0_405] : memref<27x4x4xf32, #tpu.memory_space<vmem>>, vector<1x4x4xf32>
    %419 = vector.shape_cast %418 : vector<1x4x4xf32> to vector<4x4xf32>
    %c0_406 = arith.constant 0 : index
    %c238_407 = arith.constant 238 : index
    %420 = vector.load %arg14[%c0_406, %c238_407] : memref<4x896xf32, #tpu.memory_space<vmem>>, vector<4x640xf32>
    %cst_408 = arith.constant dense<0.000000e+00> : vector<4x640xf32>
    %421 = tpu.matmul %419, %420, %cst_408 {dimension_numbers = #tpu.dot_dimension_numbers<[1], [0], [0], [1], [0, 0, 1, 1], [], []>} : vector<4x4xf32>, vector<4x640xf32>, vector<4x640xf32> -> vector<4x640xf32>
    %422 = arith.addf %415, %421 : vector<4x640xf32>
    %c0_409 = arith.constant 0 : index
    %c238_410 = arith.constant 238 : index
    %423 = vector.load %arg15[%c0_409, %c238_410] : memref<1x896xf32, #tpu.memory_space<vmem>>, vector<1x640xf32>
    %424 = arith.addf %417, %423 : vector<1x640xf32>
    %c26_411 = arith.constant 26 : index
    %c0_412 = arith.constant 0 : index
    %c0_413 = arith.constant 0 : index
    %425 = vector.load %arg7[%c26_411, %c0_412, %c0_413] : memref<27x4x4xf32, #tpu.memory_space<vmem>>, vector<1x4x4xf32>
    %426 = vector.shape_cast %425 : vector<1x4x4xf32> to vector<4x4xf32>
    %c0_414 = arith.constant 0 : index
    %c239_415 = arith.constant 239 : index
    %427 = vector.load %arg14[%c0_414, %c239_415] : memref<4x896xf32, #tpu.memory_space<vmem>>, vector<4x640xf32>
    %cst_416 = arith.constant dense<0.000000e+00> : vector<4x640xf32>
    %428 = tpu.matmul %426, %427, %cst_416 {dimension_numbers = #tpu.dot_dimension_numbers<[1], [0], [0], [1], [0, 0, 1, 1], [], []>} : vector<4x4xf32>, vector<4x640xf32>, vector<4x640xf32> -> vector<4x640xf32>
    %429 = arith.addf %422, %428 : vector<4x640xf32>
    %c0_417 = arith.constant 0 : index
    %c239_418 = arith.constant 239 : index
    %430 = vector.load %arg15[%c0_417, %c239_418] : memref<1x896xf32, #tpu.memory_space<vmem>>, vector<1x640xf32>
    %431 = arith.addf %424, %430 : vector<1x640xf32>
    %cst_419 = arith.constant 4.000000e+00 : f32
    %432 = vector.broadcast %cst_419 : f32 to vector<1x640xf32>
    %433 = arith.mulf %431, %432 : vector<1x640xf32>
    %cst_420 = arith.constant 0.000000e+00 : f32
    %cst_421 = arith.constant 1.000000e+00 : f32
    %434 = vector.broadcast %cst_420 : f32 to vector<1x640xf32>
    %435 = arith.maximumf %434, %433 : vector<1x640xf32>
    %436 = vector.broadcast %cst_421 : f32 to vector<1x640xf32>
    %437 = arith.minimumf %436, %435 : vector<1x640xf32>
    %cst_422 = arith.constant 9.99999993E-9 : f32
    %438 = vector.broadcast %cst_422 : f32 to vector<1x640xf32>
    %439 = arith.addf %433, %438 : vector<1x640xf32>
    %440 = tpu.reciprocal %439 {approx = true} : vector<1x640xf32> -> vector<1x640xf32>
    %441 = arith.mulf %439, %440 : vector<1x640xf32>
    %cst_423 = arith.constant 2.000000e+00 : f32
    %442 = vector.broadcast %cst_423 : f32 to vector<1x640xf32>
    %443 = arith.subf %442, %441 : vector<1x640xf32>
    %444 = arith.mulf %440, %443 : vector<1x640xf32>
    %cst_424 = arith.constant 1.080000e+02 : f32
    %445 = vector.broadcast %cst_424 : f32 to vector<1x640xf32>
    %446 = arith.mulf %445, %444 : vector<1x640xf32>
    %447 = arith.mulf %446, %437 : vector<1x640xf32>
    %448 = vector.broadcast %447 : vector<1x640xf32> to vector<4x640xf32>
    %449 = arith.mulf %429, %448 : vector<4x640xf32>
    %c0_425 = arith.constant 0 : index
    %c0_426 = arith.constant 0 : index
    %450 = vector.load %arg8[%c0_425, %c0_426] : memref<4x1xf32, #tpu.memory_space<vmem>>, vector<4x1xf32>
    %451 = vector.broadcast %450 : vector<4x1xf32> to vector<4x640xf32>
    %452 = arith.mulf %449, %451 : vector<4x640xf32>
    %c0_427 = arith.constant 0 : index
    %c0_428 = arith.constant 0 : index
    %453 = vector.load %arg9[%c0_427, %c0_428] : memref<4x1xf32, #tpu.memory_space<vmem>>, vector<4x1xf32>
    %454 = vector.broadcast %453 : vector<4x1xf32> to vector<4x640xf32>
    %455 = arith.addf %452, %454 : vector<4x640xf32>
    %cst_429 = arith.constant 0.000000e+00 : f32
    %456 = vector.broadcast %cst_429 : f32 to vector<4x640xf32>
    %457 = arith.subf %456, %455 : vector<4x640xf32>
    %458 = math.exp %457 : vector<4x640xf32>
    %cst_430 = arith.constant 1.000000e+00 : f32
    %459 = vector.broadcast %cst_430 : f32 to vector<4x640xf32>
    %460 = arith.addf %459, %458 : vector<4x640xf32>
    %cst_431 = arith.constant 1.000000e+00 : f32
    %461 = vector.broadcast %cst_431 : f32 to vector<4x640xf32>
    %462 = arith.divf %461, %460 : vector<4x640xf32>
    %463 = arith.mulf %455, %462 : vector<4x640xf32>
    %c0_432 = arith.constant 0 : index
    %c0_433 = arith.constant 0 : index
    %c0_434 = arith.constant 0 : index
    %464 = vector.load %arg10[%c0_432, %c0_433, %c0_434] : memref<1x4x640xf32, #tpu.memory_space<vmem>>, vector<1x4x640xf32>
    %465 = vector.shape_cast %464 : vector<1x4x640xf32> to vector<4x640xf32>
    %466 = vector.shape_cast %463 : vector<4x640xf32> to vector<1x4x640xf32>
    tpu.vector_store %arg10[%c0_432, %c0_433, %c0_434], %466 {strides = array<i32>} : memref<1x4x640xf32, #tpu.memory_space<vmem>>, vector<1x4x640xf32>,
    %c0_435 = arith.constant 0 : index
    %c0_436 = arith.constant 0 : index
    %c0_437 = arith.constant 0 : index
    %467 = vector.load %arg11[%c0_435, %c0_436, %c0_437] : memref<1x1x640xf32, #tpu.memory_space<vmem>>, vector<1x1x640xf32>
    %468 = vector.shape_cast %467 : vector<1x1x640xf32> to vector<1x640xf32>
    %469 = vector.shape_cast %437 : vector<1x640xf32> to vector<1x1x640xf32>
    tpu.vector_store %arg11[%c0_435, %c0_436, %c0_437], %469 {strides = array<i32>} : memref<1x1x640xf32, #tpu.memory_space<vmem>>, vector<1x1x640xf32>,
    return
  }
  func.func @transform_0(%arg0: i32) -> (i32, i32, i32) {
    %c0_i32 = arith.constant 0 : i32
    %c0_i32_0 = arith.constant 0 : i32
    %c0_i32_1 = arith.constant 0 : i32
    return %arg0, %c0_i32, %c0_i32_0 : i32, i32, i32
  }
  func.func @transform_1(%arg0: i32) -> (i32, i32, i32) {
    %c0_i32 = arith.constant 0 : i32
    %c0_i32_0 = arith.constant 0 : i32
    %c0_i32_1 = arith.constant 0 : i32
    return %arg0, %c0_i32, %c0_i32_0 : i32, i32, i32
  }
  func.func @transform_2(%arg0: i32) -> (i32, i32) {
    %c0_i32 = arith.constant 0 : i32
    %c0_i32_0 = arith.constant 0 : i32
    %c0_i32_1 = arith.constant 0 : i32
    return %c0_i32, %c0_i32_0 : i32, i32
  }
  func.func @transform_3(%arg0: i32) -> (i32, i32, i32) {
    %c0_i32 = arith.constant 0 : i32
    %c0_i32_0 = arith.constant 0 : i32
    %c0_i32_1 = arith.constant 0 : i32
    %c0_i32_2 = arith.constant 0 : i32
    return %c0_i32, %c0_i32_0, %c0_i32_1 : i32, i32, i32
  }
  func.func @transform_4(%arg0: i32) -> (i32, i32) {
    %c0_i32 = arith.constant 0 : i32
    %c0_i32_0 = arith.constant 0 : i32
    %c0_i32_1 = arith.constant 0 : i32
    return %c0_i32, %c0_i32_0 : i32, i32
  }
  func.func @transform_5(%arg0: i32) -> (i32, i32) {
    %c0_i32 = arith.constant 0 : i32
    %c0_i32_0 = arith.constant 0 : i32
    %c0_i32_1 = arith.constant 0 : i32
    return %c0_i32, %c0_i32_0 : i32, i32
  }
  func.func @transform_6(%arg0: i32) -> (i32, i32, i32) {
    %c0_i32 = arith.constant 0 : i32
    %c0_i32_0 = arith.constant 0 : i32
    %c0_i32_1 = arith.constant 0 : i32
    %c0_i32_2 = arith.constant 0 : i32
    return %c0_i32, %c0_i32_0, %c0_i32_1 : i32, i32, i32
  }
  func.func @transform_7(%arg0: i32) -> (i32, i32) {
    %c0_i32 = arith.constant 0 : i32
    %c0_i32_0 = arith.constant 0 : i32
    %c0_i32_1 = arith.constant 0 : i32
    return %c0_i32, %c0_i32_0 : i32, i32
  }
  func.func @transform_8(%arg0: i32) -> (i32, i32) {
    %c0_i32 = arith.constant 0 : i32
    %c0_i32_0 = arith.constant 0 : i32
    %c0_i32_1 = arith.constant 0 : i32
    return %c0_i32, %c0_i32_0 : i32, i32
  }
  func.func @transform_9(%arg0: i32) -> (i32, i32, i32) {
    %c0_i32 = arith.constant 0 : i32
    %c0_i32_0 = arith.constant 0 : i32
    %c0_i32_1 = arith.constant 0 : i32
    return %arg0, %c0_i32, %c0_i32_0 : i32, i32, i32
  }
  func.func @transform_10(%arg0: i32) -> (i32, i32, i32) {
    %c0_i32 = arith.constant 0 : i32
    %c0_i32_0 = arith.constant 0 : i32
    %c0_i32_1 = arith.constant 0 : i32
    return %arg0, %c0_i32, %c0_i32_0 : i32, i32, i32
  }
}

</mosaic_0001>

<bundles_post_ra>
// kernel: inpainting_double_conv3d.1
= control target key start
LH: loop header
LB: loop body
LE: loop exit
PB: predicated region body
PF: predicated region fallthrough
CT: control target
= control target key end

     0   :  { %s16683_s13 = smov 0   ;;  %s18846_s0 = inlined_call_operand.vmem [shape: f32[2,4,896], index: 0, kind: input, shape index: {}]   ;;  %s18847_s1 = inlined_call_operand.vmem [shape: bf16[2,4,896], index: 1, kind: input, shape index: {}]   ;;  %s18848_s2 = inlined_call_operand.vmem [shape: f32[1,640], index: 2, kind: input, shape index: {}]   ;;  %s18849_s3 = inlined_call_operand.vmem [shape: f32[27,4,4], index: 3, kind: input, shape index: {}]   ;;  %s18850_s4 = inlined_call_operand.vmem [shape: f32[4,1], index: 4, kind: input, shape index: {}]   ;;  %s18851_s5 = inlined_call_operand.vmem [shape: f32[4,1], index: 5, kind: input, shape index: {}]   ;;  %s18852_s6 = inlined_call_operand.vmem [shape: f32[27,4,4], index: 6, kind: input, shape index: {}]   ;;  %s18853_s7 = inlined_call_operand.vmem [shape: f32[4,1], index: 7, kind: input, shape index: {}]   ;;  %s18854_s8 = inlined_call_operand.vmem [shape: f32[4,1], index: 8, kind: input, shape index: {}]   ;;  %s18855_s9 = inlined_call_operand.vmem [shape: f32[2,4,640], index: 9, kind: output, shape index: {0}]   ;;  %s18856_s10 = inlined_call_operand.vmem [shape: f32[2,1,640], index: 10, kind: output, shape index: {1}]  }
   0x1 LB: > { %s15267_s14 = sadd.s32 4294967295, %s16577_s13   ;;  %p15271_p0 = scmp.ge.s32.totalorder %s16577_s13, 1  ;;  %s16577_s13 = sphi %s16683_s13, %s21_s13  }
   0x2   : > { %p325_p1 = scmp.lt.s32.totalorder %s16577_s13, 3 }
   0x4   : > { %p326_p2 = pnand %p15271_p0, %p325_p1 }
   0x5   : > { %p372_p3 = scmp.lt.s32.totalorder (!%p326_p2), %s15267_s14, 1  ;;  %v16579_v0 = vmov (!%p326_p2), 0.0   ;;  %s16580_s23 = smov (!%p326_p2), 110   ;;  %vm556_vm0 = vcmask (!%p326_p2), 900096   ;;  %vm419_vm1 = vcmask (!%p326_p2), 1043456   ;;  %vm562_vm2 = vcmask (!%p326_p2), 31744  }
   0x6   : > { %329 = sbr.rel (%p326_p2) target bundleno = 1577 (0x629), region = 56  ;;  %640 = vmatprep.mubr.f32.mxu0 (!%p326_p2), %v16579_v0  ;;  %7863 = vst [vmem:[#allocation4] sm:$0xff] (!%p326_p2), %v16579_v0  ;;  %7864 = vst [vmem:[#allocation4 + $0x8] sm:$0xff] (!%p326_p2), %v16579_v0  ;;  %8002 = vmatprep.mubr.f32.mxu1 (!%p326_p2), %v16579_v0  ;;  %s16581_s24 = smov (!%p326_p2), 111   ;;  %v15275_v24 = vld [vmem:[%s18849_s3 + $0x4] sm:$0xf] (!%p326_p2) }
   0x7   : > { %7865 = vst [vmem:[#allocation4 + $0x10] sm:$0xff] (!%p326_p2), %v16579_v0  ;;  %7866 = vst [vmem:[#allocation4 + $0x18] sm:$0xf] (!%p326_p2), %v16579_v0  ;;  %s16582_s25 = smov (!%p326_p2), 109   ;;  %s16583_s26 = smov (!%p326_p2), 101   ;;  %vm16591_vm3 = vmmov (!%p326_p2), 0  }
   0x8   : > { %s16584_s27 = smov (!%p326_p2), 100   ;;  %s16585_s28 = smov (!%p326_p2), 99   ;;  %vm800_vm4 = vcmask (!%p326_p2), 908288   ;;  %v530_v36 = vld [vmem:[%s18849_s3] sm:$0xf] (!%p326_p2)  ;;  %vm1063_vm5 = vcmask (!%p326_p2), 891904  }
   0x9   : > { %s16586_s29 = smov (!%p326_p2), 91   ;;  %s16587_s30 = smov (!%p326_p2), 90   ;;  %v15292_v53 = vld [vmem:[%s18849_s3 + $0x8] sm:$0xf] (!%p326_p2)  ;;  %vm1331_vm6 = vcmask (!%p326_p2), 826368   ;;  %vm1599_vm7 = vcmask (!%p326_p2), 818176  }
   0xa   : > { %s18880_s11 = smov (!%p326_p2), 89   ;;  %s18874_s12 = smov (!%p326_p2), 11   ;;  %vm18914_vm8 = vcmask (!%p326_p2), 809984   ;;  %vm18912_vm10 = vcmask (!%p326_p2), 744448   ;;  %vm18911_vm11 = vcmask (!%p326_p2), 736256   ;;  %vm18891_vm12 = vcmask (!%p326_p2), 728064  }
   0xb   : > { %s18871_s17 = smov (!%p326_p2), 10   ;;  %s18861_s20 = smov (!%p326_p2), 9   ;;  %vm18888_vm13 = vcmask (!%p326_p2), 89088   ;;  %vm18879_vm14 = vcmask (!%p326_p2), 80896   ;;  %vm18876_vm15 = vcmask (!%p326_p2), 72704  }
   0xc   : > { %s18883_s18 = smov (!%p326_p2), 116   ;;  %s18887_s21 = smov (!%p326_p2), 108  }
   0xd   : > { %s19075_s14 = smov (!%p372_p3, %s15267_s14), 1 }
   0xe   : > { %s16451_s15 = smul.u32 28, %s19075_s14 }
   0xf   : > { %s16452_s16 = smul.u32 14, %s19075_s14 }
  0x10   : > { %s16698_s19 = scalar_lea.vmem %s18846_s0, %s16451_s15  ;;  %s18859_s15 = smov 1  }
  0x11   : > { %s381_s22 = scalar_lea.vmem %s18847_s1, %s16452_s16  ;;  %v392_v1 = vld [vmem:[%s16698_s19 + $0x8] sm:$0xff]  ;;  %v391_v4 = vld [vmem:[%s16698_s19] sm:$0xff]  ;;  %v393_v10 = vld [vmem:[%s16698_s19 + $0x10] sm:$0xff]  ;;  %s18857_s16 = smov 119  }
  0x12   : > { %v395_v2 = vld [vmem:[%s381_s22] sm:$0xff]  ;;  %v16715_v6 = vld [vmem:[%s381_s22 + $0x8] sm:$0x3f]  ;;  %v394_v16 = vld [vmem:[%s16698_s19 + $0x18] sm:$0xf]  ;;  %s16594_s19 = smov 127  }
  0x13   : > { %v16710_v3 = vunpack.c.h.bf16 %v395_v2  ;;  %v16713_v5 = vunpack.c.l.bf16 %v395_v2  ;;  %v16724_v9 = vunpack.c.l.bf16 %v16715_v6  ;;  %v400_v15 = vunpack.c.h.bf16 %v16715_v6  ;;  %s16597_s22 = smov 118  }
  0x15   : > { %v16718_v7 = vmul.f32 %v16710_v3, %v392_v1  ;;  %v16721_v8 = vmul.f32 %v16713_v5, %v391_v4  ;;  %v16744_v13 = vmul.f32 %v16724_v9, %v393_v10  ;;  %v405_v17 = vmul.f32 %v400_v15, %v394_v16 }
  0x16   : > { %v414_v44 = vcombine.high %v16710_v3, %v16710_v3  ;;  %v434_v45 = vsel %vm419_vm1, %v16710_v3, 0.0  ;;  %v413_v46 = vcombine.high %v16713_v5, %v16713_v5  ;;  %v420_v48 = vsel %vm419_vm1, %v16713_v5, 0.0 }
  0x17   : > { %407 = vst [vmem:[#allocation2 + $0x8] sm:$0xff] %v16718_v7  ;;  %548 = vrot.lane.b32.xlu0 %v16718_v7, %s16580_s23  ;;  %406 = vst [vmem:[#allocation2] sm:$0xff] %v16721_v8  ;;  %544 = vrot.lane.b32.xlu1 %v16721_v8, %s16580_s23  ;;  %v16735_v11 = vcombine.high %v16718_v7, %v16718_v7  ;;  %v16739_v12 = vcombine.high %v16721_v8, %v16721_v8  ;;  %v435_v50 = vrot.slane %v434_v45, 4 }
  0x18   : > { %408 = vst [vmem:[#allocation2 + $0x10] sm:$0xff] %v16744_v13  ;;  %v16751_v14 = vcombine.high %v16744_v13, %v16744_v13  ;;  %409 = vst [vmem:[#allocation2 + $0x18] sm:$0xf] %v405_v17  ;;  %v415_v54 = vcombine.high %v16724_v9, %v16724_v9  ;;  %v441_v55 = vsel %vm419_vm1, %v414_v44, 0.0  ;;  %v421_v56 = vrot.slane %v420_v48, 4 }
  0x19   : > { %v427_v57 = vsel %vm419_vm1, %v413_v46, 0.0  ;;  %v462_v58 = vsel %vm419_vm1, %v400_v15, 0.0  ;;  %v448_v59 = vsel %vm419_vm1, %v16724_v9, 0.0  ;;  %v436_v61 = vadd.f32 %v435_v50, %v434_v45 }
  0x1a   : > { %v442_v62 = vrot.slane %v441_v55, 4  ;;  %v428_v63 = vrot.slane %v427_v57, 4  ;;  %v455_v3 = vsel %vm419_vm1, %v415_v54, 0.0  ;;  %v422_v4 = vadd.f32 %v421_v56, %v420_v48 }
  0x1b   : > { %546 = vrot.lane.b32.xlu0 %v16739_v12, %s16580_s23  ;;  %550 = vrot.lane.b32.xlu1 %v16735_v11, %s16580_s23  ;;  %v463_v6 = vrot.slane %v462_v58, 4  ;;  %v456_v16 = vrot.slane %v455_v3, 4 }
  0x1c   : > { %v443_v15 = vadd.f32 %v442_v62, %v441_v55  ;;  %v429_v17 = vadd.f32 %v428_v63, %v427_v57  ;;  %v16595_v57 = vmov 1966171168  }
  0x1e   : > { %v16974_v9 = vld [vmem:[#allocation2 + $0x4] sm:$0xff] }
  0x1f   : > { %552 = vrot.lane.b32.xlu0 %v16744_v13, %s16580_s23  ;;  %554 = vrot.lane.b32.xlu1 %v16751_v14, %s16580_s23 }
  0x23   : > { %788 = vrot.lane.b32.xlu0 %v16721_v8, %s16581_s24  ;;  %792 = vrot.lane.b32.xlu1 %v16718_v7, %s16581_s24 }
  0x27   : > { %790 = vrot.lane.b32.xlu0 %v16739_v12, %s16581_s24  ;;  %794 = vrot.lane.b32.xlu1 %v16735_v11, %s16581_s24 }
  0x2b   : > { %796 = vrot.lane.b32.xlu0 %v16744_v13, %s16581_s24  ;;  %798 = vrot.lane.b32.xlu1 %v16751_v14, %s16581_s24 }
  0x2f   : > { %1053 = vrot.lane.b32.xlu0 %v16739_v12, %s16582_s25  ;;  %1055 = vrot.lane.b32.xlu1 %v16718_v7, %s16582_s25 }
  0x33   : > { %1051 = vrot.lane.b32.xlu0 %v16721_v8, %s16582_s25  ;;  %1057 = vrot.lane.b32.xlu1 %v16735_v11, %s16582_s25 }
  0x37   : > { %1059 = vrot.lane.b32.xlu0 %v16744_v13, %s16582_s25  ;;  %1061 = vrot.lane.b32.xlu1 %v16751_v14, %s16582_s25 }
  0x3b   : > { %1321 = vrot.lane.b32.xlu0 %v16739_v12, %s16583_s26  ;;  %1323 = vrot.lane.b32.xlu1 %v16718_v7, %s16583_s26 }
  0x3f   : > { %1319 = vrot.lane.b32.xlu0 %v16721_v8, %s16583_s26  ;;  %1325 = vrot.lane.b32.xlu1 %v16735_v11, %s16583_s26 }
  0x43   : > { %1327 = vrot.lane.b32.xlu0 %v16744_v13, %s16583_s26  ;;  %1329 = vrot.lane.b32.xlu1 %v16751_v14, %s16583_s26 }
  0x47   : > { %1589 = vrot.lane.b32.xlu0 %v16739_v12, %s16584_s27  ;;  %1591 = vrot.lane.b32.xlu1 %v16718_v7, %s16584_s27 }
  0x4b   : > { %1587 = vrot.lane.b32.xlu0 %v16721_v8, %s16584_s27  ;;  %1593 = vrot.lane.b32.xlu1 %v16735_v11, %s16584_s27 }
  0x4f   : > { %1595 = vrot.lane.b32.xlu0 %v16744_v13, %s16584_s27  ;;  %1597 = vrot.lane.b32.xlu1 %v16751_v14, %s16584_s27 }
  0x53   : > { %1857 = vrot.lane.b32.xlu0 %v16739_v12, %s16585_s28  ;;  %1859 = vrot.lane.b32.xlu1 %v16718_v7, %s16585_s28 }
  0x57   : > { %1855 = vrot.lane.b32.xlu0 %v16721_v8, %s16585_s28  ;;  %1861 = vrot.lane.b32.xlu1 %v16735_v11, %s16585_s28 }
  0x5b   : > { %1863 = vrot.lane.b32.xlu0 %v16744_v13, %s16585_s28  ;;  %1865 = vrot.lane.b32.xlu1 %v16751_v14, %s16585_s28 }
  0x5f   : > { %2125 = vrot.lane.b32.xlu0 %v16739_v12, %s16586_s29  ;;  %2127 = vrot.lane.b32.xlu1 %v16718_v7, %s16586_s29 }
  0x63   : > { %2123 = vrot.lane.b32.xlu0 %v16721_v8, %s16586_s29  ;;  %2129 = vrot.lane.b32.xlu1 %v16735_v11, %s16586_s29 }
  0x67   : > { %2131 = vrot.lane.b32.xlu0 %v16744_v13, %s16586_s29  ;;  %2133 = vrot.lane.b32.xlu1 %v16751_v14, %s16586_s29 }
  0x6b   : > { %2393 = vrot.lane.b32.xlu0 %v16739_v12, %s16587_s30  ;;  %2395 = vrot.lane.b32.xlu1 %v16718_v7, %s16587_s30 }
  0x6f   : > { %2391 = vrot.lane.b32.xlu0 %v16721_v8, %s16587_s30  ;;  %2397 = vrot.lane.b32.xlu1 %v16735_v11, %s16587_s30 }
  0x73   : > { %2399 = vrot.lane.b32.xlu0 %v16744_v13, %s16587_s30  ;;  %2401 = vrot.lane.b32.xlu1 %v16751_v14, %s16587_s30 }
  0x77   : > { %2661 = vrot.lane.b32.xlu0 %v16739_v12, %s18880_s11  ;;  %2663 = vrot.lane.b32.xlu1 %v16718_v7, %s18880_s11 }
  0x7b   : > { %2659 = vrot.lane.b32.xlu0 %v16721_v8, %s18880_s11  ;;  %2665 = vrot.lane.b32.xlu1 %v16735_v11, %s18880_s11 }
  0x7f   : > { %2667 = vrot.lane.b32.xlu0 %v16744_v13, %s18880_s11  ;;  %2669 = vrot.lane.b32.xlu1 %v16751_v14, %s18880_s11  ;;  %s18884_s11 = smov 126  }
  0x83   : > { %2929 = vrot.lane.b32.xlu0 %v16739_v12, %s18874_s12  ;;  %2931 = vrot.lane.b32.xlu1 %v16718_v7, %s18874_s12 }
  0x87   : > { %2927 = vrot.lane.b32.xlu0 %v16721_v8, %s18874_s12  ;;  %2933 = vrot.lane.b32.xlu1 %v16735_v11, %s18874_s12 }
  0x89   : > { %v549_v18 = vpop.permute.xlu0 %548  ;;  %v545_v19 = vpop.permute.xlu1 %544 }
  0x8b   : > { %2935 = vrot.lane.b32.xlu0 %v16744_v13, %s18874_s12  ;;  %2937 = vrot.lane.b32.xlu1 %v16751_v14, %s18874_s12  ;;  %s18906_s12 = smov 18  }
  0x8d   : > { %v547_v20 = vpop.permute.xlu0 %546  ;;  %v551_v21 = vpop.permute.xlu1 %550 }
  0x8e   : > { %v558_v22 = vsel %vm556_vm0, %v547_v20, %v549_v18  ;;  %v557_v23 = vsel %vm556_vm0, %v545_v19, %v547_v20  ;;  %v559_v28 = vsel %vm556_vm0, %v549_v18, %v551_v21  ;;  %v16987_v20 = vcombine.high %v16974_v9, %v16974_v9 }
  0x8f   : > { %3197 = vrot.lane.b32.xlu0 %v16739_v12, %s18871_s17  ;;  %15276 = vmatprep.subr.msk.mxu0 %vm419_vm1, %v558_v22 }
  0x90   : > { %3199 = vrot.lane.b32.xlu1 %v16718_v7, %s18871_s17  ;;  %15277 = vmatpush1.msk.msra.mxu0 %vm419_vm1, %v557_v23 }
  0x91   : > { %15278 = vmatmul.mubr.msk.f32.vlgmr.msra.gmra.mrb[0].mxu0 %vm562_vm2, %v15275_v24  ;;  %v553_v25 = vpop.permute.xlu0 %552  ;;  %v555_v26 = vpop.permute.xlu1 %554 }
  0x92   : > { %v560_v27 = vsel %vm556_vm0, %v551_v21, %v553_v25  ;;  %711 = vmatprep.mubr.f32.mxu0 %v16579_v0  ;;  %v561_v29 = vsel %vm556_vm0, %v553_v25, %v555_v26  ;;  %v464_v21 = vadd.f32 %v463_v6, %v462_v58  ;;  %v444_v25 = vrot.slane %v443_v15, 2 }
  0x93   : > { %3195 = vrot.lane.b32.xlu0 %v16721_v8, %s18871_s17  ;;  %15279 = vmatprep.subr.msk.mxu0 %vm419_vm1, %v560_v27  ;;  %v430_v26 = vrot.slane %v429_v17, 2  ;;  %v480_v58 = vunpack.c.l.s4 %v16595_v57 }
  0x94   : > { %3201 = vrot.lane.b32.xlu1 %v16735_v11, %s18871_s17  ;;  %15280 = vmatpush1.msk.msra.mxu0 %vm419_vm1, %v559_v28 }
  0x95   : > { %15281 = vmatmul.mubr.msk.f32.vlgmr.msra.gmra.mrb[2].mxu0 %vm562_vm2, %v15275_v24  ;;  %15869 = vmatprep.subr.mxu0 %v16579_v0  ;;  %v789_v30 = vpop.permute.xlu0 %788  ;;  %v793_v31 = vpop.permute.xlu1 %792 }
  0x96   : > { %15870 = vmatpush3.msk.msra.mxu0 %vm419_vm1, %v561_v29  ;;  %15871 = vmatprep.mubr.msk.f32.mxu0 %vm16591_vm3, %v16579_v0  ;;  %v15301_v29 = vld [vmem:[%s18849_s3 + $0xc] sm:$0xf] }
  0x97   : > { %3203 = vrot.lane.b32.xlu0 %v16744_v13, %s18871_s17 }
  0x98   : > { %3205 = vrot.lane.b32.xlu1 %v16751_v14, %s18871_s17  ;;  %s18877_s17 = smov 19  }
  0x99   : > { %15872 = vmatmul.mubr.msk.f32.vlgmr.msra.gmra.mrb[4].mxu0 %vm562_vm2, %v15275_v24  ;;  %v791_v32 = vpop.permute.xlu0 %790  ;;  %v795_v33 = vpop.permute.xlu1 %794  ;;  %v16993_v24 = vld [vmem:[#allocation2 + $0xc] sm:$0xff] }
  0x9a   : > { %v801_v34 = vsel %vm800_vm4, %v789_v30, %v791_v32  ;;  %v802_v35 = vsel %vm800_vm4, %v791_v32, %v793_v31  ;;  %883 = vmatprep.mubr.f32.mxu0 %v16579_v0  ;;  %v803_v40 = vsel %vm800_vm4, %v793_v31, %v795_v33  ;;  %v465_v31 = vrot.slane %v464_v21, 2 }
  0x9b   : > { %3465 = vrot.lane.b32.xlu0 %v16739_v12, %s18861_s20  ;;  %15284 = vmatprep.subr.msk.mxu0 %vm419_vm1, %v802_v35  ;;  %v17010_v35 = vld [vmem:[#allocation2 + $0x14] sm:$0xff] }
  0x9c   : > { %3467 = vrot.lane.b32.xlu1 %v16718_v7, %s18861_s20  ;;  %15285 = vmatpush1.msk.msra.mxu0 %vm419_vm1, %v801_v34  ;;  %v466_v44 = vadd.f32 %v465_v31, %v464_v21  ;;  %v17023_v45 = vcombine.high %v17010_v35, %v17010_v35 }
  0x9d   : > { %15286 = vmatmul.mubr.msk.f32.vlgmr.msra.gmra.mrb[0].mxu0 %vm562_vm2, %v530_v36  ;;  %v797_v37 = vpop.permute.xlu0 %796  ;;  %v799_v38 = vpop.permute.xlu1 %798 }
  0x9e   : > { %v804_v39 = vsel %vm800_vm4, %v795_v33, %v797_v37  ;;  %954 = vmatprep.mubr.f32.mxu0 %v16579_v0  ;;  %v805_v41 = vsel %vm800_vm4, %v797_v37, %v799_v38  ;;  %v17005_v33 = vcombine.high %v16993_v24, %v16993_v24  ;;  %v431_v37 = vadd.f32 %v430_v26, %v429_v17 }
  0x9f   : > { %3463 = vrot.lane.b32.xlu0 %v16721_v8, %s18861_s20  ;;  %15287 = vmatprep.subr.msk.mxu0 %vm419_vm1, %v804_v39  ;;  %v467_v55 = vrot.slane %v466_v44, 1 }
  0xa0   : > { %3469 = vrot.lane.b32.xlu1 %v16735_v11, %s18861_s20  ;;  %15288 = vmatpush1.msk.msra.mxu0 %vm419_vm1, %v803_v40 }
  0xa1   : > { %15289 = vmatmul.mubr.msk.f32.vlgmr.msra.gmra.mrb[2].mxu0 %vm562_vm2, %v530_v36  ;;  %15874 = vmatprep.subr.mxu0 %v16579_v0  ;;  %v1054_v42 = vpop.permute.xlu0 %1053  ;;  %v1056_v43 = vpop.permute.xlu1 %1055 }
  0xa2   : > { %15875 = vmatpush3.msk.msra.mxu0 %vm419_vm1, %v805_v41  ;;  %15876 = vmatprep.mubr.msk.f32.mxu0 %vm16591_vm3, %v16579_v0  ;;  %v1065_v47 = vsel %vm1063_vm5, %v1054_v42, %v1056_v43 }
  0xa3   : > { %3471 = vrot.lane.b32.xlu0 %v16744_v13, %s18861_s20  ;;  %15293 = vmatprep.subr.msk.mxu0 %vm419_vm1, %v1065_v47 }
  0xa4   : > { %3473 = vrot.lane.b32.xlu1 %v16751_v14, %s18861_s20  ;;  %s18865_s20 = smov 38  }
  0xa5   : > { %15877 = vmatmul.mubr.msk.f32.vlgmr.msra.gmra.mrb[4].mxu0 %vm562_vm2, %v530_v36  ;;  %v1052_v49 = vpop.permute.xlu0 %1051  ;;  %v1058_v51 = vpop.permute.xlu1 %1057  ;;  %v445_v36 = vadd.f32 %v444_v25, %v443_v15 }
  0xa6   : > { %v1064_v52 = vsel %vm1063_vm5, %v1052_v49, %v1054_v42  ;;  %1146 = vmatprep.mubr.f32.mxu0 %v16579_v0  ;;  %v1066_v5 = vsel %vm1063_vm5, %v1056_v43, %v1058_v51 }
  0xa7   : > { %3733 = vrot.lane.b32.xlu0 %v16739_v12, %s18859_s15  ;;  %15294 = vmatpush1.msk.msra.mxu0 %vm419_vm1, %v1064_v52  ;;  %v446_v52 = vrot.slane %v445_v36, 1 }
  0xa8   : > { %3735 = vrot.lane.b32.xlu1 %v16718_v7, %s18859_s15  ;;  %v449_v7 = vrot.slane %v448_v59, 4 }
  0xa9   : > { %15295 = vmatmul.mubr.msk.f32.vlgmr.msra.gmra.mrb[0].mxu0 %vm562_vm2, %v15292_v53  ;;  %v1060_v60 = vpop.permute.xlu0 %1059  ;;  %v1062_v1 = vpop.permute.xlu1 %1061 }
  0xaa   : > { %v1067_v2 = vsel %vm1063_vm5, %v1058_v51, %v1060_v60  ;;  %1217 = vmatprep.mubr.f32.mxu0 %v16579_v0  ;;  %v1068_v10 = vsel %vm1063_vm5, %v1060_v60, %v1062_v1  ;;  %v450_v22 = vadd.f32 %v449_v7, %v448_v59  ;;  %v432_v51 = vrot.slane %v431_v37, 1  ;;  %v15310_v7 = vld [vmem:[%s18849_s3 + $0x10] sm:$0xf] }
  0xab   : > { %3731 = vrot.lane.b32.xlu0 %v16721_v8, %s18859_s15  ;;  %15296 = vmatprep.subr.msk.mxu0 %vm419_vm1, %v1067_v2  ;;  %v437_v8 = vrot.slane %v436_v61, 2  ;;  %v482_v59 = vlaneseq  ;;  %v447_v1 = vadd.f32 %v446_v52, %v445_v36  ;;  %v15328_v52 = vld [vmem:[%s18849_s3 + $0x18] sm:$0xf] }
  0xac   : > { %3737 = vrot.lane.b32.xlu1 %v16735_v11, %s18859_s15  ;;  %15297 = vmatpush1.msk.msra.mxu0 %vm419_vm1, %v1066_v5  ;;  %v423_v11 = vrot.slane %v422_v4, 2  ;;  %v451_v32 = vrot.slane %v450_v22, 2 }
  0xad   : > { %15298 = vmatmul.mubr.msk.f32.vlgmr.msra.gmra.mrb[2].mxu0 %vm562_vm2, %v15292_v53  ;;  %15879 = vmatprep.subr.mxu0 %v16579_v0  ;;  %v1322_v12 = vpop.permute.xlu0 %1321  ;;  %v1324_v18 = vpop.permute.xlu1 %1323  ;;  %vm527_vm9 = vcmp.lt.s32.totalorder %v482_v59, 896 }
  0xae   : > { %15880 = vmatpush3.msk.msra.mxu0 %vm419_vm1, %v1068_v10  ;;  %15881 = vmatprep.mubr.msk.f32.mxu0 %vm16591_vm3, %v16579_v0  ;;  %v1333_v19 = vsel %vm1331_vm6, %v1322_v12, %v1324_v18  ;;  %v424_v30 = vadd.f32 %v423_v11, %v422_v4  ;;  %v452_v46 = vadd.f32 %v451_v32, %v450_v22  ;;  %v481_v4 = vunpack.c.0.s8 %v480_v58 }
  0xaf   : > { %3739 = vrot.lane.b32.xlu0 %v16744_v13, %s18859_s15  ;;  %15302 = vmatprep.subr.msk.mxu0 %vm419_vm1, %v1333_v19  ;;  %v457_v13 = vadd.f32 %v456_v16, %v455_v3  ;;  %7867 = vst.msk [vmem:[#allocation5] sm:$0x7f] %vm527_vm9, %v16579_v0 }
  0xb0   : > { %3741 = vrot.lane.b32.xlu1 %v16751_v14, %s18859_s15  ;;  %v438_v14 = vadd.f32 %v437_v8, %v436_v61  ;;  %v425_v42 = vrot.slane %v424_v30, 1  ;;  %v433_v61 = vadd.f32 %v432_v51, %v431_v37  ;;  %v468_v8 = vadd.f32 %v467_v55, %v466_v44  ;;  %s18863_s15 = smov 39  }
  0xb1   : > { %15882 = vmatmul.mubr.msk.f32.vlgmr.msra.gmra.mrb[4].mxu0 %vm562_vm2, %v15292_v53  ;;  %v1320_v23 = vpop.permute.xlu0 %1319  ;;  %v1326_v27 = vpop.permute.xlu1 %1325  ;;  %v458_v40 = vrot.slane %v457_v13, 2  ;;  %v453_v53 = vrot.slane %v452_v46, 1 }
  0xb2   : > { %v1332_v28 = vsel %vm1331_vm6, %v1320_v23, %v1322_v12  ;;  %1414 = vmatprep.mubr.f32.mxu0 %v16579_v0  ;;  %v439_v41 = vrot.slane %v438_v14, 1  ;;  %v1334_v43 = vsel %vm1331_vm6, %v1324_v18, %v1326_v27  ;;  %v426_v60 = vadd.f32 %v425_v42, %v424_v30 }
  0xb3   : > { %4250 = vrot.lane.b32.xlu0 %v16987_v20, %s16594_s19  ;;  %15303 = vmatpush1.msk.msra.mxu0 %vm419_vm1, %v1332_v28  ;;  %v459_v47 = vadd.f32 %v458_v40, %v457_v13  ;;  %v454_v2 = vadd.f32 %v453_v53, %v452_v46  ;;  %v17044_v12 = vshrl.u32 %v482_v59, 7 }
  0xb4   : > { %4252 = vrot.lane.b32.xlu1 %v16993_v24, %s16594_s19  ;;  %v440_v62 = vadd.f32 %v439_v41, %v438_v14  ;;  %v476_v10 = vcombine.low %v426_v60, %v433_v61 }
  0xb5   : > { %15304 = vmatmul.mubr.msk.f32.vlgmr.msra.gmra.mrb[0].mxu0 %vm562_vm2, %v15301_v29  ;;  %v1328_v34 = vpop.permute.xlu0 %1327  ;;  %v1330_v38 = vpop.permute.xlu1 %1329  ;;  %v460_v54 = vrot.slane %v459_v47, 1  ;;  %v484_v17 = vsub.s32 %v481_v4, %v17044_v12 }
  0xb6   : > { %v1335_v39 = vsel %vm1331_vm6, %v1326_v27, %v1328_v34  ;;  %1485 = vmatprep.mubr.f32.mxu0 %v16579_v0  ;;  %v1336_v48 = vsel %vm1331_vm6, %v1328_v34, %v1330_v38  ;;  %v477_v15 = vcombine.low %v440_v62, %v447_v1 }
  0xb7   : > { %4248 = vrot.lane.b32.xlu0 %v16974_v9, %s16594_s19  ;;  %15305 = vmatprep.subr.msk.mxu0 %vm419_vm1, %v1335_v39  ;;  %v461_v3 = vadd.f32 %v460_v54, %v459_v47  ;;  %v485_v21 = vrot.slane %v476_v10, %v484_v17  ;;  %v506_v13 = vrot.slane %v468_v8, %v484_v17  ;;  %v15319_v39 = vld [vmem:[%s18849_s3 + $0x14] sm:$0xf] }
  0xb8   : > { %15306 = vmatpush1.msk.msra.mxu0 %vm419_vm1, %v1334_v43  ;;  %4254 = vrot.lane.b32.xlu1 %v17005_v33, %s16594_s19  ;;  %v492_v22 = vrot.slane %v477_v15, %v484_v17 }
  0xb9   : > { %15307 = vmatmul.mubr.msk.f32.vlgmr.msra.gmra.mrb[2].mxu0 %vm562_vm2, %v15301_v29  ;;  %15884 = vmatprep.subr.mxu0 %v16579_v0  ;;  %v1590_v49 = vpop.permute.xlu0 %1589  ;;  %v1592_v50 = vpop.permute.xlu1 %1591  ;;  %v478_v16 = vcombine.low %v454_v2, %v461_v3  ;;  %v15337_v2 = vld [vmem:[%s18849_s3 + $0x1c] sm:$0xf] }
  0xba   : > { %15885 = vmatpush3.msk.msra.mxu0 %vm419_vm1, %v1336_v48  ;;  %15886 = vmatprep.mubr.msk.f32.mxu0 %vm16591_vm3, %v16579_v0  ;;  %v1601_v56 = vsel %vm1599_vm7, %v1590_v49, %v1592_v50  ;;  %v507_v26 = vcombine.low %v485_v21, %v492_v22 }
  0xbb   : > { %4256 = vrot.lane.b32.xlu0 %v17010_v35, %s16594_s19  ;;  %15311 = vmatprep.subr.msk.mxu0 %vm419_vm1, %v1601_v56  ;;  %v499_v25 = vrot.slane %v478_v16, %v484_v17 }
  0xbc   : > { %4258 = vrot.lane.b32.xlu1 %v17023_v45, %s16594_s19  ;;  %v515_v30 = vrot.slane %v507_v26, %v484_v17 }
  0xbd   : > { %15887 = vmatmul.mubr.msk.f32.vlgmr.msra.gmra.mrb[4].mxu0 %vm562_vm2, %v15301_v29  ;;  %v1588_v63 = vpop.permute.xlu0 %1587  ;;  %v1594_v5 = vpop.permute.xlu1 %1593  ;;  %v508_v29 = vcombine.low %v499_v25, %v506_v13 }
  0xbe   : > { %v1600_v6 = vsel %vm1599_vm7, %v1588_v63, %v1590_v49  ;;  %1682 = vmatprep.mubr.f32.mxu0 %v16579_v0  ;;  %v1602_v23 = vsel %vm1599_vm7, %v1592_v50, %v1594_v5 }
  0xbf   : > { %4517 = vrot.lane.b32.xlu0 %v16987_v20, %s18857_s16  ;;  %15312 = vmatpush1.msk.msra.mxu0 %vm419_vm1, %v1600_v6  ;;  %v522_v32 = vrot.slane %v508_v29, %v484_v17 }
  0xc0   : > { %4519 = vrot.lane.b32.xlu1 %v16993_v24, %s18857_s16 }
  0xc1   : > { %15313 = vmatmul.mubr.msk.f32.vlgmr.msra.gmra.mrb[0].mxu0 %vm562_vm2, %v15310_v7  ;;  %v1596_v18 = vpop.permute.xlu0 %1595  ;;  %v1598_v11 = vpop.permute.xlu1 %1597  ;;  %v523_v36 = vcombine.low %v515_v30, %v522_v32  ;;  %v15355_v30 = vld [vmem:[%s18849_s3 + $0x24] sm:$0xf] }
  0xc2   : > { %v1603_v19 = vsel %vm1599_vm7, %v1594_v5, %v1596_v18  ;;  %1753 = vmatprep.mubr.f32.mxu0 %v16579_v0  ;;  %v1604_v27 = vsel %vm1599_vm7, %v1596_v18, %v1598_v11  ;;  %v15346_v11 = vld [vmem:[%s18849_s3 + $0x20] sm:$0xf] }
  0xc3   : > { %4515 = vrot.lane.b32.xlu0 %v16974_v9, %s18857_s16  ;;  %15314 = vmatprep.subr.msk.mxu0 %vm419_vm1, %v1603_v19  ;;  %529 = vst.msk [vmem:[#allocation3] sm:$0x7f] %vm527_vm9, %v523_v36  ;;  %vm18873_vm9 = vcmask 7168  }
  0xc4   : > { %15315 = vmatpush1.msk.msra.mxu0 %vm419_vm1, %v1602_v23  ;;  %4521 = vrot.lane.b32.xlu1 %v17005_v33, %s18857_s16 }
  0xc5   : > { %15316 = vmatmul.mubr.msk.f32.vlgmr.msra.gmra.mrb[2].mxu0 %vm562_vm2, %v15310_v7  ;;  %15889 = vmatprep.subr.mxu0 %v16579_v0  ;;  %v1858_v28 = vpop.permute.xlu0 %1857  ;;  %v1860_v14 = vpop.permute.xlu1 %1859 }
  0xc6   : > { %15890 = vmatpush3.msk.msra.mxu0 %vm419_vm1, %v1604_v27  ;;  %15891 = vmatprep.mubr.msk.f32.mxu0 %vm16591_vm3, %v16579_v0  ;;  %v1869_v31 = vsel %vm18914_vm8, %v1858_v28, %v1860_v14 }
  0xc7   : > { %4523 = vrot.lane.b32.xlu0 %v17010_v35, %s18857_s16  ;;  %15320 = vmatprep.subr.msk.mxu0 %vm419_vm1, %v1869_v31 }
  0xc8   : > { %4525 = vrot.lane.b32.xlu1 %v17023_v45, %s18857_s16  ;;  %s18885_s16 = smov 117  }
  0xc9   : > { %15892 = vmatmul.mubr.msk.f32.vlgmr.msra.gmra.mrb[4].mxu0 %vm562_vm2, %v15310_v7  ;;  %v1856_v34 = vpop.permute.xlu0 %1855  ;;  %v1862_v37 = vpop.permute.xlu1 %1861 }
  0xca   : > { %v1868_v38 = vsel %vm18914_vm8, %v1856_v34, %v1858_v28  ;;  %1950 = vmatprep.mubr.f32.mxu0 %v16579_v0  ;;  %v1870_v43 = vsel %vm18914_vm8, %v1860_v14, %v1862_v37 }
  0xcb   : > { %4785 = vrot.lane.b32.xlu0 %v16987_v20, %s16597_s22  ;;  %15321 = vmatpush1.msk.msra.mxu0 %vm419_vm1, %v1868_v38 }
  0xcc   : > { %4787 = vrot.lane.b32.xlu1 %v16993_v24, %s16597_s22 }
  0xcd   : > { %15322 = vmatmul.mubr.msk.f32.vlgmr.msra.gmra.mrb[0].mxu0 %vm562_vm2, %v15319_v39  ;;  %v1864_v40 = vpop.permute.xlu0 %1863  ;;  %v1866_v41 = vpop.permute.xlu1 %1865 }
  0xce   : > { %v1871_v42 = vsel %vm18914_vm8, %v1862_v37, %v1864_v40  ;;  %2021 = vmatprep.mubr.f32.mxu0 %v16579_v0  ;;  %v1872_v44 = vsel %vm18914_vm8, %v1864_v40, %v1866_v41  ;;  %vm18915_vm8 = vcmask 1031168  }
  0xcf   : > { %4783 = vrot.lane.b32.xlu0 %v16974_v9, %s16597_s22  ;;  %15323 = vmatprep.subr.msk.mxu0 %vm419_vm1, %v1871_v42 }
  0xd0   : > { %15324 = vmatpush1.msk.msra.mxu0 %vm419_vm1, %v1870_v43  ;;  %4789 = vrot.lane.b32.xlu1 %v17005_v33, %s16597_s22 }
  0xd1   : > { %15325 = vmatmul.mubr.msk.f32.vlgmr.msra.gmra.mrb[2].mxu0 %vm562_vm2, %v15319_v39  ;;  %15894 = vmatprep.subr.mxu0 %v16579_v0  ;;  %v2126_v46 = vpop.permute.xlu0 %2125  ;;  %v2128_v47 = vpop.permute.xlu1 %2127 }
  0xd2   : > { %15895 = vmatpush3.msk.msra.mxu0 %vm419_vm1, %v1872_v44  ;;  %15896 = vmatprep.mubr.msk.f32.mxu0 %vm16591_vm3, %v16579_v0  ;;  %v2137_v48 = vsel %vm18912_vm10, %v2126_v46, %v2128_v47  ;;  %v15364_v44 = vld [vmem:[%s18849_s3 + $0x28] sm:$0xf] }
  0xd3   : > { %4791 = vrot.lane.b32.xlu0 %v17010_v35, %s16597_s22  ;;  %15329 = vmatprep.subr.msk.mxu0 %vm419_vm1, %v2137_v48 }
  0xd4   : > { %4793 = vrot.lane.b32.xlu1 %v17023_v45, %s16597_s22 }
  0xd5   : > { %15897 = vmatmul.mubr.msk.f32.vlgmr.msra.gmra.mrb[4].mxu0 %vm562_vm2, %v15319_v39  ;;  %v2124_v49 = vpop.permute.xlu0 %2123  ;;  %v2130_v50 = vpop.permute.xlu1 %2129 }
  0xd6   : > { %v2136_v51 = vsel %vm18912_vm10, %v2124_v49, %v2126_v46  ;;  %2218 = vmatprep.mubr.f32.mxu0 %v16579_v0  ;;  %v2138_v56 = vsel %vm18912_vm10, %v2128_v47, %v2130_v50 }
  0xd7   : > { %5052 = vrot.lane.b32.xlu0 %v16987_v20, %s18885_s16  ;;  %15330 = vmatpush1.msk.msra.mxu0 %vm419_vm1, %v2136_v51 }
  0xd8   : > { %5054 = vrot.lane.b32.xlu1 %v16993_v24, %s18885_s16 }
  0xd9   : > { %15331 = vmatmul.mubr.msk.f32.vlgmr.msra.gmra.mrb[0].mxu0 %vm562_vm2, %v15328_v52  ;;  %v2132_v53 = vpop.permute.xlu0 %2131  ;;  %v2134_v54 = vpop.permute.xlu1 %2133 }
  0xda   : > { %v2139_v55 = vsel %vm18912_vm10, %v2130_v50, %v2132_v53  ;;  %2289 = vmatprep.mubr.f32.mxu0 %v16579_v0  ;;  %v2140_v57 = vsel %vm18912_vm10, %v2132_v53, %v2134_v54  ;;  %vm18924_vm10 = vcmask 146432  }
  0xdb   : > { %5050 = vrot.lane.b32.xlu0 %v16974_v9, %s18885_s16  ;;  %15332 = vmatprep.subr.msk.mxu0 %vm419_vm1, %v2139_v55 }
  0xdc   : > { %15333 = vmatpush1.msk.msra.mxu0 %vm419_vm1, %v2138_v56  ;;  %5056 = vrot.lane.b32.xlu1 %v17005_v33, %s18885_s16 }
  0xdd   : > { %15334 = vmatmul.mubr.msk.f32.vlgmr.msra.gmra.mrb[2].mxu0 %vm562_vm2, %v15328_v52  ;;  %15899 = vmatprep.subr.mxu0 %v16579_v0  ;;  %v2394_v58 = vpop.permute.xlu0 %2393  ;;  %v2396_v60 = vpop.permute.xlu1 %2395 }
  0xde   : > { %15900 = vmatpush3.msk.msra.mxu0 %vm419_vm1, %v2140_v57  ;;  %15901 = vmatprep.mubr.msk.f32.mxu0 %vm16591_vm3, %v16579_v0  ;;  %v2405_v61 = vsel %vm18911_vm11, %v2394_v58, %v2396_v60  ;;  %v15373_v57 = vld [vmem:[%s18849_s3 + $0x2c] sm:$0xf] }
  0xdf   : > { %5058 = vrot.lane.b32.xlu0 %v17010_v35, %s18885_s16  ;;  %15338 = vmatprep.subr.msk.mxu0 %vm419_vm1, %v2405_v61 }
  0xe0   : > { %5060 = vrot.lane.b32.xlu1 %v17023_v45, %s18885_s16 }
  0xe1   : > { %15902 = vmatmul.mubr.msk.f32.vlgmr.msra.gmra.mrb[4].mxu0 %vm562_vm2, %v15328_v52  ;;  %v2392_v62 = vpop.permute.xlu0 %2391  ;;  %v2398_v63 = vpop.permute.xlu1 %2397 }
  0xe2   : > { %v2404_v1 = vsel %vm18911_vm11, %v2392_v62, %v2394_v58  ;;  %2486 = vmatprep.mubr.f32.mxu0 %v16579_v0  ;;  %v2406_v6 = vsel %vm18911_vm11, %v2396_v60, %v2398_v63 }
  0xe3   : > { %5319 = vrot.lane.b32.xlu0 %v16987_v20, %s18863_s15  ;;  %15339 = vmatpush1.msk.msra.mxu0 %vm419_vm1, %v2404_v1 }
  0xe4   : > { %5321 = vrot.lane.b32.xlu1 %v16993_v24, %s18863_s15 }
  0xe5   : > { %15340 = vmatmul.mubr.msk.f32.vlgmr.msra.gmra.mrb[0].mxu0 %vm562_vm2, %v15337_v2  ;;  %v2400_v3 = vpop.permute.xlu0 %2399  ;;  %v2402_v4 = vpop.permute.xlu1 %2401 }
  0xe6   : > { %v2407_v5 = vsel %vm18911_vm11, %v2398_v63, %v2400_v3  ;;  %2557 = vmatprep.mubr.f32.mxu0 %v16579_v0  ;;  %v2408_v7 = vsel %vm18911_vm11, %v2400_v3, %v2402_v4  ;;  %vm18913_vm11 = vcmask 154624  }
  0xe7   : > { %5317 = vrot.lane.b32.xlu0 %v16974_v9, %s18863_s15  ;;  %15341 = vmatprep.subr.msk.mxu0 %vm419_vm1, %v2407_v5 }
  0xe8   : > { %15342 = vmatpush1.msk.msra.mxu0 %vm419_vm1, %v2406_v6  ;;  %5323 = vrot.lane.b32.xlu1 %v17005_v33, %s18863_s15 }
  0xe9   : > { %15343 = vmatmul.mubr.msk.f32.vlgmr.msra.gmra.mrb[2].mxu0 %vm562_vm2, %v15337_v2  ;;  %15904 = vmatprep.subr.mxu0 %v16579_v0  ;;  %v2662_v10 = vpop.permute.xlu0 %2661  ;;  %v2664_v8 = vpop.permute.xlu1 %2663 }
  0xea   : > { %15905 = vmatpush3.msk.msra.mxu0 %vm419_vm1, %v2408_v7  ;;  %15906 = vmatprep.mubr.msk.f32.mxu0 %vm16591_vm3, %v16579_v0  ;;  %v2673_v15 = vsel %vm18891_vm12, %v2662_v10, %v2664_v8  ;;  %v15382_v7 = vld [vmem:[%s18849_s3 + $0x30] sm:$0xf] }
  0xeb   : > { %5325 = vrot.lane.b32.xlu0 %v17010_v35, %s18863_s15  ;;  %15347 = vmatprep.subr.msk.mxu0 %vm419_vm1, %v2673_v15 }
  0xec   : > { %5327 = vrot.lane.b32.xlu1 %v17023_v45, %s18863_s15  ;;  %s18867_s15 = smov 37  }
  0xed   : > { %15907 = vmatmul.mubr.msk.f32.vlgmr.msra.gmra.mrb[4].mxu0 %vm562_vm2, %v15337_v2  ;;  %v2660_v16 = vpop.permute.xlu0 %2659  ;;  %v2666_v17 = vpop.permute.xlu1 %2665 }
  0xee   : > { %v2672_v18 = vsel %vm18891_vm12, %v2660_v16, %v2662_v10  ;;  %2754 = vmatprep.mubr.f32.mxu0 %v16579_v0  ;;  %v2674_v23 = vsel %vm18891_vm12, %v2664_v8, %v2666_v17 }
  0xef   : > { %5587 = vrot.lane.b32.xlu0 %v16987_v20, %s18865_s20  ;;  %15348 = vmatpush1.msk.msra.mxu0 %vm419_vm1, %v2672_v18 }
  0xf0   : > { %5589 = vrot.lane.b32.xlu1 %v16993_v24, %s18865_s20 }
  0xf1   : > { %15349 = vmatmul.mubr.msk.f32.vlgmr.msra.gmra.mrb[0].mxu0 %vm562_vm2, %v15346_v11  ;;  %v2668_v19 = vpop.permute.xlu0 %2667  ;;  %v2670_v21 = vpop.permute.xlu1 %2669 }
  0xf2   : > { %v2675_v22 = vsel %vm18891_vm12, %v2666_v17, %v2668_v19  ;;  %2825 = vmatprep.mubr.f32.mxu0 %v16579_v0  ;;  %v2676_v25 = vsel %vm18891_vm12, %v2668_v19, %v2670_v21  ;;  %vm18905_vm12 = vcmask 310272  }
  0xf3   : > { %5585 = vrot.lane.b32.xlu0 %v16974_v9, %s18865_s20  ;;  %15350 = vmatprep.subr.msk.mxu0 %vm419_vm1, %v2675_v22  ;;  %v15391_v22 = vld [vmem:[%s18849_s3 + $0x34] sm:$0xf] }
  0xf4   : > { %15351 = vmatpush1.msk.msra.mxu0 %vm419_vm1, %v2674_v23  ;;  %5591 = vrot.lane.b32.xlu1 %v17005_v33, %s18865_s20 }
  0xf5   : > { %15352 = vmatmul.mubr.msk.f32.vlgmr.msra.gmra.mrb[2].mxu0 %vm562_vm2, %v15346_v11  ;;  %15909 = vmatprep.subr.mxu0 %v16579_v0  ;;  %v2930_v13 = vpop.permute.xlu0 %2929  ;;  %v2932_v26 = vpop.permute.xlu1 %2931 }
  0xf6   : > { %15910 = vmatpush3.msk.msra.mxu0 %vm419_vm1, %v2676_v25  ;;  %15911 = vmatprep.mubr.msk.f32.mxu0 %vm16591_vm3, %v16579_v0  ;;  %v2941_v27 = vsel %vm18888_vm13, %v2930_v13, %v2932_v26 }
  0xf7   : > { %5593 = vrot.lane.b32.xlu0 %v17010_v35, %s18865_s20  ;;  %15356 = vmatprep.subr.msk.mxu0 %vm419_vm1, %v2941_v27 }
  0xf8   : > { %5595 = vrot.lane.b32.xlu1 %v17023_v45, %s18865_s20  ;;  %s18869_s20 = smov 29  }
  0xf9   : > { %15912 = vmatmul.mubr.msk.f32.vlgmr.msra.gmra.mrb[4].mxu0 %vm562_vm2, %v15346_v11  ;;  %v2928_v28 = vpop.permute.xlu0 %2927  ;;  %v2934_v29 = vpop.permute.xlu1 %2933 }
  0xfa   : > { %v2940_v14 = vsel %vm18888_vm13, %v2928_v28, %v2930_v13  ;;  %3022 = vmatprep.mubr.f32.mxu0 %v16579_v0  ;;  %v2942_v36 = vsel %vm18888_vm13, %v2932_v26, %v2934_v29  ;;  %v3992_v13 = vld [vmem:[#allocation2 + $0x14] sm:$0xf] }
  0xfb   : > { %5855 = vrot.lane.b32.xlu0 %v16987_v20, %s18867_s15  ;;  %15357 = vmatpush1.msk.msra.mxu0 %vm419_vm1, %v2940_v14 }
  0xfc   : > { %5857 = vrot.lane.b32.xlu1 %v16993_v24, %s18867_s15 }
  0xfd   : > { %15358 = vmatmul.mubr.msk.f32.vlgmr.msra.gmra.mrb[0].mxu0 %vm562_vm2, %v15355_v30  ;;  %v2936_v31 = vpop.permute.xlu0 %2935  ;;  %v2938_v32 = vpop.permute.xlu1 %2937 }
  0xfe   : > { %v2943_v34 = vsel %vm18888_vm13, %v2934_v29, %v2936_v31  ;;  %3093 = vmatprep.mubr.f32.mxu0 %v16579_v0  ;;  %v2944_v37 = vsel %vm18888_vm13, %v2936_v31, %v2938_v32  ;;  %v15400_v32 = vld [vmem:[%s18849_s3 + $0x38] sm:$0xf]  ;;  %vm18898_vm13 = vcmask 318464  }
  0xff   : > { %5853 = vrot.lane.b32.xlu0 %v16974_v9, %s18867_s15  ;;  %15359 = vmatprep.subr.msk.mxu0 %vm419_vm1, %v2943_v34 }
 0x100   : > { %15360 = vmatpush1.msk.msra.mxu0 %vm419_vm1, %v2942_v36  ;;  %5859 = vrot.lane.b32.xlu1 %v17005_v33, %s18867_s15 }
 0x101   : > { %15361 = vmatmul.mubr.msk.f32.vlgmr.msra.gmra.mrb[2].mxu0 %vm562_vm2, %v15355_v30  ;;  %15914 = vmatprep.subr.mxu0 %v16579_v0  ;;  %v3198_v38 = vpop.permute.xlu0 %3197 }
 0x102   : > { %v3200_v39 = vpop.permute.xlu1 %3199  ;;  %15915 = vmatpush3.msk.msra.mxu0 %vm419_vm1, %v2944_v37  ;;  %15916 = vmatprep.mubr.msk.f32.mxu0 %vm16591_vm3, %v16579_v0 }
 0x103   : > { %5861 = vrot.lane.b32.xlu0 %v17010_v35, %s18867_s15  ;;  %v3209_v40 = vsel %vm18879_vm14, %v3198_v38, %v3200_v39 }
 0x104   : > { %15365 = vmatprep.subr.msk.mxu0 %vm419_vm1, %v3209_v40  ;;  %5863 = vrot.lane.b32.xlu1 %v17023_v45, %s18867_s15  ;;  %s16603_s15 = smov 28  }
 0x105   : > { %15917 = vmatmul.mubr.msk.f32.vlgmr.msra.gmra.mrb[4].mxu0 %vm562_vm2, %v15355_v30  ;;  %v3196_v41 = vpop.permute.xlu0 %3195 }
 0x106   : > { %v3202_v42 = vpop.permute.xlu1 %3201  ;;  %v3208_v43 = vsel %vm18879_vm14, %v3196_v41, %v3198_v38  ;;  %3290 = vmatprep.mubr.f32.mxu0 %v16579_v0  ;;  %v17254_v0 = vld [vmem:[#allocation4] sm:$0xff] }
 0x107   : > { %6123 = vrot.lane.b32.xlu0 %v16987_v20, %s18869_s20  ;;  %15366 = vmatpush1.msk.msra.mxu0 %vm419_vm1, %v3208_v43  ;;  %v3210_v49 = vsel %vm18879_vm14, %v3200_v39, %v3202_v42 }
 0x108   : > { %6125 = vrot.lane.b32.xlu1 %v16993_v24, %s18869_s20 }
 0x109   : > { %15367 = vmatmul.mubr.msk.f32.vlgmr.msra.gmra.mrb[0].mxu0 %vm562_vm2, %v15364_v44  ;;  %v3204_v46 = vpop.permute.xlu0 %3203 }
 0x10a   : > { %v3206_v47 = vpop.permute.xlu1 %3205  ;;  %v3211_v48 = vsel %vm18879_vm14, %v3202_v42, %v3204_v46  ;;  %3361 = vmatprep.mubr.f32.mxu0 %v17254_v0 }
 0x10b   : > { %6121 = vrot.lane.b32.xlu0 %v16974_v9, %s18869_s20  ;;  %15368 = vmatprep.subr.msk.mxu0 %vm419_vm1, %v3211_v48  ;;  %v3212_v50 = vsel %vm18879_vm14, %v3204_v46, %v3206_v47  ;;  %v15409_v47 = vld [vmem:[%s18849_s3 + $0x3c] sm:$0xf]  ;;  %vm18918_vm14 = vcmask 965632  }
 0x10c   : > { %15369 = vmatpush1.msk.msra.mxu0 %vm419_vm1, %v3210_v49  ;;  %6127 = vrot.lane.b32.xlu1 %v17005_v33, %s18869_s20 }
 0x10d   : > { %15370 = vmatmul.mubr.msk.f32.vlgmr.msra.gmra.mrb[2].mxu0 %vm562_vm2, %v15364_v44  ;;  %15919 = vmatprep.subr.mxu0 %v17254_v0  ;;  %v3466_v51 = vpop.permute.xlu0 %3465 }
 0x10e   : > { %v3468_v52 = vpop.permute.xlu1 %3467  ;;  %15920 = vmatpush3.msk.msra.mxu0 %vm419_vm1, %v3212_v50  ;;  %15921 = vmatprep.mubr.msk.f32.mxu0 %vm16591_vm3, %v17254_v0 }
 0x10f   : > { %6129 = vrot.lane.b32.xlu0 %v17010_v35, %s18869_s20  ;;  %v3477_v53 = vsel %vm18876_vm15, %v3466_v51, %v3468_v52 }
 0x110   : > { %15374 = vmatprep.subr.msk.mxu0 %vm419_vm1, %v3477_v53  ;;  %6131 = vrot.lane.b32.xlu1 %v17023_v45, %s18869_s20  ;;  %s16604_s20 = smov 27  }
 0x111   : > { %15922 = vmatmul.mubr.msk.f32.vlgmr.msra.gmra.mrb[4].mxu0 %vm562_vm2, %v15364_v44  ;;  %v3464_v54 = vpop.permute.xlu0 %3463 }
 0x112   : > { %v3470_v55 = vpop.permute.xlu1 %3469  ;;  %v3476_v56 = vsel %vm18876_vm15, %v3464_v54, %v3466_v51  ;;  %3558 = vmatprep.mubr.f32.mxu0 %v17254_v0 }
 0x113   : > { %6391 = vrot.lane.b32.xlu0 %v16987_v20, %s16603_s15  ;;  %15375 = vmatpush1.msk.msra.mxu0 %vm419_vm1, %v3476_v56  ;;  %v3478_v62 = vsel %vm18876_vm15, %v3468_v52, %v3470_v55 }
 0x114   : > { %6393 = vrot.lane.b32.xlu1 %v16993_v24, %s16603_s15 }
 0x115   : > { %15376 = vmatmul.mubr.msk.f32.vlgmr.msra.gmra.mrb[0].mxu0 %vm562_vm2, %v15373_v57  ;;  %v3472_v58 = vpop.permute.xlu0 %3471 }
 0x116   : > { %v3474_v60 = vpop.permute.xlu1 %3473  ;;  %v3479_v61 = vsel %vm18876_vm15, %v3470_v55, %v3472_v58  ;;  %3629 = vmatprep.mubr.f32.mxu0 %v17254_v0  ;;  %v1299_v55 = vld [vmem:[#allocation3] sm:$0x3f] }
 0x117   : > { %6389 = vrot.lane.b32.xlu0 %v16974_v9, %s16603_s15  ;;  %15377 = vmatprep.subr.msk.mxu0 %vm419_vm1, %v3479_v61  ;;  %v3480_v63 = vsel %vm18876_vm15, %v3472_v58, %v3474_v60  ;;  %vm18882_vm15 = vcmask 973824   ;;  %v1835_v60 = vld [vmem:[#allocation3] sm:$0x3f] }
 0x118   : > { %15378 = vmatpush1.msk.msra.mxu0 %vm419_vm1, %v3478_v62  ;;  %6395 = vrot.lane.b32.xlu1 %v17005_v33, %s16603_s15  ;;  %v2103_v62 = vld [vmem:[#allocation3] sm:$0x3f] }
 0x119   : > { %15379 = vmatmul.mubr.msk.f32.vlgmr.msra.gmra.mrb[2].mxu0 %vm562_vm2, %v15373_v57  ;;  %15924 = vmatprep.subr.mxu0 %v17254_v0  ;;  %v3734_v1 = vpop.permute.xlu0 %3733 }
 0x11a   : > { %v3736_v2 = vpop.permute.xlu1 %3735  ;;  %15925 = vmatpush3.msk.msra.mxu0 %vm419_vm1, %v3480_v63  ;;  %15926 = vmatprep.mubr.msk.f32.mxu0 %vm16591_vm3, %v17254_v0 }
 0x11b   : > { %6397 = vrot.lane.b32.xlu0 %v17010_v35, %s16603_s15  ;;  %v3745_v3 = vsel %vm18873_vm9, %v3734_v1, %v3736_v2 }
 0x11c   : > { %15383 = vmatprep.subr.msk.mxu0 %vm419_vm1, %v3745_v3  ;;  %6399 = vrot.lane.b32.xlu1 %v17023_v45, %s16603_s15  ;;  %v2371_v3 = vld [vmem:[#allocation3] sm:$0x3f] }
 0x11d   : > { %15927 = vmatmul.mubr.msk.f32.vlgmr.msra.gmra.mrb[4].mxu0 %vm562_vm2, %v15373_v57  ;;  %v3732_v4 = vpop.permute.xlu0 %3731 }
 0x11e   : > { %v3738_v5 = vpop.permute.xlu1 %3737  ;;  %v3744_v6 = vsel %vm18873_vm9, %v3732_v4, %v3734_v1  ;;  %3826 = vmatprep.mubr.f32.mxu0 %v17254_v0 }
 0x11f   : > { %6658 = vrot.lane.b32.xlu0 %v16987_v20, %s16604_s20  ;;  %15384 = vmatpush1.msk.msra.mxu0 %vm419_vm1, %v3744_v6  ;;  %v3746_v16 = vsel %vm18873_vm9, %v3736_v2, %v3738_v5 }
 0x120   : > { %6660 = vrot.lane.b32.xlu1 %v16993_v24, %s16604_s20 }
 0x121   : > { %15385 = vmatmul.mubr.msk.f32.vlgmr.msra.gmra.mrb[0].mxu0 %vm562_vm2, %v15382_v7  ;;  %v3740_v10 = vpop.permute.xlu0 %3739 }
 0x122   : > { %v3742_v8 = vpop.permute.xlu1 %3741  ;;  %v3747_v15 = vsel %vm18873_vm9, %v3738_v5, %v3740_v10  ;;  %3897 = vmatprep.mubr.f32.mxu0 %v17254_v0  ;;  %v2639_v5 = vld [vmem:[#allocation3] sm:$0x3f] }
 0x123   : > { %6656 = vrot.lane.b32.xlu0 %v16974_v9, %s16604_s20  ;;  %15386 = vmatprep.subr.msk.mxu0 %vm419_vm1, %v3747_v15  ;;  %v3748_v17 = vsel %vm18873_vm9, %v3740_v10, %v3742_v8  ;;  %vm18916_vm9 = vcmask 1039360   ;;  %v2907_v8 = vld [vmem:[#allocation3] sm:$0x3f] }
 0x124   : > { %15387 = vmatpush1.msk.msra.mxu0 %vm419_vm1, %v3746_v16  ;;  %6662 = vrot.lane.b32.xlu1 %v17005_v33, %s16604_s20  ;;  %v15427_v16 = vld [vmem:[%s18849_s3 + $0x44] sm:$0xf] }
 0x125   : > { %15388 = vmatmul.mubr.msk.f32.vlgmr.msra.gmra.mrb[2].mxu0 %vm562_vm2, %v15382_v7  ;;  %15929 = vmatprep.subr.mxu0 %v17254_v0  ;;  %v4251_v18 = vpop.permute.xlu0 %4250 }
 0x126   : > { %15930 = vmatpush3.msk.msra.mxu0 %vm419_vm1, %v3748_v17  ;;  %v4253_v11 = vpop.permute.xlu1 %4252  ;;  %15931 = vmatprep.mubr.msk.f32.mxu0 %vm16591_vm3, %v17254_v0  ;;  %v3175_v17 = vld [vmem:[#allocation3] sm:$0x3f] }
 0x127   : > { %6664 = vrot.lane.b32.xlu0 %v17010_v35, %s16604_s20  ;;  %15392 = vmatprep.subr.msk.mxu0 %vm419_vm1, %v16987_v20  ;;  %v4261_v26 = vsel %vm18916_vm9, %v4251_v18, %v4253_v11 }
 0x128   : > { %6666 = vrot.lane.b32.xlu1 %v17023_v45, %s16604_s20 }
 0x129   : > { %15932 = vmatmul.mubr.msk.f32.vlgmr.msra.gmra.mrb[4].mxu0 %vm562_vm2, %v15382_v7  ;;  %v4249_v19 = vpop.permute.xlu0 %4248 }
 0x12a   : > { %v4255_v21 = vpop.permute.xlu1 %4254  ;;  %15393 = vmatpush1.msk.msra.mxu0 %vm419_vm1, %v16974_v9  ;;  %4075 = vmatprep.mubr.f32.mxu0 %v17254_v0  ;;  %v4260_v14 = vsel %vm18916_vm9, %v4249_v19, %v4251_v18  ;;  %v3443_v19 = vld [vmem:[#allocation3] sm:$0x3f] }
 0x12b   : > { %6925 = vrot.lane.b32.xlu0 %v16987_v20, %s18877_s17  ;;  %15395 = vmatprep.subr.msk.mxu0 %vm419_vm1, %v17005_v33  ;;  %v4262_v34 = vsel %vm18916_vm9, %v4253_v11, %v4255_v21 }
 0x12c   : > { %6927 = vrot.lane.b32.xlu1 %v16993_v24, %s18877_s17 }
 0x12d   : > { %15394 = vmatmul.mubr.msk.f32.vlgmr.msra.gmra.mrb[0].mxu0 %vm562_vm2, %v15391_v22  ;;  %v4257_v23 = vpop.permute.xlu0 %4256 }
 0x12e   : > { %v4259_v25 = vpop.permute.xlu1 %4258  ;;  %15396 = vmatpush1.msk.msra.mxu0 %vm419_vm1, %v16993_v24  ;;  %4146 = vmatprep.mubr.f32.mxu0 %v17254_v0  ;;  %v4263_v29 = vsel %vm18916_vm9, %v4255_v21, %v4257_v23 }
 0x12f   : > { %6923 = vrot.lane.b32.xlu0 %v16974_v9, %s18877_s17  ;;  %15934 = vmatprep.subr.mxu0 %v17254_v0  ;;  %v4264_v39 = vsel %vm18916_vm9, %v4257_v23, %v4259_v25 }
 0x130   : > { %6929 = vrot.lane.b32.xlu1 %v17005_v33, %s18877_s17 }
 0x131   : > { %15397 = vmatmul.mubr.msk.f32.vlgmr.msra.gmra.mrb[2].mxu0 %vm562_vm2, %v15391_v22  ;;  %v4518_v27 = vpop.permute.xlu0 %4517 }
 0x132   : > { %15935 = vmatpush3.msk.msra.mxu0 %vm419_vm1, %v3992_v13  ;;  %v4520_v28 = vpop.permute.xlu1 %4519  ;;  %15936 = vmatprep.mubr.msk.f32.mxu0 %vm16591_vm3, %v17254_v0 }
 0x133   : > { %6931 = vrot.lane.b32.xlu0 %v17010_v35, %s18877_s17  ;;  %15401 = vmatprep.subr.msk.mxu0 %vm419_vm1, %v4261_v26  ;;  %v4529_v38 = vsel %vm18882_vm15, %v4518_v27, %v4520_v28  ;;  %v3979_v26 = vld [vmem:[#allocation3] sm:$0x3f] }
 0x134   : > { %6933 = vrot.lane.b32.xlu1 %v17023_v45, %s18877_s17  ;;  %s16607_s17 = smov 17  }
 0x135   : > { %15937 = vmatmul.mubr.msk.f32.vlgmr.msra.gmra.mrb[4].mxu0 %vm562_vm2, %v15391_v22  ;;  %v4516_v30 = vpop.permute.xlu0 %4515  ;;  %v3711_v22 = vld [vmem:[#allocation3] sm:$0x3f] }
 0x136   : > { %15402 = vmatpush1.msk.msra.mxu0 %vm419_vm1, %v4260_v14  ;;  %v4522_v31 = vpop.permute.xlu1 %4521  ;;  %4342 = vmatprep.mubr.f32.mxu0 %v17254_v0  ;;  %v4528_v43 = vsel %vm18882_vm15, %v4516_v30, %v4518_v27 }
 0x137   : > { %7193 = vrot.lane.b32.xlu0 %v16987_v20, %s18906_s12  ;;  %15404 = vmatprep.subr.msk.mxu0 %vm419_vm1, %v4263_v29  ;;  %v4530_v48 = vsel %vm18882_vm15, %v4520_v28, %v4522_v31  ;;  %v4228_v28 = vld [vmem:[#allocation3 + $0x1] sm:$0x1f] }
 0x138   : > { %7195 = vrot.lane.b32.xlu1 %v16993_v24, %s18906_s12 }
 0x139   : > { %15403 = vmatmul.mubr.msk.f32.vlgmr.msra.gmra.mrb[0].mxu0 %vm562_vm2, %v15400_v32  ;;  %v4524_v36 = vpop.permute.xlu0 %4523 }
 0x13a   : > { %15405 = vmatpush1.msk.msra.mxu0 %vm419_vm1, %v4262_v34  ;;  %v4526_v37 = vpop.permute.xlu1 %4525  ;;  %4413 = vmatprep.mubr.f32.mxu0 %v17254_v0  ;;  %v4531_v42 = vsel %vm18882_vm15, %v4522_v31, %v4524_v36  ;;  %v4495_v31 = vld [vmem:[#allocation3 + $0x1] sm:$0x3f]  ;;  %v15436_v34 = vld [vmem:[%s18849_s3 + $0x48] sm:$0xf] }
 0x13b   : > { %7191 = vrot.lane.b32.xlu0 %v16974_v9, %s18906_s12  ;;  %15939 = vmatprep.subr.mxu0 %v17254_v0 }
 0x13c   : > { %7197 = vrot.lane.b32.xlu1 %v17005_v33, %s18906_s12 }
 0x13d   : > { %15406 = vmatmul.mubr.msk.f32.vlgmr.msra.gmra.mrb[2].mxu0 %vm562_vm2, %v15400_v32  ;;  %v4786_v40 = vpop.permute.xlu0 %4785 }
 0x13e   : > { %15940 = vmatpush3.msk.msra.mxu0 %vm419_vm1, %v4264_v39  ;;  %v4788_v41 = vpop.permute.xlu1 %4787  ;;  %15941 = vmatprep.mubr.msk.f32.mxu0 %vm16591_vm3, %v17254_v0  ;;  %v5030_v39 = vld [vmem:[#allocation3 + $0x1] sm:$0x3f] }
 0x13f   : > { %7199 = vrot.lane.b32.xlu0 %v17010_v35, %s18906_s12  ;;  %15410 = vmatprep.subr.msk.mxu0 %vm419_vm1, %v4529_v38 }
 0x140   : > { %7201 = vrot.lane.b32.xlu1 %v17023_v45, %s18906_s12 }
 0x141   : > { %15942 = vmatmul.mubr.msk.f32.vlgmr.msra.gmra.mrb[4].mxu0 %vm562_vm2, %v15400_v32  ;;  %v4784_v44 = vpop.permute.xlu0 %4783 }
 0x142   : > { %15411 = vmatpush1.msk.msra.mxu0 %vm419_vm1, %v4528_v43  ;;  %v4790_v46 = vpop.permute.xlu1 %4789  ;;  %4610 = vmatprep.mubr.f32.mxu0 %v17254_v0  ;;  %v4795_v53 = vsel %vm18918_vm14, %v4784_v44, %v4786_v40 }
 0x143   : > { %7460 = vrot.lane.b32.xlu0 %v16987_v20, %s16607_s17  ;;  %15413 = vmatprep.subr.msk.mxu0 %vm419_vm1, %v4531_v42  ;;  %v4796_v20 = vsel %vm18918_vm14, %v4786_v40, %v4788_v41  ;;  %v4797_v57 = vsel %vm18918_vm14, %v4788_v41, %v4790_v46  ;;  %v5297_v41 = vld [vmem:[#allocation3 + $0x1] sm:$0x3f] }
 0x144   : > { %7462 = vrot.lane.b32.xlu1 %v16993_v24, %s16607_s17  ;;  %v4532_v24 = vsel %vm18882_vm15, %v4524_v36, %v4526_v37  ;;  %vm18917_vm15 = vcmask 957440   ;;  %v4763_v36 = vld [vmem:[#allocation3 + $0x1] sm:$0x3f] }
 0x145   : > { %15412 = vmatmul.mubr.msk.f32.vlgmr.msra.gmra.mrb[0].mxu0 %vm562_vm2, %v15409_v47  ;;  %v4792_v49 = vpop.permute.xlu0 %4791 }
 0x146   : > { %15414 = vmatpush1.msk.msra.mxu0 %vm419_vm1, %v4530_v48  ;;  %v4794_v50 = vpop.permute.xlu1 %4793  ;;  %4681 = vmatprep.mubr.f32.mxu0 %v17254_v0  ;;  %v5833_v48 = vld [vmem:[#allocation3 + $0x1] sm:$0x3f] }
 0x147   : > { %7458 = vrot.lane.b32.xlu0 %v16974_v9, %s16607_s17  ;;  %15944 = vmatprep.subr.mxu0 %v17254_v0  ;;  %v1031_v9 = vld [vmem:[#allocation3] sm:$0x3f]  ;;  %v4799_v1 = vsel %vm18918_vm14, %v4792_v49, %v4794_v50 }
 0x148   : > { %7464 = vrot.lane.b32.xlu1 %v17005_v33, %s16607_s17  ;;  %v4798_v33 = vsel %vm18918_vm14, %v4790_v46, %v4792_v49  ;;  %v5565_v46 = vld [vmem:[#allocation3 + $0x1] sm:$0x3f] }
 0x149   : > { %15415 = vmatmul.mubr.msk.f32.vlgmr.msra.gmra.mrb[2].mxu0 %vm562_vm2, %v15409_v47  ;;  %v5053_v51 = vpop.permute.xlu0 %5052 }
 0x14a   : > { %15945 = vmatpush3.msk.msra.mxu0 %vm419_vm1, %v4532_v24  ;;  %v5055_v52 = vpop.permute.xlu1 %5054  ;;  %15946 = vmatprep.mubr.msk.f32.mxu0 %vm16591_vm3, %v17254_v0  ;;  %v6101_v24 = vld [vmem:[#allocation3 + $0x1] sm:$0x3f] }
 0x14b   : > { %7466 = vrot.lane.b32.xlu0 %v17010_v35, %s16607_s17  ;;  %15419 = vmatprep.subr.msk.mxu0 %vm419_vm1, %v4796_v20  ;;  %v15418_v35 = vld [vmem:[%s18849_s3 + $0x40] sm:$0xf]  ;;  %v5063_v63 = vsel %vm18917_vm15, %v5053_v51, %v5055_v52 }
 0x14c   : > { %7468 = vrot.lane.b32.xlu1 %v17023_v45, %s16607_s17  ;;  %v1567_v45 = vld [vmem:[#allocation3] sm:$0x3f] }
 0x14d   : > { %15947 = vmatmul.mubr.msk.f32.vlgmr.msra.gmra.mrb[4].mxu0 %vm562_vm2, %v15409_v47  ;;  %v5051_v54 = vpop.permute.xlu0 %5050 }
 0x14e   : > { %15420 = vmatpush1.msk.msra.mxu0 %vm419_vm1, %v4795_v53  ;;  %v5057_v56 = vpop.permute.xlu1 %5056  ;;  %4877 = vmatprep.mubr.f32.mxu0 %v17254_v0  ;;  %v5062_v7 = vsel %vm18917_vm15, %v5051_v54, %v5053_v51  ;;  %v6636_v54 = vld [vmem:[#allocation3 + $0x1] sm:$0x3f] }
 0x14f   : > { %1033 = vrot.lane.b32.xlu0 %v1031_v9, %s16594_s19  ;;  %15422 = vmatprep.subr.msk.mxu0 %vm419_vm1, %v4798_v33  ;;  %v5064_v18 = vsel %vm18917_vm15, %v5055_v52, %v5057_v56  ;;  %v15445_v52 = vld [vmem:[%s18849_s3 + $0x4c] sm:$0xf]  ;;  %v6369_v9 = vld [vmem:[#allocation3 + $0x1] sm:$0x3f] }
 0x150   : > { %1301 = vrot.lane.b32.xlu1 %v1299_v55, %s18884_s11  ;;  %s18889_s11 = smov 26  }
 0x151   : > { %15421 = vmatmul.mubr.msk.f32.vlgmr.msra.gmra.mrb[0].mxu0 %vm562_vm2, %v15418_v35  ;;  %v5059_v58 = vpop.permute.xlu0 %5058 }
 0x152   : > { %15423 = vmatpush1.msk.msra.mxu0 %vm419_vm1, %v4797_v57  ;;  %v5061_v61 = vpop.permute.xlu1 %5060  ;;  %4948 = vmatprep.mubr.f32.mxu0 %v17254_v0  ;;  %v5065_v6 = vsel %vm18917_vm15, %v5057_v56, %v5059_v58  ;;  %v6903_v56 = vld [vmem:[#allocation3 + $0x1] sm:$0x3f] }
 0x153   : > { %1569 = vrot.lane.b32.xlu0 %v1567_v45, %s16597_s22  ;;  %15949 = vmatprep.subr.mxu0 %v17254_v0  ;;  %v5066_v25 = vsel %vm18917_vm15, %v5059_v58, %v5061_v61  ;;  %v7171_v58 = vld [vmem:[#allocation3 + $0x1] sm:$0x3f] }
 0x154   : > { %1837 = vrot.lane.b32.xlu1 %v1835_v60, %s18885_s16  ;;  %s18890_s16 = smov 107   ;;  %v7438_v61 = vld [vmem:[#allocation3 + $0x1] sm:$0x3f] }
 0x155   : > { %15424 = vmatmul.mubr.msk.f32.vlgmr.msra.gmra.mrb[2].mxu0 %vm562_vm2, %v15418_v35  ;;  %v5320_v2 = vpop.permute.xlu0 %5319 }
 0x156   : > { %15950 = vmatpush3.msk.msra.mxu0 %vm419_vm1, %v4799_v1  ;;  %v17462_v4 = vpop.permute.xlu1 %5321  ;;  %15951 = vmatprep.mubr.msk.f32.mxu0 %vm16591_vm3, %v17254_v0 }
 0x157   : > { %2105 = vrot.lane.b32.xlu0 %v2103_v62, %s18883_s18  ;;  %15428 = vmatprep.subr.msk.mxu0 %vm419_vm1, %v5063_v63  ;;  %v5331_v23 = vsel %vm18898_vm13, %v5320_v2, %v17462_v4  ;;  %s18893_s18 = smov 7  }
 0x158   : > { %2373 = vrot.lane.b32.xlu1 %v2371_v3, %s18887_s21  ;;  %s18896_s21 = smov 106  }
 0x159   : > { %15952 = vmatmul.mubr.msk.f32.vlgmr.msra.gmra.mrb[4].mxu0 %vm562_vm2, %v15418_v35  ;;  %v5318_v10 = vpop.permute.xlu0 %5317 }
 0x15a   : > { %15429 = vmatpush1.msk.msra.mxu0 %vm419_vm1, %v5062_v7  ;;  %v5324_v15 = vpop.permute.xlu1 %5323  ;;  %5144 = vmatprep.mubr.f32.mxu0 %v17254_v0  ;;  %v5330_v14 = vsel %vm18898_vm13, %v5318_v10, %v5320_v2  ;;  %v7705_v2 = vld [vmem:[#allocation3 + $0x1] sm:$0x3f]  ;;  %v16627_v7 = vmov 0  }
 0x15b   : > { %2641 = vrot.lane.b32.xlu0 %v2639_v5, %s18890_s16  ;;  %15431 = vmatprep.subr.msk.mxu0 %vm419_vm1, %v5065_v6  ;;  %s18895_s16 = smov 16   ;;  %v5332_v37 = vsel %vm18898_vm13, %v17462_v4, %v5324_v15  ;;  %v15454_v4 = vld [vmem:[%s18849_s3 + $0x50] sm:$0xf]  ;;  %v7786_v10 = vld [vmem:[%s18851_s5] sm:$0xf] }
 0x15c   : > { %2909 = vrot.lane.b32.xlu1 %v2907_v8, %s18896_s21  ;;  %s18902_s21 = smov 55   ;;  %v7775_v8 = vld [vmem:[%s18850_s4] sm:$0xf]  ;;  %16512 = vset.pattern.permute.xlu0 %v16627_v7 }
 0x15d   : > { %15430 = vmatmul.mubr.msk.f32.vlgmr.msra.gmra.mrb[0].mxu0 %vm562_vm2, %v15427_v16  ;;  %v5326_v11 = vpop.permute.xlu0 %5325  ;;  %16513 = vset.pattern.permute.xlu1 %v16627_v7 }
 0x15e   : > { %15432 = vmatpush1.msk.msra.mxu0 %vm419_vm1, %v5064_v18  ;;  %v5328_v21 = vpop.permute.xlu1 %5327  ;;  %5215 = vmatprep.mubr.f32.mxu0 %v17254_v0  ;;  %v5333_v29 = vsel %vm18898_vm13, %v5324_v15, %v5326_v11 }
 0x15f   : > { %3177 = vrot.lane.b32.xlu0 %v3175_v17, %s16603_s15  ;;  %15954 = vmatprep.subr.mxu0 %v17254_v0  ;;  %v5334_v43 = vsel %vm18898_vm13, %v5326_v11, %v5328_v21  ;;  %vm18909_vm13 = vcmask 302080  }
 0x160   : > { %3445 = vrot.lane.b32.xlu1 %v3443_v19, %s16604_s20 }
 0x161   : > { %15433 = vmatmul.mubr.msk.f32.vlgmr.msra.gmra.mrb[2].mxu0 %vm562_vm2, %v15427_v16  ;;  %v5588_v13 = vpop.permute.xlu0 %5587 }
 0x162   : > { %15955 = vmatpush3.msk.msra.mxu0 %vm419_vm1, %v5066_v25  ;;  %v17492_v27 = vpop.permute.xlu1 %5589  ;;  %15956 = vmatprep.mubr.msk.f32.mxu0 %vm16591_vm3, %v17254_v0  ;;  %v15463_v25 = vld [vmem:[%s18849_s3 + $0x54] sm:$0xf] }
 0x163   : > { %3713 = vrot.lane.b32.xlu0 %v3711_v22, %s18889_s11  ;;  %15437 = vmatprep.subr.msk.mxu0 %vm419_vm1, %v5331_v23  ;;  %s18892_s11 = smov 8   ;;  %v5599_v42 = vsel %vm18905_vm12, %v5588_v13, %v17492_v27 }
 0x164   : > { %3981 = vrot.lane.b32.xlu1 %v3979_v26, %s18906_s12  ;;  %s18968_s12 = smov 29  }
 0x165   : > { %15957 = vmatmul.mubr.msk.f32.vlgmr.msra.gmra.mrb[4].mxu0 %vm562_vm2, %v15427_v16  ;;  %v5586_v30 = vpop.permute.xlu0 %5585 }
 0x166   : > { %15438 = vmatpush1.msk.msra.mxu0 %vm419_vm1, %v5330_v14  ;;  %v5592_v32 = vpop.permute.xlu1 %5591  ;;  %5412 = vmatprep.mubr.f32.mxu0 %v17254_v0  ;;  %v5598_v50 = vsel %vm18905_vm12, %v5586_v30, %v5588_v13 }
 0x167   : > { %4230 = vrot.lane.b32.xlu0 %v4228_v28, %s16607_s17  ;;  %15440 = vmatprep.subr.msk.mxu0 %vm419_vm1, %v5333_v29  ;;  %v5600_v33 = vsel %vm18905_vm12, %v17492_v27, %v5592_v32 }
 0x168   : > { %4497 = vrot.lane.b32.xlu1 %v4495_v31, %s18895_s16  ;;  %s18899_s16 = smov 46  }
 0x169   : > { %15439 = vmatmul.mubr.msk.f32.vlgmr.msra.gmra.mrb[0].mxu0 %vm562_vm2, %v15436_v34  ;;  %v5594_v38 = vpop.permute.xlu0 %5593 }
 0x16a   : > { %15441 = vmatpush1.msk.msra.mxu0 %vm419_vm1, %v5332_v37  ;;  %v5596_v40 = vpop.permute.xlu1 %5595  ;;  %5483 = vmatprep.mubr.f32.mxu0 %v17254_v0  ;;  %v5601_v49 = vsel %vm18905_vm12, %v5592_v32, %v5594_v38  ;;  %v15472_v37 = vld [vmem:[%s18849_s3 + $0x58] sm:$0xf] }
 0x16b   : > { %4765 = vrot.lane.b32.xlu0 %v4763_v36, %s18892_s11  ;;  %15959 = vmatprep.subr.mxu0 %v17254_v0  ;;  %s18894_s11 = smov 6   ;;  %v5602_v45 = vsel %vm18905_vm12, %v5594_v38, %v5596_v40  ;;  %vm18910_vm12 = vcmask 236544  }
 0x16c   : > { %5032 = vrot.lane.b32.xlu1 %v5030_v39, %s18893_s18  ;;  %s18897_s18 = smov 56  }
 0x16d   : > { %15442 = vmatmul.mubr.msk.f32.vlgmr.msra.gmra.mrb[2].mxu0 %vm562_vm2, %v15436_v34  ;;  %v5856_v44 = vpop.permute.xlu0 %5855 }
 0x16e   : > { %15960 = vmatpush3.msk.msra.mxu0 %vm419_vm1, %v5334_v43  ;;  %v17523_v47 = vpop.permute.xlu1 %5857  ;;  %15961 = vmatprep.mubr.msk.f32.mxu0 %vm16591_vm3, %v17254_v0 }
 0x16f   : > { %5299 = vrot.lane.b32.xlu0 %v5297_v41, %s18894_s11  ;;  %15446 = vmatprep.subr.msk.mxu0 %vm419_vm1, %v5599_v42  ;;  %s18900_s11 = smov 45   ;;  %v5867_v35 = vsel %vm18909_vm13, %v5856_v44, %v17523_v47 }
 0x170   : > { %5567 = vrot.lane.b32.xlu1 %v5565_v46, %s18897_s18  ;;  %s18903_s18 = smov 54  }
 0x171   : > { %15962 = vmatmul.mubr.msk.f32.vlgmr.msra.gmra.mrb[4].mxu0 %vm562_vm2, %v15436_v34  ;;  %v5854_v20 = vpop.permute.xlu0 %5853 }
 0x172   : > { %15447 = vmatpush1.msk.msra.mxu0 %vm419_vm1, %v5598_v50  ;;  %v5860_v51 = vpop.permute.xlu1 %5859  ;;  %5680 = vmatprep.mubr.f32.mxu0 %v17254_v0  ;;  %v5866_v63 = vsel %vm18909_vm13, %v5854_v20, %v5856_v44  ;;  %v15481_v50 = vld [vmem:[%s18849_s3 + $0x5c] sm:$0xf] }
 0x173   : > { %5835 = vrot.lane.b32.xlu0 %v5833_v48, %s18902_s21  ;;  %15449 = vmatprep.subr.msk.mxu0 %vm419_vm1, %v5601_v49  ;;  %v5868_v5 = vsel %vm18909_vm13, %v17523_v47, %v5860_v51  ;;  %s18945_s21 = smov 117  }
 0x174   : > { %6103 = vrot.lane.b32.xlu1 %v6101_v24, %s18903_s18  ;;  %s18908_s18 = smov 35  }
 0x175   : > { %15448 = vmatmul.mubr.msk.f32.vlgmr.msra.gmra.mrb[0].mxu0 %vm562_vm2, %v15445_v52  ;;  %v5862_v53 = vpop.permute.xlu0 %5861 }
 0x176   : > { %15450 = vmatpush1.msk.msra.mxu0 %vm419_vm1, %v5600_v33  ;;  %v5864_v55 = vpop.permute.xlu1 %5863  ;;  %5751 = vmatprep.mubr.f32.mxu0 %v17254_v0  ;;  %v5869_v62 = vsel %vm18909_vm13, %v5860_v51, %v5862_v53 }
 0x177   : > { %6371 = vrot.lane.b32.xlu0 %v6369_v9, %s18899_s16  ;;  %15964 = vmatprep.subr.mxu0 %v17254_v0  ;;  %s18901_s16 = smov 44   ;;  %v5870_v17 = vsel %vm18909_vm13, %v5862_v53, %v5864_v55  ;;  %vm3180_vm13 = vcmask 228352  }
 0x178   : > { %6638 = vrot.lane.b32.xlu1 %v6636_v54, %s18900_s11  ;;  %s18904_s11 = smov 36  }
 0x179   : > { %15451 = vmatmul.mubr.msk.f32.vlgmr.msra.gmra.mrb[2].mxu0 %vm562_vm2, %v15445_v52  ;;  %v6124_v57 = vpop.permute.xlu0 %6123 }
 0x17a   : > { %15965 = vmatpush3.msk.msra.mxu0 %vm419_vm1, %v5602_v45  ;;  %v6126_v60 = vpop.permute.xlu1 %6125  ;;  %15966 = vmatprep.mubr.msk.f32.mxu0 %vm16591_vm3, %v17254_v0  ;;  %v15490_v45 = vld [vmem:[%s18849_s3 + $0x60] sm:$0xf] }
 0x17b   : > { %6905 = vrot.lane.b32.xlu0 %v6903_v56, %s18901_s16  ;;  %15455 = vmatprep.subr.msk.mxu0 %vm419_vm1, %v5867_v35  ;;  %v6135_v16 = vsel %vm18910_vm12, %v6124_v57, %v6126_v60  ;;  %s18937_s16 = smov 1  }
 0x17c   : > { %7173 = vrot.lane.b32.xlu1 %v7171_v58, %s18904_s11  ;;  %s16626_s11 = smov 34  }
 0x17d   : > { %15967 = vmatmul.mubr.msk.f32.vlgmr.msra.gmra.mrb[4].mxu0 %vm562_vm2, %v15445_v52  ;;  %v6122_v1 = vpop.permute.xlu0 %6121 }
 0x17e   : > { %15456 = vmatpush1.msk.msra.mxu0 %vm419_vm1, %v5866_v63  ;;  %v6128_v3 = vpop.permute.xlu1 %6127  ;;  %5948 = vmatprep.mubr.f32.mxu0 %v17254_v0  ;;  %v6134_v21 = vsel %vm18910_vm12, %v6122_v1, %v6124_v57 }
 0x17f   : > { %7440 = vrot.lane.b32.xlu0 %v7438_v61, %s18908_s18  ;;  %15458 = vmatprep.subr.msk.mxu0 %vm419_vm1, %v5869_v62  ;;  %v6136_v13 = vsel %vm18910_vm12, %v6126_v60, %v6128_v3  ;;  %s18951_s18 = smov 39  }
 0x180   : > { %7707 = vrot.lane.b32.xlu1 %v7705_v2, %s16626_s11 }
 0x181   : > { %15457 = vmatmul.mubr.msk.f32.vlgmr.msra.gmra.mrb[0].mxu0 %vm562_vm2, %v15454_v4  ;;  %v6130_v6 = vpop.permute.xlu0 %6129 }
 0x182   : > { %15459 = vmatpush1.msk.msra.mxu0 %vm419_vm1, %v5868_v5  ;;  %v6132_v15 = vpop.permute.xlu1 %6131  ;;  %6019 = vmatprep.mubr.f32.mxu0 %v17254_v0  ;;  %v6137_v19 = vsel %vm18910_vm12, %v6128_v3, %v6130_v6 }
 0x183   : > { %15969 = vmatprep.subr.mxu0 %v17254_v0  ;;  %7778 = vperm.xlu0 %16512, %v7775_v8   ;;  %v6138_v29 = vsel %vm18910_vm12, %v6130_v6, %v6132_v15  ;;  %vm18926_vm12 = vcmask 220160   ;;  %v15499_v6 = vld [vmem:[%s18849_s3 + $0x64] sm:$0xf] }
 0x184   : > { %7789 = vperm.xlu1 %16513, %v7786_v10  }
 0x185   : > { %15460 = vmatmul.mubr.msk.f32.vlgmr.msra.gmra.mrb[2].mxu0 %vm562_vm2, %v15454_v4  ;;  %v6392_v18 = vpop.permute.xlu0 %6391 }
 0x186   : > { %15970 = vmatpush3.msk.msra.mxu0 %vm419_vm1, %v5870_v17  ;;  %v6394_v11 = vpop.permute.xlu1 %6393  ;;  %15971 = vmatprep.mubr.msk.f32.mxu0 %vm16591_vm3, %v17254_v0 }
 0x187   : > { %15464 = vmatprep.subr.msk.mxu0 %vm419_vm1, %v6135_v16  ;;  %v6402_v28 = vsel %vm3180_vm13, %v6392_v18, %v6394_v11 }
 0x189   : > { %15972 = vmatmul.mubr.msk.f32.vlgmr.msra.gmra.mrb[4].mxu0 %vm562_vm2, %v15454_v4  ;;  %v6390_v22 = vpop.permute.xlu0 %6389 }
 0x18a   : > { %15465 = vmatpush1.msk.msra.mxu0 %vm419_vm1, %v6134_v21  ;;  %v6396_v23 = vpop.permute.xlu1 %6395  ;;  %6216 = vmatprep.mubr.f32.mxu0 %v17254_v0  ;;  %v6401_v32 = vsel %vm3180_vm13, %v6390_v22, %v6392_v18  ;;  %v534_v18 = vld [vmem:[#allocation3] sm:$0x3f] }
 0x18b   : > { %15467 = vmatprep.subr.msk.mxu0 %vm419_vm1, %v6137_v19  ;;  %v6403_v38 = vsel %vm3180_vm13, %v6394_v11, %v6396_v23 }
 0x18d   : > { %15466 = vmatmul.mubr.msk.f32.vlgmr.msra.gmra.mrb[0].mxu0 %vm562_vm2, %v15463_v25  ;;  %v6398_v26 = vpop.permute.xlu0 %6397 }
 0x18e   : > { %15468 = vmatpush1.msk.msra.mxu0 %vm419_vm1, %v6136_v13  ;;  %v6400_v27 = vpop.permute.xlu1 %6399  ;;  %6287 = vmatprep.mubr.f32.mxu0 %v17254_v0  ;;  %v6404_v31 = vsel %vm3180_vm13, %v6396_v23, %v6398_v26 }
 0x18f   : > { %15974 = vmatprep.subr.mxu0 %v17254_v0  ;;  %v6405_v42 = vsel %vm3180_vm13, %v6398_v26, %v6400_v27 }
 0x191   : > { %15469 = vmatmul.mubr.msk.f32.vlgmr.msra.gmra.mrb[2].mxu0 %vm562_vm2, %v15463_v25  ;;  %v6659_v14 = vpop.permute.xlu0 %6658 }
 0x192   : > { %15975 = vmatpush3.msk.msra.mxu0 %vm419_vm1, %v6138_v29  ;;  %v6661_v30 = vpop.permute.xlu1 %6660  ;;  %15976 = vmatprep.mubr.msk.f32.mxu0 %vm16591_vm3, %v17254_v0 }
 0x193   : > { %15473 = vmatprep.subr.msk.mxu0 %vm419_vm1, %v6402_v28  ;;  %v6669_v41 = vsel %vm18926_vm12, %v6659_v14, %v6661_v30 }
 0x195   : > { %15977 = vmatmul.mubr.msk.f32.vlgmr.msra.gmra.mrb[4].mxu0 %vm562_vm2, %v15463_v25  ;;  %v6657_v34 = vpop.permute.xlu0 %6656 }
 0x196   : > { %15474 = vmatpush1.msk.msra.mxu0 %vm419_vm1, %v6401_v32  ;;  %v6663_v36 = vpop.permute.xlu1 %6662  ;;  %6483 = vmatprep.mubr.f32.mxu0 %v17254_v0  ;;  %v6668_v47 = vsel %vm18926_vm12, %v6657_v34, %v6659_v14  ;;  %v15508_v14 = vld [vmem:[%s18849_s3 + $0x68] sm:$0xf] }
 0x197   : > { %15476 = vmatprep.subr.msk.mxu0 %vm419_vm1, %v6404_v31  ;;  %v6670_v20 = vsel %vm18926_vm12, %v6661_v30, %v6663_v36 }
 0x199   : > { %15475 = vmatmul.mubr.msk.f32.vlgmr.msra.gmra.mrb[0].mxu0 %vm562_vm2, %v15472_v37  ;;  %v6665_v39 = vpop.permute.xlu0 %6664 }
 0x19a   : > { %15477 = vmatpush1.msk.msra.mxu0 %vm419_vm1, %v6403_v38  ;;  %v6667_v40 = vpop.permute.xlu1 %6666  ;;  %6554 = vmatprep.mubr.f32.mxu0 %v17254_v0  ;;  %v6671_v46 = vsel %vm18926_vm12, %v6663_v36, %v6665_v39 }
 0x19b   : > { %15979 = vmatprep.subr.mxu0 %v17254_v0  ;;  %v6672_v9 = vsel %vm18926_vm12, %v6665_v39, %v6667_v40 }
 0x19d   : > { %15478 = vmatmul.mubr.msk.f32.vlgmr.msra.gmra.mrb[2].mxu0 %vm562_vm2, %v15472_v37  ;;  %v6926_v43 = vpop.permute.xlu0 %6925 }
 0x19e   : > { %15980 = vmatpush3.msk.msra.mxu0 %vm419_vm1, %v6405_v42  ;;  %v6928_v44 = vpop.permute.xlu1 %6927  ;;  %15981 = vmatprep.mubr.msk.f32.mxu0 %vm16591_vm3, %v17254_v0 }
 0x19f   : > { %15482 = vmatprep.subr.msk.mxu0 %vm419_vm1, %v6669_v41  ;;  %v6937_v52 = vsel %vm18913_vm11, %v6926_v43, %v6928_v44 }
 0x1a1   : > { %15982 = vmatmul.mubr.msk.f32.vlgmr.msra.gmra.mrb[4].mxu0 %vm562_vm2, %v15472_v37  ;;  %v6924_v48 = vpop.permute.xlu0 %6923 }
 0x1a2   : > { %15483 = vmatpush1.msk.msra.mxu0 %vm419_vm1, %v6668_v47  ;;  %v6930_v49 = vpop.permute.xlu1 %6929  ;;  %6750 = vmatprep.mubr.f32.mxu0 %v17254_v0  ;;  %v6936_v55 = vsel %vm18913_vm11, %v6924_v48, %v6926_v43 }
 0x1a3   : > { %15485 = vmatprep.subr.msk.mxu0 %vm419_vm1, %v6671_v46  ;;  %v6938_v57 = vsel %vm18913_vm11, %v6928_v44, %v6930_v49 }
 0x1a5   : > { %15484 = vmatmul.mubr.msk.f32.vlgmr.msra.gmra.mrb[0].mxu0 %vm562_vm2, %v15481_v50  ;;  %v6932_v24 = vpop.permute.xlu0 %6931 }
 0x1a6   : > { %15486 = vmatpush1.msk.msra.mxu0 %vm419_vm1, %v6670_v20  ;;  %v6934_v51 = vpop.permute.xlu1 %6933  ;;  %6821 = vmatprep.mubr.f32.mxu0 %v17254_v0  ;;  %v6939_v54 = vsel %vm18913_vm11, %v6930_v49, %v6932_v24 }
 0x1a7   : > { %15984 = vmatprep.subr.mxu0 %v17254_v0  ;;  %v6940_v62 = vsel %vm18913_vm11, %v6932_v24, %v6934_v51  ;;  %vm4233_vm11 = vcmask 138240  }
 0x1a9   : > { %15487 = vmatmul.mubr.msk.f32.vlgmr.msra.gmra.mrb[2].mxu0 %vm562_vm2, %v15481_v50  ;;  %v7194_v33 = vpop.permute.xlu0 %7193 }
 0x1aa   : > { %15985 = vmatpush3.msk.msra.mxu0 %vm419_vm1, %v6672_v9  ;;  %v7196_v53 = vpop.permute.xlu1 %7195  ;;  %15986 = vmatprep.mubr.msk.f32.mxu0 %vm16591_vm3, %v17254_v0 }
 0x1ab   : > { %15491 = vmatprep.subr.msk.mxu0 %vm419_vm1, %v6937_v52  ;;  %v7204_v61 = vsel %vm18924_vm10, %v7194_v33, %v7196_v53 }
 0x1ad   : > { %15987 = vmatmul.mubr.msk.f32.vlgmr.msra.gmra.mrb[4].mxu0 %vm562_vm2, %v15481_v50  ;;  %v7192_v56 = vpop.permute.xlu0 %7191 }
 0x1ae   : > { %15492 = vmatpush1.msk.msra.mxu0 %vm419_vm1, %v6936_v55  ;;  %v7198_v35 = vpop.permute.xlu1 %7197  ;;  %7018 = vmatprep.mubr.f32.mxu0 %v17254_v0  ;;  %v7203_v3 = vsel %vm18924_vm10, %v7192_v56, %v7194_v33 }
 0x1af   : > { %15494 = vmatprep.subr.msk.mxu0 %vm419_vm1, %v6939_v54  ;;  %v7205_v7 = vsel %vm18924_vm10, %v7196_v53, %v7198_v35 }
 0x1b1   : > { %15493 = vmatmul.mubr.msk.f32.vlgmr.msra.gmra.mrb[0].mxu0 %vm562_vm2, %v15490_v45  ;;  %v7200_v58 = vpop.permute.xlu0 %7199 }
 0x1b2   : > { %15495 = vmatpush1.msk.msra.mxu0 %vm419_vm1, %v6938_v57  ;;  %v7202_v60 = vpop.permute.xlu1 %7201  ;;  %7089 = vmatprep.mubr.f32.mxu0 %v17254_v0  ;;  %v7206_v2 = vsel %vm18924_vm10, %v7198_v35, %v7200_v58 }
 0x1b3   : > { %15989 = vmatprep.subr.mxu0 %v17254_v0  ;;  %v7207_v16 = vsel %vm18924_vm10, %v7200_v58, %v7202_v60 }
 0x1b5   : > { %15496 = vmatmul.mubr.msk.f32.vlgmr.msra.gmra.mrb[2].mxu0 %vm562_vm2, %v15490_v45  ;;  %v7461_v63 = vpop.permute.xlu0 %7460 }
 0x1b6   : > { %15990 = vmatpush3.msk.msra.mxu0 %vm419_vm1, %v6940_v62  ;;  %v7463_v1 = vpop.permute.xlu1 %7462  ;;  %15991 = vmatprep.mubr.msk.f32.mxu0 %vm16591_vm3, %v17254_v0 }
 0x1b7   : > { %15500 = vmatprep.subr.msk.mxu0 %vm419_vm1, %v7204_v61  ;;  %v7471_v15 = vsel %vm4233_vm11, %v7461_v63, %v7463_v1 }
 0x1b9   : > { %15992 = vmatmul.mubr.msk.f32.vlgmr.msra.gmra.mrb[4].mxu0 %vm562_vm2, %v15490_v45  ;;  %v7459_v4 = vpop.permute.xlu0 %7458 }
 0x1ba   : > { %15501 = vmatpush1.msk.msra.mxu0 %vm419_vm1, %v7203_v3  ;;  %v7465_v5 = vpop.permute.xlu1 %7464  ;;  %7285 = vmatprep.mubr.f32.mxu0 %v17254_v0  ;;  %v7470_v25 = vsel %vm4233_vm11, %v7459_v4, %v7461_v63 }
 0x1bb   : > { %15503 = vmatprep.subr.msk.mxu0 %vm419_vm1, %v7206_v2  ;;  %v7472_v34 = vsel %vm4233_vm11, %v7463_v1, %v7465_v5 }
 0x1bd   : > { %15502 = vmatmul.mubr.msk.f32.vlgmr.msra.gmra.mrb[0].mxu0 %vm562_vm2, %v15499_v6  ;;  %v7467_v10 = vpop.permute.xlu0 %7466 }
 0x1be   : > { %15504 = vmatpush1.msk.msra.mxu0 %vm419_vm1, %v7205_v7  ;;  %v7469_v8 = vpop.permute.xlu1 %7468  ;;  %7356 = vmatprep.mubr.f32.mxu0 %v17254_v0  ;;  %v7473_v23 = vsel %vm4233_vm11, %v7465_v5, %v7467_v10 }
 0x1bf   : > { %15994 = vmatprep.subr.mxu0 %v17254_v0  ;;  %v7474_v44 = vsel %vm4233_vm11, %v7467_v10, %v7469_v8 }
 0x1c1   : > { %15505 = vmatmul.mubr.msk.f32.vlgmr.msra.gmra.mrb[2].mxu0 %vm562_vm2, %v15499_v6  ;;  %v1034_v17 = vpop.permute.xlu0 %1033 }
 0x1c2   : > { %15995 = vmatpush3.msk.msra.mxu0 %vm419_vm1, %v7207_v16  ;;  %v1035_v11 = vrot.slane %v1034_v17, 1  ;;  %v1302_v19 = vpop.permute.xlu1 %1301  ;;  %15996 = vmatprep.mubr.msk.f32.mxu0 %vm16591_vm3, %v17254_v0  ;;  %v17700_v0 = vld [vmem:[#allocation4] sm:$0xff] }
 0x1c3   : > { %v1303_v21 = vrot.slane %v1302_v19, 1  ;;  %15509 = vmatprep.subr.msk.mxu0 %vm419_vm1, %v7471_v15 }
 0x1c4   : > { %v1037_v22 = vsel %vm18916_vm9, %v1034_v17, %v1035_v11  ;;  %vm18919_vm9 = vcmask 883712  }
 0x1c5   : > { %v1039_v13 = vadd.f32 %v1037_v22, %v534_v18  ;;  %v1305_v26 = vsel %vm18915_vm8, %v1302_v19, %v1303_v21  ;;  %15997 = vmatmul.mubr.msk.f32.vlgmr.msra.gmra.mrb[4].mxu0 %vm562_vm2, %v15499_v6  ;;  %v1570_v27 = vpop.permute.xlu0 %1569  ;;  %vm18922_vm8 = vcmask 949248  }
 0x1c6   : > { %15510 = vmatpush1.msk.msra.mxu0 %vm419_vm1, %v7470_v25  ;;  %v1571_v28 = vrot.slane %v1570_v27, 1  ;;  %v1838_v29 = vpop.permute.xlu1 %1837  ;;  %7552 = vmatprep.mubr.f32.mxu0 %v17700_v0 }
 0x1c7   : > { %v1307_v30 = vadd.f32 %v1305_v26, %v1039_v13  ;;  %v1839_v31 = vrot.slane %v1838_v29, 1  ;;  %15512 = vmatprep.subr.msk.mxu0 %vm419_vm1, %v7473_v23 }
 0x1c8   : > { %v1573_v32 = vsel %vm18918_vm14, %v1570_v27, %v1571_v28  ;;  %vm18920_vm14 = vcmask 867328  }
 0x1c9   : > { %v1575_v36 = vadd.f32 %v1573_v32, %v1307_v30  ;;  %v1841_v37 = vsel %vm18917_vm15, %v1838_v29, %v1839_v31  ;;  %15511 = vmatmul.mubr.msk.f32.vlgmr.msra.gmra.mrb[0].mxu0 %vm562_vm2, %v15508_v14  ;;  %v2106_v38 = vpop.permute.xlu0 %2105  ;;  %vm18921_vm15 = vcmask 875520  }
 0x1ca   : > { %15513 = vmatpush1.msk.msra.mxu0 %vm419_vm1, %v7472_v34  ;;  %v2107_v39 = vrot.slane %v2106_v38, 1  ;;  %v2374_v40 = vpop.permute.xlu1 %2373  ;;  %7623 = vmatprep.mubr.f32.mxu0 %v17700_v0 }
 0x1cb   : > { %v1843_v41 = vadd.f32 %v1841_v37, %v1575_v36  ;;  %v2375_v42 = vrot.slane %v2374_v40, 1  ;;  %15999 = vmatprep.subr.mxu0 %v17700_v0 }
 0x1cc   : > { %v2109_v43 = vsel %vm18922_vm8, %v2106_v38, %v2107_v39  ;;  %vm18927_vm8 = vcmask 56320  }
 0x1cd   : > { %v2111_v46 = vadd.f32 %v2109_v43, %v1843_v41  ;;  %v2377_v47 = vsel %vm18919_vm9, %v2374_v40, %v2375_v42  ;;  %15514 = vmatmul.mubr.msk.f32.vlgmr.msra.gmra.mrb[2].mxu0 %vm562_vm2, %v15508_v14  ;;  %v2642_v48 = vpop.permute.xlu0 %2641  ;;  %vm18923_vm9 = vcmask 211968  }
 0x1ce   : > { %16000 = vmatpush3.msk.msra.mxu0 %vm419_vm1, %v7474_v44  ;;  %v2643_v49 = vrot.slane %v2642_v48, 1  ;;  %v2910_v50 = vpop.permute.xlu1 %2909  ;;  %16001 = vmatprep.mubr.msk.f32.mxu0 %vm16591_vm3, %v17700_v0 }
 0x1cf   : > { %v2379_v20 = vadd.f32 %v2377_v47, %v2111_v46  ;;  %v2911_v24 = vrot.slane %v2910_v50, 1 }
 0x1d0   : > { %v2645_v51 = vsel %vm18921_vm15, %v2642_v48, %v2643_v49  ;;  %vm18928_vm15 = vcmask 64512  }
 0x1d1   : > { %v2647_v52 = vadd.f32 %v2645_v51, %v2379_v20  ;;  %v2913_v9 = vsel %vm18920_vm14, %v2910_v50, %v2911_v24  ;;  %16002 = vmatmul.mubr.msk.f32.vlgmr.msra.gmra.mrb[4].mxu0 %vm562_vm2, %v15508_v14  ;;  %v3178_v33 = vpop.permute.xlu0 %3177  ;;  %vm18925_vm14 = vcmask 130048  }
 0x1d2   : > { %v3179_v53 = vrot.slane %v3178_v33, 1  ;;  %v3446_v54 = vpop.permute.xlu1 %3445 }
 0x1d3   : > { %v2915_v55 = vadd.f32 %v2913_v9, %v2647_v52  ;;  %v3447_v56 = vrot.slane %v3446_v54, 1 }
 0x1d4   : > { %v3181_v35 = vsel %vm3180_vm13, %v3178_v33, %v3179_v53 }
 0x1d5   : > { %v3183_v45 = vadd.f32 %v3181_v35, %v2915_v55  ;;  %v3449_v57 = vsel %vm18926_vm12, %v3446_v54, %v3447_v56  ;;  %v3714_v58 = vpop.permute.xlu0 %3713  ;;  %vm18931_vm12 = vcmask 441344  }
 0x1d6   : > { %v3715_v60 = vrot.slane %v3714_v58, 1  ;;  %v3982_v61 = vpop.permute.xlu1 %3981 }
 0x1d7   : > { %v3451_v62 = vadd.f32 %v3449_v57, %v3183_v45  ;;  %v3983_v63 = vrot.slane %v3982_v61, 1 }
 0x1d8   : > { %v3717_v1 = vsel %vm18923_vm9, %v3714_v58, %v3715_v60  ;;  %vm18930_vm9 = vcmask 48128  }
 0x1d9   : > { %v3719_v2 = vadd.f32 %v3717_v1, %v3451_v62  ;;  %v3985_v3 = vsel %vm18924_vm10, %v3982_v61, %v3983_v63  ;;  %v4231_v4 = vpop.permute.xlu0 %4230  ;;  %vm18929_vm10 = vcmask 457728  }
 0x1da   : > { %v4232_v5 = vrot.slane %v4231_v4, 7  ;;  %v4498_v6 = vpop.permute.xlu1 %4497 }
 0x1db   : > { %v3987_v7 = vadd.f32 %v3985_v3, %v3719_v2  ;;  %v4499_v10 = vrot.slane %v4498_v6, 7 }
 0x1dc   : > { %v4234_v8 = vsel %vm4233_vm11, %v4232_v5, %v4231_v4 }
 0x1dd   : > { %v4236_v15 = vadd.f32 %v4234_v8, %v3987_v7  ;;  %v4501_v16 = vsel %vm18925_vm14, %v4499_v10, %v4498_v6  ;;  %v4766_v17 = vpop.permute.xlu0 %4765  ;;  %vm18932_vm14 = vcmask 449536   ;;  %v17745_v10 = vsub.s32 1, %v17044_v12 }
 0x1de   : > { %v4767_v18 = vrot.slane %v4766_v17, 7  ;;  %v5033_v11 = vpop.permute.xlu1 %5032  ;;  %v17748_v8 = vsub.s32 0, %v17044_v12 }
 0x1df   : > { %v4503_v19 = vadd.f32 %v4501_v16, %v4236_v15  ;;  %v5034_v21 = vrot.slane %v5033_v11, 7 }
 0x1e0   : > { %v4769_v22 = vsel %vm18928_vm15, %v4767_v18, %v4766_v17  ;;  %vm6641_vm15 = vcmask 367616   ;;  %v17754_v18 = vsub.s32 3, %v17044_v12 }
 0x1e1   : > { %v4771_v23 = vadd.f32 %v4769_v22, %v4503_v19  ;;  %v5036_v25 = vsel %vm18927_vm8, %v5034_v21, %v5033_v11  ;;  %v5300_v13 = vpop.permute.xlu0 %5299  ;;  %vm6374_vm8 = vcmask 375808   ;;  %v17757_v11 = vsub.s32 2, %v17044_v12 }
 0x1e2   : > { %v5301_v26 = vrot.slane %v5300_v13, 7  ;;  %v5568_v27 = vpop.permute.xlu1 %5567  ;;  %v7746_v22 = vsub.s32 5, %v17044_v12 }
 0x1e3   : > { %v5038_v28 = vadd.f32 %v5036_v25, %v4771_v23  ;;  %v5569_v29 = vrot.slane %v5568_v27, 1  ;;  %v17765_v23 = vsub.s32 4, %v17044_v12 }
 0x1e4   : > { %v5303_v14 = vsel %vm18930_vm9, %v5301_v26, %v5300_v13  ;;  %vm7176_vm9 = vcmask 293888  }
 0x1e5   : > { %v5305_v30 = vadd.f32 %v5303_v14, %v5038_v28  ;;  %v5571_v31 = vsel %vm18929_vm10, %v5568_v27, %v5569_v29  ;;  %v5836_v32 = vpop.permute.xlu0 %5835  ;;  %vm6908_vm10 = vcmask 359424  }
 0x1e6   : > { %v5837_v34 = vrot.slane %v5836_v32, 1  ;;  %v6104_v36 = vpop.permute.xlu1 %6103 }
 0x1e7   : > { %v5573_v37 = vadd.f32 %v5571_v31, %v5305_v30  ;;  %v6105_v38 = vrot.slane %v6104_v36, 1 }
 0x1e8   : > { %v5839_v39 = vsel %vm18932_vm14, %v5836_v32, %v5837_v34  ;;  %vm7710_vm14 = vcmask 277504  }
 0x1e9   : > { %v5841_v40 = vadd.f32 %v5839_v39, %v5573_v37  ;;  %v6107_v41 = vsel %vm18931_vm12, %v6104_v36, %v6105_v38  ;;  %v6372_v42 = vpop.permute.xlu0 %6371  ;;  %vm7443_vm12 = vcmask 285696  }
 0x1ea   : > { %v6373_v43 = vrot.slane %v6372_v42, 1  ;;  %v6639_v44 = vpop.permute.xlu1 %6638 }
 0x1eb   : > { %v6109_v46 = vadd.f32 %v6107_v41, %v5841_v40  ;;  %v6640_v47 = vrot.slane %v6639_v44, 1 }
 0x1ec   : > { %v6375_v48 = vsel %vm6374_vm8, %v6372_v42, %v6373_v43 }
 0x1ed   : > { %v6377_v49 = vadd.f32 %v6375_v48, %v6109_v46  ;;  %v6642_v50 = vsel %vm6641_vm15, %v6639_v44, %v6640_v47  ;;  %v6906_v20 = vpop.permute.xlu0 %6905 }
 0x1ee   : > { %v6907_v24 = vrot.slane %v6906_v20, 1  ;;  %v7174_v51 = vpop.permute.xlu1 %7173 }
 0x1ef   : > { %v6644_v52 = vadd.f32 %v6642_v50, %v6377_v49  ;;  %v7175_v9 = vrot.slane %v7174_v51, 1 }
 0x1f0   : > { %v6909_v33 = vsel %vm6908_vm10, %v6906_v20, %v6907_v24 }
 0x1f1   : > { %v6911_v53 = vadd.f32 %v6909_v33, %v6644_v52  ;;  %v7177_v54 = vsel %vm7176_vm9, %v7174_v51, %v7175_v9  ;;  %v7441_v55 = vpop.permute.xlu0 %7440 }
 0x1f2   : > { %v7442_v56 = vrot.slane %v7441_v55, 1  ;;  %v7708_v35 = vpop.permute.xlu1 %7707 }
 0x1f3   : > { %v7179_v45 = vadd.f32 %v7177_v54, %v6911_v53  ;;  %v7709_v57 = vrot.slane %v7708_v35, 1 }
 0x1f4   : > { %v7444_v58 = vsel %vm7443_vm12, %v7441_v55, %v7442_v56 }
 0x1f5   : > { %v7446_v60 = vadd.f32 %v7444_v58, %v7179_v45  ;;  %v7711_v61 = vsel %vm7710_vm14, %v7708_v35, %v7709_v57 }
 0x1f7   : > { %v7713_v62 = vadd.f32 %v7711_v61, %v7446_v60 }
 0x1f9   : > { %v7716_v63 = vadd.f32 1e-08, %v7713_v62  ;;  %v7714_v2 = vmax.f32 %v7713_v62, 0.0 }
 0x1fb   : > { %16523 = vrcp.f32 %v7716_v63  ;;  %v17742_v5 = vmin.f32 %v7714_v2, 1.0 }
 0x202   : > { %v7779_v27 = vpop.permute.xlu0 %7778 }
 0x203   : > { %v7790_v26 = vpop.permute.xlu1 %7789 }
 0x205   : > { %v16524_v1 = vpop.eup %16523 }
 0x206   : > { %v7718_v3 = vmul.f32 %v16524_v1, %v7716_v63 }
 0x208   : > { %v7719_v4 = vsub.f32 2.0, %v7718_v3 }
 0x20a   : > { %v7720_v6 = vmul.f32 %v16524_v1, %v7719_v4 }
 0x20c   : > { %v7721_v7 = vmul.f32 108.0, %v7720_v6 }
 0x20e   : > { %v7722_v15 = vmul.f32 %v7721_v7, %v17742_v5 }
 0x210   : > { %v7731_v16 = vrot.slane %v7722_v15, %v17745_v10  ;;  %v7727_v17 = vrot.slane %v7722_v15, %v17748_v8  ;;  %v7739_v19 = vrot.slane %v7722_v15, %v17754_v18  ;;  %v7735_v21 = vrot.slane %v7722_v15, %v17757_v11 }
 0x211   : > { %v7747_v25 = vrot.slane %v7722_v15, %v7746_v22  ;;  %v7743_v13 = vrot.slane %v7722_v15, %v17765_v23 }
 0x212   : > { %7750 = vrot.lane.b32.xlu0 %v7731_v16, %s16581_s24  ;;  %7748 = vrot.lane.b32.xlu1 %v7727_v17, %s16581_s24 }
 0x216   : > { %7754 = vrot.lane.b32.xlu0 %v7739_v19, %s16581_s24  ;;  %7752 = vrot.lane.b32.xlu1 %v7735_v21, %s16581_s24 }
 0x21a   : > { %7758 = vrot.lane.b32.xlu0 %v7747_v25, %s16581_s24  ;;  %7756 = vrot.lane.b32.xlu1 %v7743_v13, %s16581_s24  ;;  %v17782_v13 = vld [vmem:[%s18848_s2] sm:$0x1f] }
 0x284   : > { %v7749_v28 = vpop.permute.xlu1 %7748  ;;  %v7751_v29 = vpop.permute.xlu0 %7750 }
 0x285   : > { %v7760_v32 = vsel %vm800_vm4, %v7749_v28, %v7751_v29 }
 0x288   : > { %v7753_v14 = vpop.permute.xlu1 %7752  ;;  %v7755_v30 = vpop.permute.xlu0 %7754 }
 0x289   : > { %v7761_v37 = vsel %vm800_vm4, %v7751_v29, %v7753_v14  ;;  %v7762_v43 = vsel %vm800_vm4, %v7753_v14, %v7755_v30  ;;  %v7840_v29 = vrot.slane %v17782_v13, %v17745_v10 }
 0x28c   : > { %v7757_v38 = vpop.permute.xlu1 %7756  ;;  %v7759_v44 = vpop.permute.xlu0 %7758 }
 0x28d   : > { %v7763_v49 = vsel %vm800_vm4, %v7755_v30, %v7757_v38  ;;  %v7764_v53 = vsel %vm800_vm4, %v7757_v38, %v7759_v44  ;;  %v7848_v38 = vrot.slane %v17782_v13, %v17754_v18  ;;  %v7852_v44 = vrot.slane %v17782_v13, %v17765_v23 }
 0x29c   : > { %v7554_v31 = vpop.f32.mrb[0].mxu0 }
 0x29d   : > { %v7770_v34 = vmul.f32 %v7760_v32, %v7554_v31  ;;  %v7556_v36 = vpop.f32.mrb[1].mxu0 }
 0x29e   : > { %v7771_v39 = vmul.f32 %v7761_v37, %v7556_v36 }
 0x29f   : > { %v7781_v40 = vmul.f32 %v7779_v27, %v7770_v34  ;;  %v7844_v34 = vrot.slane %v17782_v13, %v17757_v11 }
 0x2a0   : > { %v7782_v41 = vmul.f32 %v7779_v27, %v7771_v39  ;;  %v7625_v42 = vpop.f32.mrb[2].mxu0 }
 0x2a1   : > { %v7792_v46 = vadd.f32 %v7790_v26, %v7781_v40  ;;  %v7772_v47 = vmul.f32 %v7762_v43, %v7625_v42  ;;  %v7627_v48 = vpop.f32.mrb[3].mxu0 }
 0x2a2   : > { %v7793_v50 = vadd.f32 %v7790_v26, %v7782_v41  ;;  %v7773_v20 = vmul.f32 %v7763_v49, %v7627_v48 }
 0x2a3   : > { %v7797_v24 = vsub.f32 0.0, %v7792_v46  ;;  %v7783_v51 = vmul.f32 %v7779_v27, %v7772_v47 }
 0x2a4   : > { %v7798_v52 = vsub.f32 0.0, %v7793_v50  ;;  %v7784_v9 = vmul.f32 %v7779_v27, %v7773_v20  ;;  %v7696_v33 = vpop.f32.mrb[4].mxu0 }
 0x2a5   : > { %v7802_v54 = vmul.f32 1.442695, %v7797_v24  ;;  %v7794_v55 = vadd.f32 %v7790_v26, %v7783_v51  ;;  %v7774_v56 = vmul.f32 %v7764_v53, %v7696_v33  ;;  %v16003_v35 = vpop.f32.mrb[5].mxu0 }
 0x2a6   : > { %v7804_v45 = vmul.f32 1.442695, %v7798_v52  ;;  %v7795_v57 = vadd.f32 %v7790_v26, %v7784_v9 }
 0x2a7   : > { %16525 = vpow2.f32 %v7802_v54  ;;  %v7799_v58 = vsub.f32 0.0, %v7794_v55  ;;  %v7785_v60 = vmul.f32 %v7779_v27, %v7774_v56  ;;  %v7836_v27 = vrot.slane %v17782_v13, %v17748_v8 }
 0x2a8   : > { %16527 = vpow2.f32 %v7804_v45  ;;  %v7800_v61 = vsub.f32 0.0, %v7795_v57  ;;  %v15517_v45 = vld [vmem:[%s18852_s6 + $0x4] sm:$0xf] }
 0x2a9   : > { %v7806_v62 = vmul.f32 1.442695, %v7799_v58  ;;  %v7796_v63 = vadd.f32 %v7790_v26, %v7785_v60 }
 0x2aa   : > { %v7808_v1 = vmul.f32 1.442695, %v7800_v61 }
 0x2ab   : > { %16529 = vpow2.f32 %v7806_v62  ;;  %v7801_v2 = vsub.f32 0.0, %v7796_v63 }
 0x2ac   : > { %16531 = vpow2.f32 %v7808_v1 }
 0x2ad   : > { %v7810_v3 = vmul.f32 1.442695, %v7801_v2 }
 0x2af   : > { %16533 = vpow2.f32 %v7810_v3 }
 0x2b1   : > { %v16526_v4 = vpop.eup %16525 }
 0x2b2   : > { %v16528_v6 = vpop.eup %16527  ;;  %v7812_v7 = vadd.f32 1.0, %v16526_v4 }
 0x2b3   : > { %v7813_v15 = vadd.f32 1.0, %v16528_v6 }
 0x2b4   : > { %16535 = vrcp.f32 %v7812_v7  ;;  %v7894_v7 = vld [vmem:[%s18852_s6] sm:$0xf] }
 0x2b5   : > { %v16530_v16 = vpop.eup %16529  ;;  %16537 = vrcp.f32 %v7813_v15 }
 0x2b6   : > { %v16532_v17 = vpop.eup %16531  ;;  %v7814_v19 = vadd.f32 1.0, %v16530_v16 }
 0x2b7   : > { %v7815_v21 = vadd.f32 1.0, %v16532_v17 }
 0x2b8   : > { %16539 = vrcp.f32 %v7814_v19 }
 0x2b9   : > { %v16534_v25 = vpop.eup %16533  ;;  %16541 = vrcp.f32 %v7815_v21 }
 0x2ba   : > { %v7816_v26 = vadd.f32 1.0, %v16534_v25 }
 0x2bc   : > { %16543 = vrcp.f32 %v7816_v26 }
 0x2be   : > { %v16536_v28 = vpop.eup %16535 }
 0x2bf   : > { %v16538_v14 = vpop.eup %16537  ;;  %v7827_v30 = vmul.f32 %v16536_v28, %v7792_v46 }
 0x2c0   : > { %v7828_v31 = vmul.f32 %v16538_v14, %v7793_v50 }
 0x2c1   : > { %v7858_v32 = vmul.f32 %v7836_v27, %v7827_v30  ;;  %v15534_v30 = vld [vmem:[%s18852_s6 + $0x8] sm:$0xf] }
 0x2c2   : > { %v16540_v36 = vpop.eup %16539  ;;  %v17790_v37 = vmul.f32 %v7840_v29, %v7828_v31 }
 0x2c3   : > { %v16542_v39 = vpop.eup %16541  ;;  %v7829_v40 = vmul.f32 %v16540_v36, %v7794_v55 }
 0x2c4   : > { %v17795_v41 = vcombine.low %v7858_v32, %v17790_v37  ;;  %v7830_v42 = vmul.f32 %v16542_v39, %v7795_v57 }
 0x2c5   : > { %v7860_v43 = vmul.f32 %v7844_v34, %v7829_v40 }
 0x2c6   : > { %v16544_v46 = vpop.eup %16543  ;;  %7876 = vst [vmem:[#allocation4 + $0x4] sm:$0xff] %v17795_v41  ;;  %v17800_v47 = vmul.f32 %v7848_v38, %v7830_v42 }
 0x2c7   : > { %v7831_v48 = vmul.f32 %v16544_v46, %v7796_v63 }
 0x2c8   : > { %v17803_v49 = vcombine.low %v7860_v43, %v17800_v47 }
 0x2c9   : > { %v7862_v50 = vmul.f32 %v7852_v44, %v7831_v48  ;;  %v18041_v44 = vcombine.low %v17790_v37, %v17790_v37 }
 0x2ca   : > { %7877 = vst [vmem:[#allocation4 + $0xc] sm:$0xff] %v17803_v49 }
 0x2cb   : > { %7878 = vst [vmem:[#allocation4 + $0x14] sm:$0xf] %v7862_v50  ;;  %v15543_v50 = vld [vmem:[%s18852_s6 + $0xc] sm:$0xf] }
 0x2cd   : > { %v17806_v20 = vld [vmem:[#allocation4] sm:$0xff] }
 0x2ce   : > { %7908 = vrot.lane.b32.xlu1 %v17806_v20, %s16580_s23  ;;  %v17812_v24 = vcombine.high %v17806_v20, %v17806_v20 }
 0x2d1   : > { %v17814_v51 = vld [vmem:[#allocation4 + $0x8] sm:$0xff] }
 0x2d2   : > { %7910 = vrot.lane.b32.xlu1 %v17812_v24, %s16580_s23  ;;  %7912 = vrot.lane.b32.xlu0 %v17814_v51, %s16580_s23  ;;  %v17822_v52 = vcombine.high %v17814_v51, %v17814_v51  ;;  %v17824_v9 = vld [vmem:[#allocation4 + $0x10] sm:$0xff] }
 0x2d3   : > { %v17832_v33 = vcombine.high %v17824_v9, %v17824_v9 }
 0x2d6   : > { %7914 = vrot.lane.b32.xlu0 %v17822_v52, %s16580_s23  ;;  %7916 = vrot.lane.b32.xlu1 %v17824_v9, %s16580_s23 }
 0x2da   : > { %8152 = vrot.lane.b32.xlu1 %v17812_v24, %s16581_s24  ;;  %7918 = vrot.lane.b32.xlu0 %v17832_v33, %s16580_s23  ;;  %s18933_s23 = smov 89  }
 0x2de   : > { %8150 = vrot.lane.b32.xlu1 %v17806_v20, %s16581_s24  ;;  %8154 = vrot.lane.b32.xlu0 %v17814_v51, %s16581_s24 }
 0x2e2   : > { %8158 = vrot.lane.b32.xlu1 %v17824_v9, %s16581_s24  ;;  %8156 = vrot.lane.b32.xlu0 %v17822_v52, %s16581_s24 }
 0x2e6   : > { %8413 = vrot.lane.b32.xlu1 %v17812_v24, %s16582_s25  ;;  %8160 = vrot.lane.b32.xlu0 %v17832_v33, %s16581_s24 }
 0x2ea   : > { %8411 = vrot.lane.b32.xlu1 %v17806_v20, %s16582_s25  ;;  %8415 = vrot.lane.b32.xlu0 %v17814_v51, %s16582_s25 }
 0x2ee   : > { %8419 = vrot.lane.b32.xlu1 %v17824_v9, %s16582_s25  ;;  %8417 = vrot.lane.b32.xlu0 %v17822_v52, %s16582_s25 }
 0x2f2   : > { %8679 = vrot.lane.b32.xlu1 %v17812_v24, %s16583_s26  ;;  %8421 = vrot.lane.b32.xlu0 %v17832_v33, %s16582_s25  ;;  %s18934_s25 = smov 11  }
 0x2f6   : > { %8677 = vrot.lane.b32.xlu1 %v17806_v20, %s16583_s26  ;;  %8681 = vrot.lane.b32.xlu0 %v17814_v51, %s16583_s26 }
 0x2fa   : > { %8685 = vrot.lane.b32.xlu1 %v17824_v9, %s16583_s26  ;;  %8683 = vrot.lane.b32.xlu0 %v17822_v52, %s16583_s26 }
 0x2fe   : > { %8945 = vrot.lane.b32.xlu1 %v17812_v24, %s16584_s27  ;;  %8687 = vrot.lane.b32.xlu0 %v17832_v33, %s16583_s26  ;;  %s18935_s26 = smov 10  }
 0x302   : > { %8943 = vrot.lane.b32.xlu1 %v17806_v20, %s16584_s27  ;;  %8947 = vrot.lane.b32.xlu0 %v17814_v51, %s16584_s27 }
 0x306   : > { %8951 = vrot.lane.b32.xlu1 %v17824_v9, %s16584_s27  ;;  %8949 = vrot.lane.b32.xlu0 %v17822_v52, %s16584_s27 }
 0x30a   : > { %9211 = vrot.lane.b32.xlu1 %v17812_v24, %s16585_s28  ;;  %8953 = vrot.lane.b32.xlu0 %v17832_v33, %s16584_s27  ;;  %s19046_s27 = smov 8  }
 0x30e   : > { %9209 = vrot.lane.b32.xlu1 %v17806_v20, %s16585_s28  ;;  %9213 = vrot.lane.b32.xlu0 %v17814_v51, %s16585_s28 }
 0x312   : > { %9217 = vrot.lane.b32.xlu1 %v17824_v9, %s16585_s28  ;;  %9215 = vrot.lane.b32.xlu0 %v17822_v52, %s16585_s28 }
 0x316   : > { %9477 = vrot.lane.b32.xlu1 %v17812_v24, %s16586_s29  ;;  %9219 = vrot.lane.b32.xlu0 %v17832_v33, %s16585_s28  ;;  %s19050_s28 = smov 55  }
 0x31a   : > { %9475 = vrot.lane.b32.xlu1 %v17806_v20, %s16586_s29  ;;  %9479 = vrot.lane.b32.xlu0 %v17814_v51, %s16586_s29 }
 0x31e   : > { %9483 = vrot.lane.b32.xlu1 %v17824_v9, %s16586_s29  ;;  %9481 = vrot.lane.b32.xlu0 %v17822_v52, %s16586_s29 }
 0x322   : > { %9743 = vrot.lane.b32.xlu1 %v17812_v24, %s16587_s30  ;;  %9485 = vrot.lane.b32.xlu0 %v17832_v33, %s16586_s29  ;;  %s18936_s29 = smov 9  }
 0x326   : > { %9741 = vrot.lane.b32.xlu1 %v17806_v20, %s16587_s30  ;;  %9745 = vrot.lane.b32.xlu0 %v17814_v51, %s16587_s30 }
 0x32a   : > { %9749 = vrot.lane.b32.xlu1 %v17824_v9, %s16587_s30  ;;  %9747 = vrot.lane.b32.xlu0 %v17822_v52, %s16587_s30 }
 0x32e   : > { %10009 = vrot.lane.b32.xlu1 %v17812_v24, %s18933_s23  ;;  %9751 = vrot.lane.b32.xlu0 %v17832_v33, %s16587_s30  ;;  %s19053_s30 = smov 36  }
 0x332   : > { %10007 = vrot.lane.b32.xlu1 %v17806_v20, %s18933_s23  ;;  %10011 = vrot.lane.b32.xlu0 %v17814_v51, %s18933_s23 }
 0x336   : > { %10015 = vrot.lane.b32.xlu1 %v17824_v9, %s18933_s23  ;;  %10013 = vrot.lane.b32.xlu0 %v17822_v52, %s18933_s23 }
 0x33a   : > { %10275 = vrot.lane.b32.xlu1 %v17812_v24, %s18934_s25  ;;  %10017 = vrot.lane.b32.xlu0 %v17832_v33, %s18933_s23  ;;  %s18987_s23 = smov 18  }
 0x33e   : > { %10273 = vrot.lane.b32.xlu1 %v17806_v20, %s18934_s25  ;;  %10277 = vrot.lane.b32.xlu0 %v17814_v51, %s18934_s25 }
 0x340   : > { %v7909_v53 = vpop.permute.xlu1 %7908 }
 0x342   : > { %10281 = vrot.lane.b32.xlu1 %v17824_v9, %s18934_s25  ;;  %10279 = vrot.lane.b32.xlu0 %v17822_v52, %s18934_s25 }
 0x344   : > { %v7911_v54 = vpop.permute.xlu1 %7910  ;;  %v7913_v55 = vpop.permute.xlu0 %7912 }
 0x345   : > { %v7921_v56 = vsel %vm556_vm0, %v7911_v54, %v7913_v55  ;;  %v7920_v35 = vsel %vm556_vm0, %v7909_v53, %v7911_v54  ;;  %v18073_v54 = vld [vmem:[#allocation4 + $0x14] sm:$0xff] }
 0x346   : > { %10541 = vrot.lane.b32.xlu1 %v17812_v24, %s18935_s26  ;;  %10283 = vrot.lane.b32.xlu0 %v17832_v33, %s18934_s25  ;;  %s19041_s25 = smov 106  }
 0x347   : > { %15518 = vmatprep.subr.msk.mxu1 %vm419_vm1, %v7921_v56 }
 0x348   : > { %15519 = vmatpush1.msk.msra.mxu1 %vm419_vm1, %v7920_v35  ;;  %v7917_v57 = vpop.permute.xlu1 %7916  ;;  %v7915_v58 = vpop.permute.xlu0 %7914 }
 0x349   : > { %15520 = vmatmul.mubr.msk.f32.vlgmr.msra.gmra.mrb[0].mxu1 %vm562_vm2, %v15517_v45  ;;  %v7922_v60 = vsel %vm556_vm0, %v7913_v55, %v7915_v58  ;;  %v7923_v61 = vsel %vm556_vm0, %v7915_v58, %v7917_v57 }
 0x34a   : > { %10539 = vrot.lane.b32.xlu1 %v17806_v20, %s18935_s26  ;;  %10543 = vrot.lane.b32.xlu0 %v17814_v51, %s18935_s26 }
 0x34b   : > { %15521 = vmatprep.subr.msk.mxu1 %vm419_vm1, %v7923_v61  ;;  %8073 = vmatprep.mubr.f32.mxu1 %v17700_v0 }
 0x34c   : > { %15522 = vmatpush1.msk.msra.mxu1 %vm419_vm1, %v7922_v60  ;;  %v8153_v62 = vpop.permute.xlu1 %8152  ;;  %v7919_v63 = vpop.permute.xlu0 %7918 }
 0x34d   : > { %15523 = vmatmul.mubr.msk.f32.vlgmr.msra.gmra.mrb[2].mxu1 %vm562_vm2, %v15517_v45  ;;  %v7924_v1 = vsel %vm556_vm0, %v7917_v57, %v7919_v63  ;;  %16004 = vmatprep.subr.mxu1 %v17700_v0  ;;  %v18096_v57 = vcombine.high %v18073_v54, %v18073_v54  ;;  %vm18939_vm0 = vcmask 809984  }
 0x34e   : > { %10547 = vrot.lane.b32.xlu1 %v17824_v9, %s18935_s26  ;;  %10545 = vrot.lane.b32.xlu0 %v17822_v52, %s18935_s26 }
 0x34f   : > { %16005 = vmatpush3.msk.msra.mxu1 %vm419_vm1, %v7924_v1  ;;  %16006 = vmatprep.mubr.msk.f32.mxu1 %vm16591_vm3, %v17700_v0 }
 0x350   : > { %v8151_v2 = vpop.permute.xlu1 %8150  ;;  %v8155_v3 = vpop.permute.xlu0 %8154 }
 0x351   : > { %v8162_v4 = vsel %vm800_vm4, %v8151_v2, %v8153_v62  ;;  %16007 = vmatmul.mubr.msk.f32.vlgmr.msra.gmra.mrb[4].mxu1 %vm562_vm2, %v15517_v45  ;;  %v8163_v6 = vsel %vm800_vm4, %v8153_v62, %v8155_v3  ;;  %v15552_v45 = vld [vmem:[%s18852_s6 + $0x10] sm:$0xf] }
 0x352   : > { %10807 = vrot.lane.b32.xlu1 %v17812_v24, %s18936_s29  ;;  %10549 = vrot.lane.b32.xlu0 %v17832_v33, %s18935_s26  ;;  %s18938_s26 = smov 119  }
 0x353   : > { %15526 = vmatprep.subr.msk.mxu1 %vm419_vm1, %v8163_v6  ;;  %8244 = vmatprep.mubr.f32.mxu1 %v17700_v0 }
 0x354   : > { %15527 = vmatpush1.msk.msra.mxu1 %vm419_vm1, %v8162_v4  ;;  %v8159_v15 = vpop.permute.xlu1 %8158  ;;  %v8157_v16 = vpop.permute.xlu0 %8156 }
 0x355   : > { %15528 = vmatmul.mubr.msk.f32.vlgmr.msra.gmra.mrb[0].mxu1 %vm562_vm2, %v7894_v7  ;;  %v8164_v17 = vsel %vm800_vm4, %v8155_v3, %v8157_v16  ;;  %v8165_v19 = vsel %vm800_vm4, %v8157_v16, %v8159_v15 }
 0x356   : > { %10805 = vrot.lane.b32.xlu1 %v17806_v20, %s18936_s29  ;;  %10809 = vrot.lane.b32.xlu0 %v17814_v51, %s18936_s29 }
 0x357   : > { %15529 = vmatprep.subr.msk.mxu1 %vm419_vm1, %v8165_v19  ;;  %8315 = vmatprep.mubr.f32.mxu1 %v17700_v0 }
 0x358   : > { %15530 = vmatpush1.msk.msra.mxu1 %vm419_vm1, %v8164_v17  ;;  %v8414_v21 = vpop.permute.xlu1 %8413  ;;  %v8161_v25 = vpop.permute.xlu0 %8160 }
 0x359   : > { %15531 = vmatmul.mubr.msk.f32.vlgmr.msra.gmra.mrb[2].mxu1 %vm562_vm2, %v7894_v7  ;;  %v8166_v26 = vsel %vm800_vm4, %v8159_v15, %v8161_v25  ;;  %16009 = vmatprep.subr.mxu1 %v17700_v0  ;;  %v15561_v15 = vld [vmem:[%s18852_s6 + $0x14] sm:$0xf] }
 0x35a   : > { %10813 = vrot.lane.b32.xlu1 %v17824_v9, %s18936_s29  ;;  %10811 = vrot.lane.b32.xlu0 %v17822_v52, %s18936_s29 }
 0x35b   : > { %16010 = vmatpush3.msk.msra.mxu1 %vm419_vm1, %v8166_v26  ;;  %16011 = vmatprep.mubr.msk.f32.mxu1 %vm16591_vm3, %v17700_v0 }
 0x35c   : > { %v8412_v27 = vpop.permute.xlu1 %8411  ;;  %v8416_v28 = vpop.permute.xlu0 %8415 }
 0x35d   : > { %v8423_v29 = vsel %vm1063_vm5, %v8412_v27, %v8414_v21  ;;  %16012 = vmatmul.mubr.msk.f32.vlgmr.msra.gmra.mrb[4].mxu1 %vm562_vm2, %v7894_v7  ;;  %v8424_v14 = vsel %vm1063_vm5, %v8414_v21, %v8416_v28 }
 0x35e   : > { %11073 = vrot.lane.b32.xlu1 %v17812_v24, %s18937_s16  ;;  %10815 = vrot.lane.b32.xlu0 %v17832_v33, %s18936_s29  ;;  %s18963_s29 = smov 37  }
 0x35f   : > { %15535 = vmatprep.subr.msk.mxu1 %vm419_vm1, %v8424_v14  ;;  %8505 = vmatprep.mubr.f32.mxu1 %v17700_v0 }
 0x360   : > { %15536 = vmatpush1.msk.msra.mxu1 %vm419_vm1, %v8423_v29  ;;  %v8420_v31 = vpop.permute.xlu1 %8419  ;;  %v8418_v32 = vpop.permute.xlu0 %8417 }
 0x361   : > { %15537 = vmatmul.mubr.msk.f32.vlgmr.msra.gmra.mrb[0].mxu1 %vm562_vm2, %v15534_v30  ;;  %v8425_v34 = vsel %vm1063_vm5, %v8416_v28, %v8418_v32  ;;  %v8426_v36 = vsel %vm1063_vm5, %v8418_v32, %v8420_v31 }
 0x362   : > { %11071 = vrot.lane.b32.xlu1 %v17806_v20, %s18937_s16  ;;  %11075 = vrot.lane.b32.xlu0 %v17814_v51, %s18937_s16 }
 0x363   : > { %15538 = vmatprep.subr.msk.mxu1 %vm419_vm1, %v8426_v36  ;;  %8576 = vmatprep.mubr.f32.mxu1 %v17700_v0 }
 0x364   : > { %15539 = vmatpush1.msk.msra.mxu1 %vm419_vm1, %v8425_v34  ;;  %v8680_v38 = vpop.permute.xlu1 %8679  ;;  %v8422_v39 = vpop.permute.xlu0 %8421 }
 0x365   : > { %15540 = vmatmul.mubr.msk.f32.vlgmr.msra.gmra.mrb[2].mxu1 %vm562_vm2, %v15534_v30  ;;  %v8427_v40 = vsel %vm1063_vm5, %v8420_v31, %v8422_v39  ;;  %16014 = vmatprep.subr.mxu1 %v17700_v0  ;;  %vm18940_vm5 = vmmov %vm18939_vm0  ;;  %v15570_v31 = vld [vmem:[%s18852_s6 + $0x18] sm:$0xf] }
 0x366   : > { %11079 = vrot.lane.b32.xlu1 %v17824_v9, %s18937_s16  ;;  %11077 = vrot.lane.b32.xlu0 %v17822_v52, %s18937_s16  ;;  %v18067_v52 = vcombine.low %v17800_v47, %v17800_v47 }
 0x367   : > { %16015 = vmatpush3.msk.msra.mxu1 %vm419_vm1, %v8427_v40  ;;  %16016 = vmatprep.mubr.msk.f32.mxu1 %vm16591_vm3, %v17700_v0 }
 0x368   : > { %v8678_v42 = vpop.permute.xlu1 %8677  ;;  %v8682_v43 = vpop.permute.xlu0 %8681 }
 0x369   : > { %v8689_v46 = vsel %vm1331_vm6, %v8678_v42, %v8680_v38  ;;  %16017 = vmatmul.mubr.msk.f32.vlgmr.msra.gmra.mrb[4].mxu1 %vm562_vm2, %v15534_v30  ;;  %v8690_v48 = vsel %vm1331_vm6, %v8680_v38, %v8682_v43 }
 0x36a   : > { %11587 = vrot.lane.b32.xlu1 %v18041_v44, %s16594_s19  ;;  %11081 = vrot.lane.b32.xlu0 %v17832_v33, %s18937_s16  ;;  %s18982_s16 = smov 19  }
 0x36b   : > { %15544 = vmatprep.subr.msk.mxu1 %vm419_vm1, %v8690_v48  ;;  %8771 = vmatprep.mubr.f32.mxu1 %v17700_v0 }
 0x36c   : > { %15545 = vmatpush1.msk.msra.mxu1 %vm419_vm1, %v8689_v46  ;;  %v8686_v37 = vpop.permute.xlu1 %8685  ;;  %v8684_v20 = vpop.permute.xlu0 %8683 }
 0x36d   : > { %15546 = vmatmul.mubr.msk.f32.vlgmr.msra.gmra.mrb[0].mxu1 %vm562_vm2, %v15543_v50  ;;  %v8691_v24 = vsel %vm1331_vm6, %v8682_v43, %v8684_v20  ;;  %v8692_v51 = vsel %vm1331_vm6, %v8684_v20, %v8686_v37 }
 0x36e   : > { %11585 = vrot.lane.b32.xlu1 %v17795_v41, %s16594_s19  ;;  %11589 = vrot.lane.b32.xlu0 %v17803_v49, %s16594_s19 }
 0x36f   : > { %15547 = vmatprep.subr.msk.mxu1 %vm419_vm1, %v8692_v51  ;;  %8842 = vmatprep.mubr.f32.mxu1 %v17700_v0 }
 0x370   : > { %15548 = vmatpush1.msk.msra.mxu1 %vm419_vm1, %v8691_v24  ;;  %v8946_v9 = vpop.permute.xlu1 %8945  ;;  %v8688_v33 = vpop.permute.xlu0 %8687 }
 0x371   : > { %15549 = vmatmul.mubr.msk.f32.vlgmr.msra.gmra.mrb[2].mxu1 %vm562_vm2, %v15543_v50  ;;  %v8693_v53 = vsel %vm1331_vm6, %v8686_v37, %v8688_v33  ;;  %16019 = vmatprep.subr.mxu1 %v17700_v0  ;;  %vm18941_vm6 = vmmov %vm18939_vm0  ;;  %v15579_v37 = vld [vmem:[%s18852_s6 + $0x1c] sm:$0xf] }
 0x372   : > { %11593 = vrot.lane.b32.xlu1 %v18073_v54, %s16594_s19  ;;  %11591 = vrot.lane.b32.xlu0 %v18067_v52, %s16594_s19 }
 0x373   : > { %16020 = vmatpush3.msk.msra.mxu1 %vm419_vm1, %v8693_v53  ;;  %16021 = vmatprep.mubr.msk.f32.mxu1 %vm16591_vm3, %v17700_v0 }
 0x374   : > { %v8944_v47 = vpop.permute.xlu1 %8943  ;;  %v8948_v55 = vpop.permute.xlu0 %8947 }
 0x375   : > { %v8955_v56 = vsel %vm1599_vm7, %v8944_v47, %v8946_v9  ;;  %16022 = vmatmul.mubr.msk.f32.vlgmr.msra.gmra.mrb[4].mxu1 %vm562_vm2, %v15543_v50  ;;  %v8956_v35 = vsel %vm1599_vm7, %v8946_v9, %v8948_v55 }
 0x376   : > { %11853 = vrot.lane.b32.xlu1 %v18041_v44, %s18938_s26  ;;  %11855 = vrot.lane.b32.xlu0 %v17803_v49, %s18938_s26 }
 0x377   : > { %15553 = vmatprep.subr.msk.mxu1 %vm419_vm1, %v8956_v35  ;;  %9037 = vmatprep.mubr.f32.mxu1 %v17700_v0 }
 0x378   : > { %15554 = vmatpush1.msk.msra.mxu1 %vm419_vm1, %v8955_v56  ;;  %v8952_v58 = vpop.permute.xlu1 %8951  ;;  %v8950_v60 = vpop.permute.xlu0 %8949 }
 0x379   : > { %15555 = vmatmul.mubr.msk.f32.vlgmr.msra.gmra.mrb[0].mxu1 %vm562_vm2, %v15552_v45  ;;  %v8957_v61 = vsel %vm1599_vm7, %v8948_v55, %v8950_v60  ;;  %v8958_v62 = vsel %vm1599_vm7, %v8950_v60, %v8952_v58 }
 0x37a   : > { %11851 = vrot.lane.b32.xlu1 %v17795_v41, %s18938_s26  ;;  %11595 = vrot.lane.b32.xlu0 %v18096_v57, %s16594_s19 }
 0x37b   : > { %15556 = vmatprep.subr.msk.mxu1 %vm419_vm1, %v8958_v62  ;;  %9108 = vmatprep.mubr.f32.mxu1 %v17700_v0 }
 0x37c   : > { %15557 = vmatpush1.msk.msra.mxu1 %vm419_vm1, %v8957_v61  ;;  %v9212_v63 = vpop.permute.xlu1 %9211  ;;  %v8954_v1 = vpop.permute.xlu0 %8953 }
 0x37d   : > { %15558 = vmatmul.mubr.msk.f32.vlgmr.msra.gmra.mrb[2].mxu1 %vm562_vm2, %v15552_v45  ;;  %v8959_v2 = vsel %vm1599_vm7, %v8952_v58, %v8954_v1  ;;  %16024 = vmatprep.subr.mxu1 %v17700_v0  ;;  %vm18942_vm7 = vmmov %vm18939_vm0  ;;  %v15588_v58 = vld [vmem:[%s18852_s6 + $0x20] sm:$0xf] }
 0x37e   : > { %11859 = vrot.lane.b32.xlu1 %v18073_v54, %s18938_s26  ;;  %11857 = vrot.lane.b32.xlu0 %v18067_v52, %s18938_s26 }
 0x37f   : > { %16025 = vmatpush3.msk.msra.mxu1 %vm419_vm1, %v8959_v2  ;;  %16026 = vmatprep.mubr.msk.f32.mxu1 %vm16591_vm3, %v17700_v0 }
 0x380   : > { %v9210_v3 = vpop.permute.xlu1 %9209  ;;  %v9214_v4 = vpop.permute.xlu0 %9213 }
 0x381   : > { %v9221_v6 = vsel %vm18939_vm0, %v9210_v3, %v9212_v63  ;;  %16027 = vmatmul.mubr.msk.f32.vlgmr.msra.gmra.mrb[4].mxu1 %vm562_vm2, %v15552_v45  ;;  %v9222_v7 = vsel %vm18940_vm5, %v9212_v63, %v9214_v4  ;;  %vm18943_vm5 = vcmask 744448  }
 0x382   : > { %12119 = vrot.lane.b32.xlu1 %v18041_v44, %s16597_s22  ;;  %12121 = vrot.lane.b32.xlu0 %v17803_v49, %s16597_s22 }
 0x383   : > { %15562 = vmatprep.subr.msk.mxu1 %vm419_vm1, %v9222_v7  ;;  %9303 = vmatprep.mubr.f32.mxu1 %v17700_v0 }
 0x384   : > { %15563 = vmatpush1.msk.msra.mxu1 %vm419_vm1, %v9221_v6  ;;  %v9218_v16 = vpop.permute.xlu1 %9217  ;;  %v9216_v17 = vpop.permute.xlu0 %9215 }
 0x385   : > { %15564 = vmatmul.mubr.msk.f32.vlgmr.msra.gmra.mrb[0].mxu1 %vm562_vm2, %v15561_v15  ;;  %v9223_v19 = vsel %vm18941_vm6, %v9214_v4, %v9216_v17  ;;  %v9224_v21 = vsel %vm18942_vm7, %v9216_v17, %v9218_v16  ;;  %vm18944_vm6 = vmmov %vm18943_vm5 }
 0x386   : > { %12117 = vrot.lane.b32.xlu1 %v17795_v41, %s16597_s22  ;;  %11861 = vrot.lane.b32.xlu0 %v18096_v57, %s18938_s26  ;;  %vm18946_vm7 = vmmov %vm18943_vm5  ;;  %s18957_s26 = smov 38  }
 0x387   : > { %15565 = vmatprep.subr.msk.mxu1 %vm419_vm1, %v9224_v21  ;;  %9374 = vmatprep.mubr.f32.mxu1 %v17700_v0 }
 0x388   : > { %15566 = vmatpush1.msk.msra.mxu1 %vm419_vm1, %v9223_v19  ;;  %v9478_v25 = vpop.permute.xlu1 %9477  ;;  %v9220_v26 = vpop.permute.xlu0 %9219 }
 0x389   : > { %15567 = vmatmul.mubr.msk.f32.vlgmr.msra.gmra.mrb[2].mxu1 %vm562_vm2, %v15561_v15  ;;  %v9225_v27 = vsel %vm18939_vm0, %v9218_v16, %v9220_v26  ;;  %16029 = vmatprep.subr.mxu1 %v17700_v0  ;;  %vm18947_vm0 = vmmov %vm18943_vm5  ;;  %v15597_v16 = vld [vmem:[%s18852_s6 + $0x24] sm:$0xf] }
 0x38a   : > { %12125 = vrot.lane.b32.xlu1 %v18073_v54, %s16597_s22  ;;  %12123 = vrot.lane.b32.xlu0 %v18067_v52, %s16597_s22 }
 0x38b   : > { %16030 = vmatpush3.msk.msra.mxu1 %vm419_vm1, %v9225_v27  ;;  %16031 = vmatprep.mubr.msk.f32.mxu1 %vm16591_vm3, %v17700_v0 }
 0x38c   : > { %v9476_v28 = vpop.permute.xlu1 %9475  ;;  %v9480_v29 = vpop.permute.xlu0 %9479 }
 0x38d   : > { %v9487_v14 = vsel %vm18943_vm5, %v9476_v28, %v9478_v25  ;;  %16032 = vmatmul.mubr.msk.f32.vlgmr.msra.gmra.mrb[4].mxu1 %vm562_vm2, %v15561_v15  ;;  %v9488_v30 = vsel %vm18944_vm6, %v9478_v25, %v9480_v29  ;;  %vm18948_vm5 = vmmov %vm18947_vm0  ;;  %vm18949_vm6 = vcmask 736256   ;;  %v18277_v28 = vld [vmem:[#allocation4 + $0x4] sm:$0xff] }
 0x38e   : > { %12385 = vrot.lane.b32.xlu1 %v18041_v44, %s18945_s21  ;;  %12387 = vrot.lane.b32.xlu0 %v17803_v49, %s18945_s21 }
 0x38f   : > { %15571 = vmatprep.subr.msk.mxu1 %vm419_vm1, %v9488_v30  ;;  %9569 = vmatprep.mubr.f32.mxu1 %v17700_v0 }
 0x390   : > { %15572 = vmatpush1.msk.msra.mxu1 %vm419_vm1, %v9487_v14  ;;  %v9484_v32 = vpop.permute.xlu1 %9483  ;;  %v9482_v34 = vpop.permute.xlu0 %9481  ;;  %v18288_v14 = vcombine.high %v18277_v28, %v18277_v28 }
 0x391   : > { %15573 = vmatmul.mubr.msk.f32.vlgmr.msra.gmra.mrb[0].mxu1 %vm562_vm2, %v15570_v31  ;;  %v9489_v36 = vsel %vm18946_vm7, %v9480_v29, %v9482_v34  ;;  %v9490_v38 = vsel %vm18947_vm0, %v9482_v34, %v9484_v32  ;;  %vm18950_vm7 = vmmov %vm18949_vm6 }
 0x392   : > { %12383 = vrot.lane.b32.xlu1 %v17795_v41, %s18945_s21  ;;  %12127 = vrot.lane.b32.xlu0 %v18096_v57, %s16597_s22  ;;  %vm18952_vm0 = vmmov %vm18949_vm6 }
 0x393   : > { %15574 = vmatprep.subr.msk.mxu1 %vm419_vm1, %v9490_v38  ;;  %9640 = vmatprep.mubr.f32.mxu1 %v17700_v0 }
 0x394   : > { %15575 = vmatpush1.msk.msra.mxu1 %vm419_vm1, %v9489_v36  ;;  %v9744_v39 = vpop.permute.xlu1 %9743  ;;  %v9486_v40 = vpop.permute.xlu0 %9485 }
 0x395   : > { %15576 = vmatmul.mubr.msk.f32.vlgmr.msra.gmra.mrb[2].mxu1 %vm562_vm2, %v15570_v31  ;;  %v9491_v42 = vsel %vm18948_vm5, %v9484_v32, %v9486_v40  ;;  %16034 = vmatprep.subr.mxu1 %v17700_v0  ;;  %vm18953_vm5 = vmmov %vm18952_vm0  ;;  %v15606_v32 = vld [vmem:[%s18852_s6 + $0x28] sm:$0xf] }
 0x396   : > { %12391 = vrot.lane.b32.xlu1 %v18073_v54, %s18945_s21  ;;  %12389 = vrot.lane.b32.xlu0 %v18067_v52, %s18945_s21 }
 0x397   : > { %16035 = vmatpush3.msk.msra.mxu1 %vm419_vm1, %v9491_v42  ;;  %16036 = vmatprep.mubr.msk.f32.mxu1 %vm16591_vm3, %v17700_v0 }
 0x398   : > { %v9742_v43 = vpop.permute.xlu1 %9741  ;;  %v9746_v46 = vpop.permute.xlu0 %9745 }
 0x399   : > { %v9753_v48 = vsel %vm18949_vm6, %v9742_v43, %v9744_v39  ;;  %16037 = vmatmul.mubr.msk.f32.vlgmr.msra.gmra.mrb[4].mxu1 %vm562_vm2, %v15570_v31  ;;  %v9754_v50 = vsel %vm18950_vm7, %v9744_v39, %v9746_v46  ;;  %vm18954_vm6 = vmmov %vm18952_vm0  ;;  %vm18955_vm7 = vcmask 728064  }
 0x39a   : > { %12651 = vrot.lane.b32.xlu1 %v18041_v44, %s18951_s18  ;;  %12653 = vrot.lane.b32.xlu0 %v17803_v49, %s18951_s18 }
 0x39b   : > { %15580 = vmatprep.subr.msk.mxu1 %vm419_vm1, %v9754_v50  ;;  %9835 = vmatprep.mubr.f32.mxu1 %v17700_v0 }
 0x39c   : > { %15581 = vmatpush1.msk.msra.mxu1 %vm419_vm1, %v9753_v48  ;;  %v9750_v20 = vpop.permute.xlu1 %9749  ;;  %v9748_v24 = vpop.permute.xlu0 %9747 }
 0x39d   : > { %15582 = vmatmul.mubr.msk.f32.vlgmr.msra.gmra.mrb[0].mxu1 %vm562_vm2, %v15579_v37  ;;  %v9755_v51 = vsel %vm18952_vm0, %v9746_v46, %v9748_v24  ;;  %v9756_v9 = vsel %vm18953_vm5, %v9748_v24, %v9750_v20  ;;  %vm18956_vm0 = vmmov %vm18955_vm7 }
 0x39e   : > { %12649 = vrot.lane.b32.xlu1 %v17795_v41, %s18951_s18  ;;  %12393 = vrot.lane.b32.xlu0 %v18096_v57, %s18945_s21  ;;  %vm18958_vm5 = vmmov %vm18956_vm0 }
 0x39f   : > { %15583 = vmatprep.subr.msk.mxu1 %vm419_vm1, %v9756_v9  ;;  %9906 = vmatprep.mubr.f32.mxu1 %v17700_v0 }
 0x3a0   : > { %15584 = vmatpush1.msk.msra.mxu1 %vm419_vm1, %v9755_v51  ;;  %v10010_v33 = vpop.permute.xlu1 %10009  ;;  %v9752_v53 = vpop.permute.xlu0 %9751  ;;  %v18338_v51 = vld [vmem:[#allocation4 + $0xc] sm:$0xff] }
 0x3a1   : > { %15585 = vmatmul.mubr.msk.f32.vlgmr.msra.gmra.mrb[2].mxu1 %vm562_vm2, %v15579_v37  ;;  %v9757_v47 = vsel %vm18954_vm6, %v9750_v20, %v9752_v53  ;;  %16039 = vmatprep.subr.mxu1 %v17700_v0  ;;  %vm18959_vm6 = vmmov %vm18956_vm0  ;;  %v18349_v9 = vcombine.high %v18338_v51, %v18338_v51 }
 0x3a2   : > { %12657 = vrot.lane.b32.xlu1 %v18073_v54, %s18951_s18  ;;  %12655 = vrot.lane.b32.xlu0 %v18067_v52, %s18951_s18 }
 0x3a3   : > { %16040 = vmatpush3.msk.msra.mxu1 %vm419_vm1, %v9757_v47  ;;  %16041 = vmatprep.mubr.msk.f32.mxu1 %vm16591_vm3, %v17700_v0 }
 0x3a4   : > { %v10008_v55 = vpop.permute.xlu1 %10007  ;;  %v10012_v56 = vpop.permute.xlu0 %10011 }
 0x3a5   : > { %v10019_v35 = vsel %vm18955_vm7, %v10008_v55, %v10010_v33  ;;  %16042 = vmatmul.mubr.msk.f32.vlgmr.msra.gmra.mrb[4].mxu1 %vm562_vm2, %v15579_v37  ;;  %v10020_v45 = vsel %vm18956_vm0, %v10010_v33, %v10012_v56  ;;  %vm18960_vm7 = vmmov %vm18956_vm0  ;;  %vm18961_vm0 = vcmask 89088  }
 0x3a6   : > { %12917 = vrot.lane.b32.xlu1 %v18041_v44, %s18957_s26  ;;  %12919 = vrot.lane.b32.xlu0 %v17803_v49, %s18957_s26 }
 0x3a7   : > { %15589 = vmatprep.subr.msk.mxu1 %vm419_vm1, %v10020_v45  ;;  %10101 = vmatprep.mubr.f32.mxu1 %v17700_v0 }
 0x3a8   : > { %15590 = vmatpush1.msk.msra.mxu1 %vm419_vm1, %v10019_v35  ;;  %v10016_v60 = vpop.permute.xlu1 %10015  ;;  %v10014_v61 = vpop.permute.xlu0 %10013 }
 0x3a9   : > { %15591 = vmatmul.mubr.msk.f32.vlgmr.msra.gmra.mrb[0].mxu1 %vm562_vm2, %v15588_v58  ;;  %v10021_v62 = vsel %vm18958_vm5, %v10012_v56, %v10014_v61  ;;  %v10022_v63 = vsel %vm18959_vm6, %v10014_v61, %v10016_v60  ;;  %vm18962_vm5 = vmmov %vm18961_vm0 }
 0x3aa   : > { %12915 = vrot.lane.b32.xlu1 %v17795_v41, %s18957_s26  ;;  %12659 = vrot.lane.b32.xlu0 %v18096_v57, %s18951_s18  ;;  %vm18964_vm6 = vmmov %vm18961_vm0  ;;  %s19040_s18 = smov 116  }
 0x3ab   : > { %15592 = vmatprep.subr.msk.mxu1 %vm419_vm1, %v10022_v63  ;;  %10172 = vmatprep.mubr.f32.mxu1 %v17700_v0 }
 0x3ac   : > { %15593 = vmatpush1.msk.msra.mxu1 %vm419_vm1, %v10021_v62  ;;  %v10276_v1 = vpop.permute.xlu1 %10275  ;;  %v10018_v2 = vpop.permute.xlu0 %10017 }
 0x3ad   : > { %15594 = vmatmul.mubr.msk.f32.vlgmr.msra.gmra.mrb[2].mxu1 %vm562_vm2, %v15588_v58  ;;  %v10023_v3 = vsel %vm18960_vm7, %v10016_v60, %v10018_v2  ;;  %16044 = vmatprep.subr.mxu1 %v17700_v0  ;;  %vm18965_vm7 = vmmov %vm18961_vm0 }
 0x3ae   : > { %12923 = vrot.lane.b32.xlu1 %v18073_v54, %s18957_s26  ;;  %12921 = vrot.lane.b32.xlu0 %v18067_v52, %s18957_s26 }
 0x3af   : > { %16045 = vmatpush3.msk.msra.mxu1 %vm419_vm1, %v10023_v3  ;;  %16046 = vmatprep.mubr.msk.f32.mxu1 %vm16591_vm3, %v17700_v0 }
 0x3b0   : > { %v10274_v4 = vpop.permute.xlu1 %10273  ;;  %v10278_v6 = vpop.permute.xlu0 %10277 }
 0x3b1   : > { %v10285_v7 = vsel %vm18961_vm0, %v10274_v4, %v10276_v1  ;;  %16047 = vmatmul.mubr.msk.f32.vlgmr.msra.gmra.mrb[4].mxu1 %vm562_vm2, %v15588_v58  ;;  %v10286_v15 = vsel %vm18962_vm5, %v10276_v1, %v10278_v6  ;;  %vm18966_vm5 = vcmask 80896   ;;  %v15624_v58 = vld [vmem:[%s18852_s6 + $0x30] sm:$0xf] }
 0x3b2   : > { %13183 = vrot.lane.b32.xlu1 %v18041_v44, %s18963_s29  ;;  %13185 = vrot.lane.b32.xlu0 %v17803_v49, %s18963_s29 }
 0x3b3   : > { %15598 = vmatprep.subr.msk.mxu1 %vm419_vm1, %v10286_v15  ;;  %10367 = vmatprep.mubr.f32.mxu1 %v17700_v0 }
 0x3b4   : > { %15599 = vmatpush1.msk.msra.mxu1 %vm419_vm1, %v10285_v7  ;;  %v10282_v17 = vpop.permute.xlu1 %10281  ;;  %v10280_v19 = vpop.permute.xlu0 %10279  ;;  %v15633_v7 = vld [vmem:[%s18852_s6 + $0x34] sm:$0xf] }
 0x3b5   : > { %15600 = vmatmul.mubr.msk.f32.vlgmr.msra.gmra.mrb[0].mxu1 %vm562_vm2, %v15597_v16  ;;  %v10287_v21 = vsel %vm18964_vm6, %v10278_v6, %v10280_v19  ;;  %v10288_v44 = vsel %vm18965_vm7, %v10280_v19, %v10282_v17  ;;  %vm18967_vm6 = vmmov %vm18966_vm5 }
 0x3b6   : > { %13181 = vrot.lane.b32.xlu1 %v17795_v41, %s18963_s29  ;;  %12925 = vrot.lane.b32.xlu0 %v18096_v57, %s18957_s26  ;;  %vm18969_vm7 = vmmov %vm18966_vm5  ;;  %s19042_s26 = smov 107  }
 0x3b7   : > { %15601 = vmatprep.subr.msk.mxu1 %vm419_vm1, %v10288_v44  ;;  %10438 = vmatprep.mubr.f32.mxu1 %v17700_v0 }
 0x3b8   : > { %15602 = vmatpush1.msk.msra.mxu1 %vm419_vm1, %v10287_v21  ;;  %v10542_v25 = vpop.permute.xlu1 %10541  ;;  %v10284_v26 = vpop.permute.xlu0 %10283  ;;  %v11330_v21 = vld [vmem:[#allocation4 + $0x14] sm:$0xf] }
 0x3b9   : > { %15603 = vmatmul.mubr.msk.f32.vlgmr.msra.gmra.mrb[2].mxu1 %vm562_vm2, %v15597_v16  ;;  %v10289_v27 = vsel %vm18961_vm0, %v10282_v17, %v10284_v26  ;;  %16049 = vmatprep.subr.mxu1 %v17700_v0  ;;  %vm18970_vm0 = vmmov %vm18966_vm5 }
 0x3ba   : > { %13189 = vrot.lane.b32.xlu1 %v18073_v54, %s18963_s29  ;;  %13187 = vrot.lane.b32.xlu0 %v18067_v52, %s18963_s29 }
 0x3bb   : > { %16050 = vmatpush3.msk.msra.mxu1 %vm419_vm1, %v10289_v27  ;;  %16051 = vmatprep.mubr.msk.f32.mxu1 %vm16591_vm3, %v17700_v0 }
 0x3bc   : > { %v10540_v41 = vpop.permute.xlu1 %10539  ;;  %v10544_v29 = vpop.permute.xlu0 %10543 }
 0x3bd   : > { %v10551_v30 = vsel %vm18966_vm5, %v10540_v41, %v10542_v25  ;;  %16052 = vmatmul.mubr.msk.f32.vlgmr.msra.gmra.mrb[4].mxu1 %vm562_vm2, %v15597_v16  ;;  %v10552_v31 = vsel %vm18967_vm6, %v10542_v25, %v10544_v29  ;;  %vm18971_vm5 = vmmov %vm18970_vm0  ;;  %vm18972_vm6 = vcmask 72704  }
 0x3be   : > { %13449 = vrot.lane.b32.xlu1 %v18288_v14, %s18968_s12  ;;  %13451 = vrot.lane.b32.xlu0 %v17803_v49, %s18968_s12 }
 0x3bf   : > { %15607 = vmatprep.subr.msk.mxu1 %vm419_vm1, %v10552_v31  ;;  %10633 = vmatprep.mubr.f32.mxu1 %v17700_v0 }
 0x3c0   : > { %15608 = vmatpush1.msk.msra.mxu1 %vm419_vm1, %v10551_v30  ;;  %v10548_v34 = vpop.permute.xlu1 %10547  ;;  %v10546_v36 = vpop.permute.xlu0 %10545 }
 0x3c1   : > { %15609 = vmatmul.mubr.msk.f32.vlgmr.msra.gmra.mrb[0].mxu1 %vm562_vm2, %v15606_v32  ;;  %v10553_v38 = vsel %vm18969_vm7, %v10544_v29, %v10546_v36  ;;  %v10554_v39 = vsel %vm18970_vm0, %v10546_v36, %v10548_v34  ;;  %vm18973_vm7 = vmmov %vm18972_vm6  ;;  %v15642_v29 = vld [vmem:[%s18852_s6 + $0x38] sm:$0xf] }
 0x3c2   : > { %13447 = vrot.lane.b32.xlu1 %v18277_v28, %s18968_s12  ;;  %13191 = vrot.lane.b32.xlu0 %v18096_v57, %s18963_s29  ;;  %vm18974_vm0 = vmmov %vm18972_vm6  ;;  %s19052_s29 = smov 46  }
 0x3c3   : > { %15610 = vmatprep.subr.msk.mxu1 %vm419_vm1, %v10554_v39  ;;  %10704 = vmatprep.mubr.f32.mxu1 %v17700_v0 }
 0x3c4   : > { %15611 = vmatpush1.msk.msra.mxu1 %vm419_vm1, %v10553_v38  ;;  %v10808_v49 = vpop.permute.xlu1 %10807  ;;  %v10550_v40 = vpop.permute.xlu0 %10549 }
 0x3c5   : > { %15612 = vmatmul.mubr.msk.f32.vlgmr.msra.gmra.mrb[2].mxu1 %vm562_vm2, %v15606_v32  ;;  %v10555_v42 = vsel %vm18971_vm5, %v10548_v34, %v10550_v40  ;;  %16054 = vmatprep.subr.mxu1 %v17700_v0  ;;  %vm18975_vm5 = vmmov %vm18974_vm0 }
 0x3c6   : > { %13455 = vrot.lane.b32.xlu1 %v18073_v54, %s18968_s12  ;;  %13453 = vrot.lane.b32.xlu0 %v18067_v52, %s18968_s12  ;;  %v15615_v52 = vld [vmem:[%s18852_s6 + $0x2c] sm:$0xf] }
 0x3c7   : > { %16055 = vmatpush3.msk.msra.mxu1 %vm419_vm1, %v10555_v42  ;;  %16056 = vmatprep.mubr.msk.f32.mxu1 %vm16591_vm3, %v17700_v0 }
 0x3c8   : > { %v10806_v43 = vpop.permute.xlu1 %10805  ;;  %v10810_v46 = vpop.permute.xlu0 %10809 }
 0x3c9   : > { %v10817_v48 = vsel %vm18972_vm6, %v10806_v43, %v10808_v49  ;;  %16057 = vmatmul.mubr.msk.f32.vlgmr.msra.gmra.mrb[4].mxu1 %vm562_vm2, %v15606_v32  ;;  %v10818_v50 = vsel %vm18973_vm7, %v10808_v49, %v10810_v46  ;;  %vm18976_vm6 = vmmov %vm18974_vm0  ;;  %vm18977_vm7 = vcmask 7168  }
 0x3ca   : > { %13457 = vrot.lane.b32.xlu1 %v18096_v57, %s18968_s12  ;;  %7879 = vrot.lane.b32.xlu0 %v17782_v13, %s16607_s17  ;;  %s19039_s12 = smov 108  }
 0x3cb   : > { %15616 = vmatprep.subr.msk.mxu1 %vm419_vm1, %v10818_v50  ;;  %10899 = vmatprep.mubr.f32.mxu1 %v17700_v0 }
 0x3cc   : > { %15617 = vmatpush1.msk.msra.mxu1 %vm419_vm1, %v10817_v48  ;;  %v10814_v37 = vpop.permute.xlu1 %10813  ;;  %v10812_v20 = vpop.permute.xlu0 %10811 }
 0x3cd   : > { %15618 = vmatmul.mubr.msk.f32.vlgmr.msra.gmra.mrb[0].mxu1 %vm562_vm2, %v15615_v52  ;;  %v10819_v24 = vsel %vm18974_vm0, %v10810_v46, %v10812_v20  ;;  %v10820_v13 = vsel %vm18975_vm5, %v10812_v20, %v10814_v37  ;;  %vm18978_vm0 = vmmov %vm18977_vm7  ;;  %v15651_v46 = vld [vmem:[%s18852_s6 + $0x3c] sm:$0xf] }
 0x3ce   : > { %13717 = vrot.lane.b32.xlu1 %v18338_v51, %s16603_s15  ;;  %13715 = vrot.lane.b32.xlu0 %v18288_v14, %s16603_s15  ;;  %vm18979_vm5 = vmmov %vm18978_vm0 }
 0x3cf   : > { %15619 = vmatprep.subr.msk.mxu1 %vm419_vm1, %v10820_v13  ;;  %10970 = vmatprep.mubr.f32.mxu1 %v17700_v0 }
 0x3d0   : > { %15620 = vmatpush1.msk.msra.mxu1 %vm419_vm1, %v10819_v24  ;;  %v11074_v33 = vpop.permute.xlu1 %11073  ;;  %v10816_v53 = vpop.permute.xlu0 %10815 }
 0x3d1   : > { %15621 = vmatmul.mubr.msk.f32.vlgmr.msra.gmra.mrb[2].mxu1 %vm562_vm2, %v15615_v52  ;;  %v10821_v47 = vsel %vm18976_vm6, %v10814_v37, %v10816_v53  ;;  %16059 = vmatprep.subr.mxu1 %v17700_v0  ;;  %vm18980_vm6 = vmmov %vm18978_vm0 }
 0x3d2   : > { %13719 = vrot.lane.b32.xlu1 %v18349_v9, %s16603_s15  ;;  %13713 = vrot.lane.b32.xlu0 %v18277_v28, %s16603_s15 }
 0x3d3   : > { %16060 = vmatpush3.msk.msra.mxu1 %vm419_vm1, %v10821_v47  ;;  %16061 = vmatprep.mubr.msk.f32.mxu1 %vm16591_vm3, %v17700_v0 }
 0x3d4   : > { %v11072_v55 = vpop.permute.xlu1 %11071  ;;  %v11076_v56 = vpop.permute.xlu0 %11075 }
 0x3d5   : > { %v11083_v35 = vsel %vm18977_vm7, %v11072_v55, %v11074_v33  ;;  %16062 = vmatmul.mubr.msk.f32.vlgmr.msra.gmra.mrb[4].mxu1 %vm562_vm2, %v15615_v52  ;;  %v11084_v45 = vsel %vm18978_vm0, %v11074_v33, %v11076_v56  ;;  %vm18981_vm7 = vmmov %vm18978_vm0  ;;  %vm18983_vm0 = vcmask 1039360  }
 0x3d6   : > { %13723 = vrot.lane.b32.xlu1 %v18096_v57, %s16603_s15  ;;  %13721 = vrot.lane.b32.xlu0 %v18073_v54, %s16603_s15 }
 0x3d7   : > { %15625 = vmatprep.subr.msk.mxu1 %vm419_vm1, %v11084_v45  ;;  %11165 = vmatprep.mubr.f32.mxu1 %v17700_v0 }
 0x3d8   : > { %15626 = vmatpush1.msk.msra.mxu1 %vm419_vm1, %v11083_v35  ;;  %v11080_v60 = vpop.permute.xlu1 %11079  ;;  %v11078_v61 = vpop.permute.xlu0 %11077 }
 0x3d9   : > { %15627 = vmatmul.mubr.msk.f32.vlgmr.msra.gmra.mrb[0].mxu1 %vm562_vm2, %v15624_v58  ;;  %v11085_v62 = vsel %vm18979_vm5, %v11076_v56, %v11078_v61  ;;  %v11086_v63 = vsel %vm18980_vm6, %v11078_v61, %v11080_v60  ;;  %vm18984_vm5 = vmmov %vm18983_vm0 }
 0x3da   : > { %13983 = vrot.lane.b32.xlu1 %v18338_v51, %s16604_s20  ;;  %13981 = vrot.lane.b32.xlu0 %v18288_v14, %s16604_s20  ;;  %vm18985_vm6 = vmmov %vm18983_vm0 }
 0x3db   : > { %15628 = vmatprep.subr.msk.mxu1 %vm419_vm1, %v11086_v63  ;;  %11236 = vmatprep.mubr.f32.mxu1 %v17700_v0 }
 0x3dc   : > { %15629 = vmatpush1.msk.msra.mxu1 %vm419_vm1, %v11085_v62  ;;  %v11588_v1 = vpop.permute.xlu1 %11587  ;;  %v11082_v2 = vpop.permute.xlu0 %11081  ;;  %v15669_v62 = vld [vmem:[%s18852_s6 + $0x44] sm:$0xf] }
 0x3dd   : > { %15630 = vmatmul.mubr.msk.f32.vlgmr.msra.gmra.mrb[2].mxu1 %vm562_vm2, %v15624_v58  ;;  %v11087_v3 = vsel %vm18981_vm7, %v11080_v60, %v11082_v2  ;;  %16064 = vmatprep.subr.mxu1 %v17700_v0  ;;  %vm18986_vm7 = vmmov %vm18983_vm0 }
 0x3de   : > { %13985 = vrot.lane.b32.xlu1 %v18349_v9, %s16604_s20  ;;  %13979 = vrot.lane.b32.xlu0 %v18277_v28, %s16604_s20 }
 0x3df   : > { %16065 = vmatpush3.msk.msra.mxu1 %vm419_vm1, %v11087_v3  ;;  %16066 = vmatprep.mubr.msk.f32.mxu1 %vm16591_vm3, %v17700_v0 }
 0x3e0   : > { %15634 = vmatprep.subr.msk.mxu1 %vm419_vm1, %v18288_v14  ;;  %v11586_v4 = vpop.permute.xlu1 %11585  ;;  %v11590_v6 = vpop.permute.xlu0 %11589 }
 0x3e1   : > { %16067 = vmatmul.mubr.msk.f32.vlgmr.msra.gmra.mrb[4].mxu1 %vm562_vm2, %v15624_v58  ;;  %v11598_v44 = vsel %vm18983_vm0, %v11588_v1, %v11590_v6  ;;  %v11597_v27 = vsel %vm18984_vm5, %v11586_v4, %v11588_v1  ;;  %vm18988_vm5 = vcmask 973824  }
 0x3e2   : > { %15635 = vmatpush1.msk.msra.mxu1 %vm419_vm1, %v18277_v28  ;;  %13989 = vrot.lane.b32.xlu1 %v18096_v57, %s16604_s20 }
 0x3e3   : > { %15637 = vmatprep.subr.msk.mxu1 %vm419_vm1, %v18349_v9  ;;  %13987 = vrot.lane.b32.xlu0 %v18073_v54, %s16604_s20 }
 0x3e4   : > { %11413 = vmatprep.mubr.f32.mxu1 %v17700_v0  ;;  %v11594_v15 = vpop.permute.xlu1 %11593  ;;  %v11592_v16 = vpop.permute.xlu0 %11591 }
 0x3e5   : > { %15636 = vmatmul.mubr.msk.f32.vlgmr.msra.gmra.mrb[0].mxu1 %vm562_vm2, %v15633_v7  ;;  %v11600_v41 = vsel %vm18985_vm6, %v11592_v16, %v11594_v15  ;;  %v11599_v32 = vsel %vm18986_vm7, %v11590_v6, %v11592_v16  ;;  %vm18989_vm6 = vmmov %vm18988_vm5 }
 0x3e6   : > { %15638 = vmatpush1.msk.msra.mxu1 %vm419_vm1, %v18338_v51  ;;  %14249 = vrot.lane.b32.xlu1 %v18338_v51, %s18982_s16  ;;  %vm18990_vm7 = vmmov %vm18988_vm5 }
 0x3e7   : > { %14247 = vrot.lane.b32.xlu0 %v18288_v14, %s18982_s16  ;;  %11484 = vmatprep.mubr.f32.mxu1 %v17700_v0 }
 0x3e8   : > { %16069 = vmatprep.subr.mxu1 %v17700_v0  ;;  %v11854_v17 = vpop.permute.xlu1 %11853  ;;  %v11856_v19 = vpop.permute.xlu0 %11855 }
 0x3e9   : > { %15639 = vmatmul.mubr.msk.f32.vlgmr.msra.gmra.mrb[2].mxu1 %vm562_vm2, %v15633_v7  ;;  %v11864_v39 = vsel %vm18988_vm5, %v11854_v17, %v11856_v19 }
 0x3ea   : > { %16070 = vmatpush3.msk.msra.mxu1 %vm419_vm1, %v11330_v21  ;;  %14251 = vrot.lane.b32.xlu1 %v18349_v9, %s18982_s16  ;;  %v15678_v21 = vld [vmem:[%s18852_s6 + $0x48] sm:$0xf] }
 0x3eb   : > { %15643 = vmatprep.subr.msk.mxu1 %vm419_vm1, %v11598_v44  ;;  %14245 = vrot.lane.b32.xlu0 %v18277_v28, %s18982_s16 }
 0x3ec   : > { %16071 = vmatprep.mubr.msk.f32.mxu1 %vm16591_vm3, %v17700_v0  ;;  %v11852_v25 = vpop.permute.xlu1 %11851  ;;  %v11596_v26 = vpop.permute.xlu0 %11595 }
 0x3ed   : > { %16072 = vmatmul.mubr.msk.f32.vlgmr.msra.gmra.mrb[4].mxu1 %vm562_vm2, %v15633_v7  ;;  %v11601_v38 = vsel %vm18983_vm0, %v11594_v15, %v11596_v26  ;;  %v11863_v42 = vsel %vm18989_vm6, %v11852_v25, %v11854_v17  ;;  %vm18991_vm0 = vmmov %vm18988_vm5  ;;  %vm18993_vm6 = vcmask 965632  }
 0x3ee   : > { %15644 = vmatpush1.msk.msra.mxu1 %vm419_vm1, %v11597_v27  ;;  %14255 = vrot.lane.b32.xlu1 %v18096_v57, %s18982_s16  ;;  %vm18992_vm5 = vmmov %vm18991_vm0 }
 0x3ef   : > { %15646 = vmatprep.subr.msk.mxu1 %vm419_vm1, %v11600_v41  ;;  %14253 = vrot.lane.b32.xlu0 %v18073_v54, %s18982_s16  ;;  %s19038_s16 = smov 126  }
 0x3f0   : > { %11679 = vmatprep.mubr.f32.mxu1 %v17700_v0  ;;  %v11860_v30 = vpop.permute.xlu1 %11859  ;;  %v11858_v31 = vpop.permute.xlu0 %11857 }
 0x3f1   : > { %15645 = vmatmul.mubr.msk.f32.vlgmr.msra.gmra.mrb[0].mxu1 %vm562_vm2, %v15642_v29  ;;  %v11866_v43 = vsel %vm18990_vm7, %v11858_v31, %v11860_v30  ;;  %v11865_v52 = vsel %vm18991_vm0, %v11856_v19, %v11858_v31  ;;  %vm18994_vm7 = vmmov %vm18993_vm6 }
 0x3f2   : > { %15647 = vmatpush1.msk.msra.mxu1 %vm419_vm1, %v11599_v32  ;;  %14515 = vrot.lane.b32.xlu1 %v18338_v51, %s18987_s23  ;;  %vm18995_vm0 = vmmov %vm18993_vm6 }
 0x3f3   : > { %14513 = vrot.lane.b32.xlu0 %v18288_v14, %s18987_s23  ;;  %11750 = vmatprep.mubr.f32.mxu1 %v17700_v0 }
 0x3f4   : > { %16074 = vmatprep.subr.mxu1 %v17700_v0  ;;  %v12120_v34 = vpop.permute.xlu1 %12119  ;;  %v12122_v36 = vpop.permute.xlu0 %12121 }
 0x3f5   : > { %15648 = vmatmul.mubr.msk.f32.vlgmr.msra.gmra.mrb[2].mxu1 %vm562_vm2, %v15642_v29  ;;  %v12130_v13 = vsel %vm18993_vm6, %v12120_v34, %v12122_v36  ;;  %vm18997_vm6 = vmmov %vm18995_vm0 }
 0x3f6   : > { %16075 = vmatpush3.msk.msra.mxu1 %vm419_vm1, %v11601_v38  ;;  %14517 = vrot.lane.b32.xlu1 %v18349_v9, %s18987_s23  ;;  %v15687_v38 = vld [vmem:[%s18852_s6 + $0x4c] sm:$0xf] }
 0x3f7   : > { %15652 = vmatprep.subr.msk.mxu1 %vm419_vm1, %v11864_v39  ;;  %14511 = vrot.lane.b32.xlu0 %v18277_v28, %s18987_s23 }
 0x3f8   : > { %16076 = vmatprep.mubr.msk.f32.mxu1 %vm16591_vm3, %v17700_v0  ;;  %v12118_v49 = vpop.permute.xlu1 %12117  ;;  %v11862_v40 = vpop.permute.xlu0 %11861 }
 0x3f9   : > { %16077 = vmatmul.mubr.msk.f32.vlgmr.msra.gmra.mrb[4].mxu1 %vm562_vm2, %v15642_v29  ;;  %v11867_v24 = vsel %vm18992_vm5, %v11860_v30, %v11862_v40  ;;  %v12129_v33 = vsel %vm18994_vm7, %v12118_v49, %v12120_v34  ;;  %vm18996_vm5 = vmmov %vm18995_vm0  ;;  %vm18998_vm7 = vcmask 957440  }
 0x3fa   : > { %15653 = vmatpush1.msk.msra.mxu1 %vm419_vm1, %v11863_v42  ;;  %14521 = vrot.lane.b32.xlu1 %v18096_v57, %s18987_s23 }
 0x3fb   : > { %15655 = vmatprep.subr.msk.mxu1 %vm419_vm1, %v11866_v43  ;;  %14519 = vrot.lane.b32.xlu0 %v18073_v54, %s18987_s23 }
 0x3fc   : > { %11945 = vmatprep.mubr.f32.mxu1 %v17700_v0  ;;  %v12126_v48 = vpop.permute.xlu1 %12125  ;;  %v12124_v50 = vpop.permute.xlu0 %12123 }
 0x3fd   : > { %15654 = vmatmul.mubr.msk.f32.vlgmr.msra.gmra.mrb[0].mxu1 %vm562_vm2, %v15651_v46  ;;  %v12132_v53 = vsel %vm18995_vm0, %v12124_v50, %v12126_v48  ;;  %v12131_v55 = vsel %vm18996_vm5, %v12122_v36, %v12124_v50  ;;  %vm18999_vm0 = vmmov %vm18998_vm7 }
 0x3fe   : > { %15656 = vmatpush1.msk.msra.mxu1 %vm419_vm1, %v11865_v52  ;;  %14781 = vrot.lane.b32.xlu1 %v18338_v51, %s16607_s17  ;;  %vm19000_vm5 = vmmov %vm18999_vm0 }
 0x3ff   : > { %14779 = vrot.lane.b32.xlu0 %v18288_v14, %s16607_s17  ;;  %12016 = vmatprep.mubr.f32.mxu1 %v17700_v0 }
 0x400   : > { %16079 = vmatprep.subr.mxu1 %v17700_v0  ;;  %v12386_v37 = vpop.permute.xlu1 %12385  ;;  %v12388_v20 = vpop.permute.xlu0 %12387 }
 0x401   : > { %15657 = vmatmul.mubr.msk.f32.vlgmr.msra.gmra.mrb[2].mxu1 %vm562_vm2, %v15651_v46 }
 0x402   : > { %16080 = vmatpush3.msk.msra.mxu1 %vm419_vm1, %v11867_v24  ;;  %14783 = vrot.lane.b32.xlu1 %v18349_v9, %s16607_s17  ;;  %v15696_v24 = vld [vmem:[%s18852_s6 + $0x50] sm:$0xf] }
 0x403   : > { %15661 = vmatprep.subr.msk.mxu1 %vm419_vm1, %v12130_v13  ;;  %14777 = vrot.lane.b32.xlu0 %v18277_v28, %s16607_s17  ;;  %v15660_v28 = vld [vmem:[%s18852_s6 + $0x40] sm:$0xf] }
 0x404   : > { %16081 = vmatprep.mubr.msk.f32.mxu1 %vm16591_vm3, %v17700_v0  ;;  %v12384_v14 = vpop.permute.xlu1 %12383  ;;  %v12128_v51 = vpop.permute.xlu0 %12127 }
 0x405   : > { %16082 = vmatmul.mubr.msk.f32.vlgmr.msra.gmra.mrb[4].mxu1 %vm562_vm2, %v15651_v46  ;;  %v12133_v35 = vsel %vm18997_vm6, %v12126_v48, %v12128_v51  ;;  %v12395_v60 = vsel %vm18999_vm0, %v12384_v14, %v12386_v37  ;;  %vm19001_vm6 = vmmov %vm18999_vm0 }
 0x406   : > { %15662 = vmatpush1.msk.msra.mxu1 %vm419_vm1, %v12129_v33  ;;  %14787 = vrot.lane.b32.xlu1 %v18096_v57, %s16607_s17 }
 0x407   : > { %15664 = vmatprep.subr.msk.mxu1 %vm419_vm1, %v12132_v53  ;;  %14785 = vrot.lane.b32.xlu0 %v18073_v54, %s16607_s17  ;;  %v12396_v54 = vsel %vm18998_vm7, %v12386_v37, %v12388_v20  ;;  %vm19002_vm7 = vmmov %vm18999_vm0  ;;  %vm19003_vm0 = vcmask 318464  }
 0x408   : > { %12211 = vmatprep.mubr.f32.mxu1 %v17700_v0  ;;  %v12392_v9 = vpop.permute.xlu1 %12391  ;;  %v12390_v47 = vpop.permute.xlu0 %12389 }
 0x409   : > { %15663 = vmatmul.mubr.msk.f32.vlgmr.msra.gmra.mrb[0].mxu1 %vm562_vm2, %v15660_v28  ;;  %v12398_v61 = vsel %vm19000_vm5, %v12390_v47, %v12392_v9  ;;  %v12397_v2 = vsel %vm19001_vm6, %v12388_v20, %v12390_v47  ;;  %vm19004_vm5 = vmmov %vm19003_vm0 }
 0x40a   : > { %15665 = vmatpush1.msk.msra.mxu1 %vm419_vm1, %v12131_v55  ;;  %12282 = vmatprep.mubr.f32.mxu1 %v17700_v0  ;;  %vm19005_vm6 = vmmov %vm19003_vm0 }
 0x40b   : > { %16084 = vmatprep.subr.mxu1 %v17700_v0 }
 0x40c   : > { %v12652_v57 = vpop.permute.xlu1 %12651  ;;  %v12654_v56 = vpop.permute.xlu0 %12653 }
 0x40d   : > { %15666 = vmatmul.mubr.msk.f32.vlgmr.msra.gmra.mrb[2].mxu1 %vm562_vm2, %v15660_v28  ;;  %v12662_v7 = vsel %vm19003_vm0, %v12652_v57, %v12654_v56 }
 0x40e   : > { %16085 = vmatpush3.msk.msra.mxu1 %vm419_vm1, %v12133_v35  ;;  %16086 = vmatprep.mubr.msk.f32.mxu1 %vm16591_vm3, %v17700_v0 }
 0x40f   : > { %15670 = vmatprep.subr.msk.mxu1 %vm419_vm1, %v12396_v54 }
 0x410   : > { %v12650_v45 = vpop.permute.xlu1 %12649  ;;  %v12394_v58 = vpop.permute.xlu0 %12393 }
 0x411   : > { %16087 = vmatmul.mubr.msk.f32.vlgmr.msra.gmra.mrb[4].mxu1 %vm562_vm2, %v15660_v28  ;;  %v12399_v6 = vsel %vm19002_vm7, %v12392_v9, %v12394_v58  ;;  %v12661_v17 = vsel %vm19004_vm5, %v12650_v45, %v12652_v57  ;;  %vm19006_vm7 = vmmov %vm19003_vm0  ;;  %vm19007_vm5 = vcmask 310272   ;;  %v15705_v58 = vld [vmem:[%s18852_s6 + $0x54] sm:$0xf] }
 0x412   : > { %15671 = vmatpush1.msk.msra.mxu1 %vm419_vm1, %v12395_v60  ;;  %12477 = vmatprep.mubr.f32.mxu1 %v17700_v0 }
 0x413   : > { %15673 = vmatprep.subr.msk.mxu1 %vm419_vm1, %v12398_v61 }
 0x414   : > { %v12658_v63 = vpop.permute.xlu1 %12657  ;;  %v12656_v1 = vpop.permute.xlu0 %12655 }
 0x415   : > { %15672 = vmatmul.mubr.msk.f32.vlgmr.msra.gmra.mrb[0].mxu1 %vm562_vm2, %v15669_v62  ;;  %v12664_v19 = vsel %vm19005_vm6, %v12656_v1, %v12658_v63  ;;  %v12663_v26 = vsel %vm19006_vm7, %v12654_v56, %v12656_v1  ;;  %vm19008_vm6 = vmmov %vm19007_vm5 }
 0x416   : > { %15674 = vmatpush1.msk.msra.mxu1 %vm419_vm1, %v12397_v2  ;;  %12548 = vmatprep.mubr.f32.mxu1 %v17700_v0  ;;  %vm19009_vm7 = vmmov %vm19007_vm5 }
 0x417   : > { %16089 = vmatprep.subr.mxu1 %v17700_v0 }
 0x418   : > { %v12918_v3 = vpop.permute.xlu1 %12917  ;;  %v12920_v4 = vpop.permute.xlu0 %12919 }
 0x419   : > { %15675 = vmatmul.mubr.msk.f32.vlgmr.msra.gmra.mrb[2].mxu1 %vm562_vm2, %v15669_v62  ;;  %v12928_v30 = vsel %vm19007_vm5, %v12918_v3, %v12920_v4 }
 0x41a   : > { %16090 = vmatpush3.msk.msra.mxu1 %vm419_vm1, %v12399_v6  ;;  %16091 = vmatprep.mubr.msk.f32.mxu1 %vm16591_vm3, %v17700_v0 }
 0x41b   : > { %15679 = vmatprep.subr.msk.mxu1 %vm419_vm1, %v12662_v7 }
 0x41c   : > { %v12916_v15 = vpop.permute.xlu1 %12915  ;;  %v12660_v16 = vpop.permute.xlu0 %12659 }
 0x41d   : > { %16092 = vmatmul.mubr.msk.f32.vlgmr.msra.gmra.mrb[4].mxu1 %vm562_vm2, %v15669_v62  ;;  %v12665_v29 = vsel %vm19003_vm0, %v12658_v63, %v12660_v16  ;;  %v12927_v34 = vsel %vm19008_vm6, %v12916_v15, %v12918_v3  ;;  %vm19010_vm0 = vmmov %vm19007_vm5  ;;  %vm19012_vm6 = vcmask 302080   ;;  %v15714_v15 = vld [vmem:[%s18852_s6 + $0x58] sm:$0xf] }
 0x41e   : > { %15680 = vmatpush1.msk.msra.mxu1 %vm419_vm1, %v12661_v17  ;;  %12743 = vmatprep.mubr.f32.mxu1 %v17700_v0  ;;  %vm19011_vm5 = vmmov %vm19010_vm0 }
 0x41f   : > { %15682 = vmatprep.subr.msk.mxu1 %vm419_vm1, %v12664_v19 }
 0x420   : > { %v12924_v44 = vpop.permute.xlu1 %12923  ;;  %v12922_v25 = vpop.permute.xlu0 %12921 }
 0x421   : > { %15681 = vmatmul.mubr.msk.f32.vlgmr.msra.gmra.mrb[0].mxu1 %vm562_vm2, %v15678_v21  ;;  %v12930_v36 = vsel %vm19009_vm7, %v12922_v25, %v12924_v44  ;;  %v12929_v40 = vsel %vm19010_vm0, %v12920_v4, %v12922_v25  ;;  %vm19013_vm7 = vmmov %vm19012_vm6 }
 0x422   : > { %15683 = vmatpush1.msk.msra.mxu1 %vm419_vm1, %v12663_v26  ;;  %12814 = vmatprep.mubr.f32.mxu1 %v17700_v0  ;;  %vm19014_vm0 = vmmov %vm19012_vm6 }
 0x423   : > { %16094 = vmatprep.subr.mxu1 %v17700_v0 }
 0x424   : > { %v13184_v27 = vpop.permute.xlu1 %13183  ;;  %v13186_v41 = vpop.permute.xlu0 %13185 }
 0x425   : > { %15684 = vmatmul.mubr.msk.f32.vlgmr.msra.gmra.mrb[2].mxu1 %vm562_vm2, %v15678_v21  ;;  %v13194_v48 = vsel %vm19012_vm6, %v13184_v27, %v13186_v41  ;;  %vm19016_vm6 = vmmov %vm19014_vm0 }
 0x426   : > { %16095 = vmatpush3.msk.msra.mxu1 %vm419_vm1, %v12665_v29  ;;  %16096 = vmatprep.mubr.msk.f32.mxu1 %vm16591_vm3, %v17700_v0 }
 0x427   : > { %15688 = vmatprep.subr.msk.mxu1 %vm419_vm1, %v12928_v30 }
 0x428   : > { %v13182_v31 = vpop.permute.xlu1 %13181  ;;  %v12926_v32 = vpop.permute.xlu0 %12925 }
 0x429   : > { %16097 = vmatmul.mubr.msk.f32.vlgmr.msra.gmra.mrb[4].mxu1 %vm562_vm2, %v15678_v21  ;;  %v12931_v46 = vsel %vm19011_vm5, %v12924_v44, %v12926_v32  ;;  %v13193_v37 = vsel %vm19013_vm7, %v13182_v31, %v13184_v27  ;;  %vm19015_vm5 = vmmov %vm19014_vm0  ;;  %vm19017_vm7 = vcmask 236544   ;;  %v15723_v31 = vld [vmem:[%s18852_s6 + $0x5c] sm:$0xf] }
 0x42a   : > { %15689 = vmatpush1.msk.msra.mxu1 %vm419_vm1, %v12927_v34  ;;  %13009 = vmatprep.mubr.f32.mxu1 %v17700_v0 }
 0x42b   : > { %15691 = vmatprep.subr.msk.mxu1 %vm419_vm1, %v12930_v36 }
 0x42c   : > { %v13190_v39 = vpop.permute.xlu1 %13189  ;;  %v13188_v49 = vpop.permute.xlu0 %13187 }
 0x42d   : > { %15690 = vmatmul.mubr.msk.f32.vlgmr.msra.gmra.mrb[0].mxu1 %vm562_vm2, %v15687_v38  ;;  %v13196_v20 = vsel %vm19014_vm0, %v13188_v49, %v13190_v39  ;;  %v13195_v51 = vsel %vm19015_vm5, %v13186_v41, %v13188_v49  ;;  %vm19018_vm0 = vmmov %vm19017_vm7 }
 0x42e   : > { %15692 = vmatpush1.msk.msra.mxu1 %vm419_vm1, %v12929_v40  ;;  %13080 = vmatprep.mubr.f32.mxu1 %v17700_v0  ;;  %vm19019_vm5 = vmmov %vm19018_vm0 }
 0x42f   : > { %16099 = vmatprep.subr.mxu1 %v17700_v0 }
 0x430   : > { %v13450_v42 = vpop.permute.xlu1 %13449  ;;  %v13452_v43 = vpop.permute.xlu0 %13451 }
 0x431   : > { %15693 = vmatmul.mubr.msk.f32.vlgmr.msra.gmra.mrb[2].mxu1 %vm562_vm2, %v15687_v38  ;;  %v13460_v47 = vsel %vm19017_vm7, %v13450_v42, %v13452_v43  ;;  %vm19021_vm7 = vmmov %vm19018_vm0 }
 0x432   : > { %16100 = vmatpush3.msk.msra.mxu1 %vm419_vm1, %v12931_v46  ;;  %16101 = vmatprep.mubr.msk.f32.mxu1 %vm16591_vm3, %v17700_v0 }
 0x433   : > { %15697 = vmatprep.subr.msk.mxu1 %vm419_vm1, %v13194_v48 }
 0x434   : > { %v13448_v50 = vpop.permute.xlu1 %13447  ;;  %v13192_v52 = vpop.permute.xlu0 %13191 }
 0x435   : > { %16102 = vmatmul.mubr.msk.f32.vlgmr.msra.gmra.mrb[4].mxu1 %vm562_vm2, %v15687_v38  ;;  %v13197_v28 = vsel %vm19016_vm6, %v13190_v39, %v13192_v52  ;;  %v13459_v54 = vsel %vm19018_vm0, %v13448_v50, %v13450_v42  ;;  %vm19020_vm6 = vmmov %vm19018_vm0  ;;  %vm19022_vm0 = vcmask 220160   ;;  %v15732_v50 = vld [vmem:[%s18852_s6 + $0x60] sm:$0xf] }
 0x436   : > { %15698 = vmatpush1.msk.msra.mxu1 %vm419_vm1, %v13193_v37  ;;  %13275 = vmatprep.mubr.f32.mxu1 %v17700_v0 }
 0x437   : > { %15700 = vmatprep.subr.msk.mxu1 %vm419_vm1, %v13196_v20 }
 0x438   : > { %v13456_v13 = vpop.permute.xlu1 %13455  ;;  %v13454_v14 = vpop.permute.xlu0 %13453 }
 0x439   : > { %15699 = vmatmul.mubr.msk.f32.vlgmr.msra.gmra.mrb[0].mxu1 %vm562_vm2, %v15696_v24  ;;  %v13462_v45 = vsel %vm19019_vm5, %v13454_v14, %v13456_v13  ;;  %v13461_v61 = vsel %vm19020_vm6, %v13452_v43, %v13454_v14  ;;  %vm19023_vm5 = vmmov %vm19022_vm0 }
 0x43a   : > { %15701 = vmatpush1.msk.msra.mxu1 %vm419_vm1, %v13195_v51  ;;  %13346 = vmatprep.mubr.f32.mxu1 %v17700_v0  ;;  %vm19024_vm6 = vmmov %vm19022_vm0 }
 0x43b   : > { %16104 = vmatprep.subr.mxu1 %v17700_v0 }
 0x43c   : > { %v13458_v33 = vpop.permute.xlu1 %13457  ;;  %v7880_v53 = vpop.permute.xlu0 %7879 }
 0x43d   : > { %15702 = vmatmul.mubr.msk.f32.vlgmr.msra.gmra.mrb[2].mxu1 %vm562_vm2, %v15696_v24  ;;  %v7881_v9 = vrot.slane %v7880_v53, 7  ;;  %v13463_v1 = vsel %vm19021_vm7, %v13456_v13, %v13458_v33  ;;  %vm19025_vm7 = vmmov %vm19022_vm0 }
 0x43e   : > { %16105 = vmatpush3.msk.msra.mxu1 %vm419_vm1, %v13197_v28  ;;  %16106 = vmatprep.mubr.msk.f32.mxu1 %vm16591_vm3, %v17700_v0 }
 0x43f   : > { %v7882_v55 = vsel %vm4233_vm11, %v7881_v9, %v7880_v53  ;;  %15706 = vmatprep.subr.msk.mxu1 %vm419_vm1, %v13460_v47  ;;  %v15741_v9 = vld [vmem:[%s18852_s6 + $0x64] sm:$0xf] }
 0x440   : > { %v7884_v57 = vmul.f32 %v7882_v55, %v17742_v5  ;;  %v13718_v56 = vpop.permute.xlu1 %13717  ;;  %v13716_v35 = vpop.permute.xlu0 %13715 }
 0x441   : > { %16107 = vmatmul.mubr.msk.f32.vlgmr.msra.gmra.mrb[4].mxu1 %vm562_vm2, %v15696_v24  ;;  %v13726_v2 = vsel %vm3180_vm13, %v13716_v35, %v13718_v56 }
 0x442   : > { %15707 = vmatpush1.msk.msra.mxu1 %vm419_vm1, %v13459_v54  ;;  %7886 = vrot.lane.b32.xlu0 %v7884_v57, %s16581_s24 }
 0x443   : > { %15709 = vmatprep.subr.msk.mxu1 %vm419_vm1, %v13462_v45  ;;  %13541 = vmatprep.mubr.f32.mxu1 %v17700_v0 }
 0x444   : > { %v13720_v5 = vpop.permute.xlu1 %13719  ;;  %v13714_v60 = vpop.permute.xlu0 %13713 }
 0x445   : > { %15708 = vmatmul.mubr.msk.f32.vlgmr.msra.gmra.mrb[0].mxu1 %vm562_vm2, %v15705_v58  ;;  %v13725_v6 = vsel %vm3180_vm13, %v13714_v60, %v13716_v35  ;;  %v13727_v19 = vsel %vm3180_vm13, %v13718_v56, %v13720_v5  ;;  %v15750_v60 = vld [vmem:[%s18852_s6 + $0x68] sm:$0xf] }
 0x446   : > { %15710 = vmatpush1.msk.msra.mxu1 %vm419_vm1, %v13461_v61  ;;  %13612 = vmatprep.mubr.f32.mxu1 %v17700_v0 }
 0x447   : > { %16109 = vmatprep.subr.mxu1 %v17700_v0 }
 0x448   : > { %v13724_v62 = vpop.permute.xlu1 %13723  ;;  %v13722_v63 = vpop.permute.xlu0 %13721 }
 0x449   : > { %15711 = vmatmul.mubr.msk.f32.vlgmr.msra.gmra.mrb[2].mxu1 %vm562_vm2, %v15705_v58  ;;  %v13728_v7 = vsel %vm3180_vm13, %v13720_v5, %v13722_v63  ;;  %v13729_v44 = vsel %vm3180_vm13, %v13722_v63, %v13724_v62 }
 0x44a   : > { %16110 = vmatpush3.msk.msra.mxu1 %vm419_vm1, %v13463_v1  ;;  %16111 = vmatprep.mubr.msk.f32.mxu1 %vm16591_vm3, %v17700_v0 }
 0x44b   : > { %15715 = vmatprep.subr.msk.mxu1 %vm419_vm1, %v13726_v2 }
 0x44c   : > { %v13984_v3 = vpop.permute.xlu1 %13983  ;;  %v13982_v4 = vpop.permute.xlu0 %13981 }
 0x44d   : > { %16112 = vmatmul.mubr.msk.f32.vlgmr.msra.gmra.mrb[4].mxu1 %vm562_vm2, %v15705_v58  ;;  %v13992_v26 = vsel %vm19022_vm0, %v13982_v4, %v13984_v3 }
 0x44e   : > { %15716 = vmatpush1.msk.msra.mxu1 %vm419_vm1, %v13725_v6  ;;  %13807 = vmatprep.mubr.f32.mxu1 %v17700_v0 }
 0x44f   : > { %15718 = vmatprep.subr.msk.mxu1 %vm419_vm1, %v13728_v7 }
 0x450   : > { %v13986_v16 = vpop.permute.xlu1 %13985  ;;  %v13980_v17 = vpop.permute.xlu0 %13979 }
 0x451   : > { %15717 = vmatmul.mubr.msk.f32.vlgmr.msra.gmra.mrb[0].mxu1 %vm562_vm2, %v15714_v15  ;;  %v13991_v41 = vsel %vm19023_vm5, %v13980_v17, %v13982_v4  ;;  %v13993_v34 = vsel %vm19025_vm7, %v13984_v3, %v13986_v16  ;;  %vm19026_vm5 = vcmask 154624  }
 0x452   : > { %15719 = vmatpush1.msk.msra.mxu1 %vm419_vm1, %v13727_v19  ;;  %13878 = vmatprep.mubr.f32.mxu1 %v17700_v0  ;;  %vm19028_vm7 = vmmov %vm19026_vm5 }
 0x453   : > { %16114 = vmatprep.subr.mxu1 %v17700_v0 }
 0x454   : > { %v13990_v21 = vpop.permute.xlu1 %13989 }
 0x455   : > { %15720 = vmatmul.mubr.msk.f32.vlgmr.msra.gmra.mrb[2].mxu1 %vm562_vm2, %v15714_v15  ;;  %v13988_v25 = vpop.permute.xlu0 %13987 }
 0x456   : > { %16115 = vmatpush3.msk.msra.mxu1 %vm419_vm1, %v13729_v44  ;;  %16116 = vmatprep.mubr.msk.f32.mxu1 %vm16591_vm3, %v17700_v0  ;;  %v13994_v30 = vsel %vm19024_vm6, %v13986_v16, %v13988_v25  ;;  %v13995_v39 = vsel %vm19022_vm0, %v13988_v25, %v13990_v21  ;;  %vm19027_vm6 = vmmov %vm19026_vm5 }
 0x457   : > { %15724 = vmatprep.subr.msk.mxu1 %vm419_vm1, %v13992_v26  ;;  %vm19029_vm0 = vmmov %vm19026_vm5 }
 0x458   : > { %v14250_v27 = vpop.permute.xlu1 %14249 }
 0x459   : > { %16117 = vmatmul.mubr.msk.f32.vlgmr.msra.gmra.mrb[4].mxu1 %vm562_vm2, %v15714_v15  ;;  %v14248_v29 = vpop.permute.xlu0 %14247 }
 0x45a   : > { %15725 = vmatpush1.msk.msra.mxu1 %vm419_vm1, %v13991_v41  ;;  %14073 = vmatprep.mubr.f32.mxu1 %v17700_v0  ;;  %v14258_v40 = vsel %vm19026_vm5, %v14248_v29, %v14250_v27  ;;  %vm19030_vm5 = vmmov %vm19029_vm0 }
 0x45b   : > { %15727 = vmatprep.subr.msk.mxu1 %vm419_vm1, %v13994_v30 }
 0x45c   : > { %v14252_v32 = vpop.permute.xlu1 %14251 }
 0x45d   : > { %15726 = vmatmul.mubr.msk.f32.vlgmr.msra.gmra.mrb[0].mxu1 %vm562_vm2, %v15723_v31  ;;  %v14246_v36 = vpop.permute.xlu0 %14245  ;;  %v14259_v52 = vsel %vm19029_vm0, %v14250_v27, %v14252_v32 }
 0x45e   : > { %15728 = vmatpush1.msk.msra.mxu1 %vm419_vm1, %v13993_v34  ;;  %14144 = vmatprep.mubr.f32.mxu1 %v17700_v0  ;;  %v14257_v43 = vsel %vm19027_vm6, %v14246_v36, %v14248_v29  ;;  %vm19031_vm6 = vcmask 146432  }
 0x45f   : > { %16119 = vmatprep.subr.mxu1 %v17700_v0  ;;  %vm19033_vm0 = vmmov %vm19031_vm6 }
 0x460   : > { %v14256_v38 = vpop.permute.xlu1 %14255 }
 0x461   : > { %15729 = vmatmul.mubr.msk.f32.vlgmr.msra.gmra.mrb[2].mxu1 %vm562_vm2, %v15723_v31  ;;  %v14254_v49 = vpop.permute.xlu0 %14253 }
 0x462   : > { %16120 = vmatpush3.msk.msra.mxu1 %vm419_vm1, %v13995_v39  ;;  %16121 = vmatprep.mubr.msk.f32.mxu1 %vm16591_vm3, %v17700_v0  ;;  %v14260_v48 = vsel %vm19028_vm7, %v14252_v32, %v14254_v49  ;;  %v14261_v24 = vsel %vm19030_vm5, %v14254_v49, %v14256_v38  ;;  %vm19032_vm7 = vmmov %vm19031_vm6 }
 0x463   : > { %15733 = vmatprep.subr.msk.mxu1 %vm419_vm1, %v14258_v40  ;;  %vm19034_vm5 = vmmov %vm19033_vm0 }
 0x464   : > { %v14516_v42 = vpop.permute.xlu1 %14515 }
 0x465   : > { %16122 = vmatmul.mubr.msk.f32.vlgmr.msra.gmra.mrb[4].mxu1 %vm562_vm2, %v15723_v31  ;;  %v14514_v46 = vpop.permute.xlu0 %14513 }
 0x466   : > { %15734 = vmatpush1.msk.msra.mxu1 %vm419_vm1, %v14257_v43  ;;  %14339 = vmatprep.mubr.f32.mxu1 %v17700_v0  ;;  %v14524_v14 = vsel %vm19031_vm6, %v14514_v46, %v14516_v42  ;;  %vm19035_vm6 = vmmov %vm19033_vm0 }
 0x467   : > { %15736 = vmatprep.subr.msk.mxu1 %vm419_vm1, %v14260_v48  ;;  %v15094_v48 = vld [vmem:[%s18853_s7] sm:$0xf] }
 0x468   : > { %v14518_v20 = vpop.permute.xlu1 %14517 }
 0x469   : > { %15735 = vmatmul.mubr.msk.f32.vlgmr.msra.gmra.mrb[0].mxu1 %vm562_vm2, %v15732_v50  ;;  %v14512_v37 = vpop.permute.xlu0 %14511  ;;  %v14525_v47 = vsel %vm19034_vm5, %v14516_v42, %v14518_v20  ;;  %vm19060_vm5 = vcmask 949248  }
 0x46a   : > { %15737 = vmatpush1.msk.msra.mxu1 %vm419_vm1, %v14259_v52  ;;  %14410 = vmatprep.mubr.f32.mxu1 %v17700_v0  ;;  %v14523_v33 = vsel %vm19032_vm7, %v14512_v37, %v14514_v46  ;;  %vm18733_vm7 = vcmp.lt.s32.totalorder %v482_v59, 640  ;;  %v15105_v46 = vld [vmem:[%s18854_s8] sm:$0xf] }
 0x46b   : > { %16124 = vmatprep.subr.mxu1 %v17700_v0 }
 0x46c   : > { %v14522_v51 = vpop.permute.xlu1 %14521 }
 0x46d   : > { %15738 = vmatmul.mubr.msk.f32.vlgmr.msra.gmra.mrb[2].mxu1 %vm562_vm2, %v15732_v50  ;;  %v14520_v13 = vpop.permute.xlu0 %14519 }
 0x46e   : > { %16125 = vmatpush3.msk.msra.mxu1 %vm419_vm1, %v14261_v24  ;;  %16126 = vmatprep.mubr.msk.f32.mxu1 %vm16591_vm3, %v17700_v0  ;;  %v14526_v28 = vsel %vm19033_vm0, %v14518_v20, %v14520_v13  ;;  %v14527_v56 = vsel %vm19035_vm6, %v14520_v13, %v14522_v51  ;;  %vm19059_vm0 = vcmask 957440   ;;  %vm19061_vm6 = vcmask 883712  }
 0x46f   : > { %15742 = vmatprep.subr.msk.mxu1 %vm419_vm1, %v14524_v14 }
 0x470   : > { %v14782_v57 = vpop.permute.xlu1 %14781 }
 0x471   : > { %16127 = vmatmul.mubr.msk.f32.vlgmr.msra.gmra.mrb[4].mxu1 %vm562_vm2, %v15732_v50  ;;  %v14780_v53 = vpop.permute.xlu0 %14779 }
 0x472   : > { %15743 = vmatpush1.msk.msra.mxu1 %vm419_vm1, %v14523_v33  ;;  %14605 = vmatprep.mubr.f32.mxu1 %v17700_v0  ;;  %v14790_v35 = vsel %vm4233_vm11, %v14780_v53, %v14782_v57 }
 0x473   : > { %15745 = vmatprep.subr.msk.mxu1 %vm419_vm1, %v14526_v28 }
 0x474   : > { %v14784_v45 = vpop.permute.xlu1 %14783 }
 0x475   : > { %15744 = vmatmul.mubr.msk.f32.vlgmr.msra.gmra.mrb[0].mxu1 %vm562_vm2, %v15741_v9  ;;  %v14778_v55 = vpop.permute.xlu0 %14777  ;;  %v14791_v61 = vsel %vm4233_vm11, %v14782_v57, %v14784_v45 }
 0x476   : > { %15746 = vmatpush1.msk.msra.mxu1 %vm419_vm1, %v14525_v47  ;;  %14676 = vmatprep.mubr.f32.mxu1 %v17700_v0  ;;  %v14789_v58 = vsel %vm4233_vm11, %v14778_v55, %v14780_v53 }
 0x477   : > { %16129 = vmatprep.subr.mxu1 %v17700_v0 }
 0x478   : > { %v14788_v62 = vpop.permute.xlu1 %14787 }
 0x479   : > { %15747 = vmatmul.mubr.msk.f32.vlgmr.msra.gmra.mrb[2].mxu1 %vm562_vm2, %v15741_v9  ;;  %v14786_v54 = vpop.permute.xlu0 %14785 }
 0x47a   : > { %16130 = vmatpush3.msk.msra.mxu1 %vm419_vm1, %v14527_v56  ;;  %16131 = vmatprep.mubr.msk.f32.mxu1 %vm16591_vm3, %v17700_v0  ;;  %v14792_v5 = vsel %vm4233_vm11, %v14784_v45, %v14786_v54  ;;  %v14793_v63 = vsel %vm4233_vm11, %v14786_v54, %v14788_v62 }
 0x47b   : > { %15751 = vmatprep.subr.msk.mxu1 %vm419_vm1, %v14790_v35 }
 0x47d   : > { %16132 = vmatmul.mubr.msk.f32.vlgmr.msra.gmra.mrb[4].mxu1 %vm562_vm2, %v15741_v9 }
 0x47e   : > { %15752 = vmatpush1.msk.msra.mxu1 %vm419_vm1, %v14789_v58  ;;  %14871 = vmatprep.mubr.f32.mxu1 %v17700_v0 }
 0x47f   : > { %15754 = vmatprep.subr.msk.mxu1 %vm419_vm1, %v14792_v5 }
 0x481   : > { %15753 = vmatmul.mubr.msk.f32.vlgmr.msra.gmra.mrb[0].mxu1 %vm562_vm2, %v15750_v60 }
 0x482   : > { %15755 = vmatpush1.msk.msra.mxu1 %vm419_vm1, %v14791_v61  ;;  %14942 = vmatprep.mubr.f32.mxu1 %v17700_v0 }
 0x483   : > { %16134 = vmatprep.subr.mxu1 %v17700_v0 }
 0x485   : > { %15756 = vmatmul.mubr.msk.f32.vlgmr.msra.gmra.mrb[2].mxu1 %vm562_vm2, %v15750_v60 }
 0x486   : > { %16135 = vmatpush3.msk.msra.mxu1 %vm419_vm1, %v14793_v63  ;;  %16136 = vmatprep.mubr.msk.f32.mxu1 %vm16591_vm3, %v17700_v0  ;;  %vm19056_vm1 = vcmask 1039360   ;;  %vm19058_vm3 = vcmask 965632  }
 0x489   : > { %16137 = vmatmul.mubr.msk.f32.vlgmr.msra.gmra.mrb[4].mxu1 %vm562_vm2, %v15750_v60  ;;  %vm19057_vm2 = vcmask 1031168  }
 0x4b4   : > { %v7887_v1 = vpop.permute.xlu0 %7886 }
 0x4b5   : > { %v7888_v3 = vrot.slane %v7887_v1, 1 }
 0x4b7   : > { %v7889_v4 = vsel %vm800_vm4, %v7887_v1, %v7888_v3 }
 0x4b8   : > { %7893 = vst.msk [vmem:[#allocation5 + $0x1] sm:$0x1f] %vm18733_vm7, %v7889_v4 }
 0x4bf   : > { %v8658_v6 = vld [vmem:[#allocation5] sm:$0x3f] }
 0x4c0   : > { %v8392_v7 = vld [vmem:[#allocation5] sm:$0x3f]  ;;  %8660 = vrot.lane.b32.xlu0 %v8658_v6, %s19038_s16  ;;  %s19054_s16 = smov 44  }
 0x4c1   : > { %8394 = vrot.lane.b32.xlu1 %v8392_v7, %s16594_s19  ;;  %v9190_v0 = vld [vmem:[#allocation5] sm:$0x3f]  ;;  %s19043_s19 = smov 26  }
 0x4c2   : > { %v8924_v15 = vld [vmem:[#allocation5] sm:$0x3f] }
 0x4c3   : > { %v9722_v59 = vld [vmem:[#allocation5] sm:$0x3f] }
 0x4c4   : > { %9192 = vrot.lane.b32.xlu0 %v9190_v0, %s18945_s21  ;;  %v9456_v16 = vld [vmem:[#allocation5] sm:$0x3f]  ;;  %s19045_s21 = smov 7  }
 0x4c5   : > { %8926 = vrot.lane.b32.xlu1 %v8924_v15, %s16597_s22  ;;  %v10254_v17 = vld [vmem:[#allocation5] sm:$0x3f]  ;;  %s19044_s22 = smov 16  }
 0x4c6   : > { %v9988_v19 = vld [vmem:[#allocation5] sm:$0x3f] }
 0x4c7   : > { %v10786_v21 = vld [vmem:[#allocation5] sm:$0x3f] }
 0x4c8   : > { %9724 = vrot.lane.b32.xlu0 %v9722_v59, %s19039_s12  ;;  %v10520_v44 = vld [vmem:[#allocation5] sm:$0x3f]  ;;  %s19055_s12 = smov 35  }
 0x4c9   : > { %9458 = vrot.lane.b32.xlu1 %v9456_v16, %s19040_s18  ;;  %v11318_v25 = vld [vmem:[#allocation5] sm:$0x3f] }
 0x4ca   : > { %v11052_v26 = vld [vmem:[#allocation5] sm:$0x3f] }
 0x4cb   : > { %v11832_v27 = vld [vmem:[#allocation5 + $0x1] sm:$0x3f] }
 0x4cc   : > { %10256 = vrot.lane.b32.xlu0 %v10254_v17, %s19041_s25  ;;  %v11566_v41 = vld [vmem:[#allocation5 + $0x1] sm:$0x1f] }
 0x4cd   : > { %9990 = vrot.lane.b32.xlu1 %v9988_v19, %s19042_s26  ;;  %v12364_v29 = vld [vmem:[#allocation5 + $0x1] sm:$0x3f] }
 0x4ce   : > { %v12098_v30 = vld [vmem:[#allocation5 + $0x1] sm:$0x3f] }
 0x4cf   : > { %v12896_v31 = vld [vmem:[#allocation5 + $0x1] sm:$0x3f] }
 0x4d0   : > { %10788 = vrot.lane.b32.xlu0 %v10786_v21, %s16604_s20  ;;  %v12630_v32 = vld [vmem:[#allocation5 + $0x1] sm:$0x3f]  ;;  %s19047_s20 = smov 56  }
 0x4d1   : > { %10522 = vrot.lane.b32.xlu1 %v10520_v44, %s16603_s15  ;;  %s19048_s15 = smov 6   ;;  %v13428_v34 = vld [vmem:[#allocation5 + $0x1] sm:$0x3f] }
 0x4d2   : > { %v13162_v36 = vld [vmem:[#allocation5 + $0x1] sm:$0x3f] }
 0x4d3   : > { %v13960_v38 = vld [vmem:[#allocation5 + $0x1] sm:$0x3f] }
 0x4d4   : > { %11320 = vrot.lane.b32.xlu0 %v11318_v25, %s18987_s23  ;;  %s19049_s23 = smov 54   ;;  %v13694_v39 = vld [vmem:[#allocation5 + $0x1] sm:$0x3f] }
 0x4d5   : > { %11054 = vrot.lane.b32.xlu1 %v11052_v26, %s19043_s19  ;;  %v14492_v49 = vld [vmem:[#allocation5 + $0x1] sm:$0x3f] }
 0x4d6   : > { %v14226_v40 = vld [vmem:[#allocation5 + $0x1] sm:$0x3f] }
 0x4d7   : > { %v15024_v42 = vld [vmem:[#allocation5 + $0x1] sm:$0x3f] }
 0x4d8   : > { %11834 = vrot.lane.b32.xlu0 %v11832_v27, %s19044_s22  ;;  %v14758_v43 = vld [vmem:[#allocation5 + $0x1] sm:$0x3f] }
 0x4d9   : > { %11568 = vrot.lane.b32.xlu1 %v11566_v41, %s16607_s17  ;;  %s19051_s17 = smov 45   ;;  %v7898_v24 = vld [vmem:[#allocation5] sm:$0x3f] }
 0x4dc   : > { %12366 = vrot.lane.b32.xlu0 %v12364_v29, %s19045_s21 }
 0x4dd   : > { %12100 = vrot.lane.b32.xlu1 %v12098_v30, %s19046_s27  ;;  %s16453_s27 = smul.u32 20, %s19075_s14 }
 0x4e0   : > { %12898 = vrot.lane.b32.xlu0 %v12896_v31, %s19047_s20 }
 0x4e1   : > { %12632 = vrot.lane.b32.xlu1 %v12630_v32, %s19048_s15 }
 0x4e4   : > { %13430 = vrot.lane.b32.xlu0 %v13428_v34, %s19049_s23  ;;  %s386_s23 = scalar_lea.vmem %s18855_s9, %s16453_s27 }
 0x4e5   : > { %13164 = vrot.lane.b32.xlu1 %v13162_v36, %s19050_s28 }
 0x4e8   : > { %13962 = vrot.lane.b32.xlu0 %v13960_v38, %s19051_s17 }
 0x4e9   : > { %13696 = vrot.lane.b32.xlu1 %v13694_v39, %s19052_s29 }
 0x4ec   : > { %14494 = vrot.lane.b32.xlu0 %v14492_v49, %s19053_s30 }
 0x4ed   : > { %14228 = vrot.lane.b32.xlu1 %v14226_v40, %s19054_s16 }
 0x4f0   : > { %15026 = vrot.lane.b32.xlu0 %v15024_v42, %s16626_s11 }
 0x4f1   : > { %14760 = vrot.lane.b32.xlu1 %v14758_v43, %s19055_s12 }
 0x4f4   : > { %15108 = vperm.xlu0 %16512, %v15105_v46  }
 0x4f5   : > { %15097 = vperm.xlu1 %16513, %v15094_v48  }
 0x532   : > { %v8661_v50 = vpop.permute.xlu0 %8660 }
 0x533   : > { %v8395_v52 = vpop.permute.xlu1 %8394  ;;  %v8662_v37 = vrot.slane %v8661_v50, 1 }
 0x534   : > { %v8396_v20 = vrot.slane %v8395_v52, 1 }
 0x535   : > { %v8663_v53 = vsel %vm19057_vm2, %v8661_v50, %v8662_v37  ;;  %vm19063_vm2 = vcmask 867328  }
 0x536   : > { %v8397_v13 = vsel %vm19056_vm1, %v8395_v52, %v8396_v20  ;;  %v9193_v51 = vpop.permute.xlu0 %9192  ;;  %vm19062_vm1 = vcmask 875520  }
 0x537   : > { %v8399_v14 = vadd.f32 %v8397_v13, %v7898_v24  ;;  %v8927_v33 = vpop.permute.xlu1 %8926  ;;  %v9194_v28 = vrot.slane %v9193_v51, 1 }
 0x538   : > { %v8928_v9 = vrot.slane %v8927_v33, 1 }
 0x539   : > { %v8665_v47 = vadd.f32 %v8663_v53, %v8399_v14  ;;  %v9195_v54 = vsel %vm19059_vm0, %v9193_v51, %v9194_v28  ;;  %vm19065_vm0 = vcmask 211968  }
 0x53a   : > { %v8929_v55 = vsel %vm19058_vm3, %v8927_v33, %v8928_v9  ;;  %v9725_v56 = vpop.permute.xlu0 %9724  ;;  %vm19064_vm3 = vcmask 220160  }
 0x53b   : > { %v8931_v57 = vadd.f32 %v8929_v55, %v8665_v47  ;;  %v9459_v35 = vpop.permute.xlu1 %9458  ;;  %v9726_v45 = vrot.slane %v9725_v56, 1 }
 0x53c   : > { %v9460_v58 = vrot.slane %v9459_v35, 1 }
 0x53d   : > { %v9197_v5 = vadd.f32 %v9195_v54, %v8931_v57  ;;  %v9727_v1 = vsel %vm19061_vm6, %v9725_v56, %v9726_v45  ;;  %vm19068_vm6 = vcmask 64512  }
 0x53e   : > { %v9461_v60 = vsel %vm19060_vm5, %v9459_v35, %v9460_v58  ;;  %v10257_v62 = vpop.permute.xlu0 %10256  ;;  %vm19066_vm5 = vcmask 146432  }
 0x53f   : > { %v9463_v61 = vadd.f32 %v9461_v60, %v9197_v5  ;;  %v9991_v63 = vpop.permute.xlu1 %9990  ;;  %v10258_v3 = vrot.slane %v10257_v62, 1 }
 0x540   : > { %v9992_v4 = vrot.slane %v9991_v63, 1 }
 0x541   : > { %v9729_v6 = vadd.f32 %v9727_v1, %v9463_v61  ;;  %v10259_v16 = vsel %vm19063_vm2, %v10257_v62, %v10258_v3  ;;  %vm19071_vm2 = vcmask 457728  }
 0x542   : > { %v9993_v7 = vsel %vm19062_vm1, %v9991_v63, %v9992_v4  ;;  %v10789_v15 = vpop.permute.xlu0 %10788  ;;  %vm19069_vm1 = vcmask 56320  }
 0x543   : > { %v9995_v0 = vadd.f32 %v9993_v7, %v9729_v6  ;;  %v10523_v59 = vpop.permute.xlu1 %10522  ;;  %v10790_v17 = vrot.slane %v10789_v15, 1 }
 0x544   : > { %v10524_v19 = vrot.slane %v10523_v59, 1 }
 0x545   : > { %v10261_v21 = vadd.f32 %v10259_v16, %v9995_v0  ;;  %v10791_v41 = vsel %vm19064_vm3, %v10789_v15, %v10790_v17  ;;  %vm19072_vm3 = vcmask 449536  }
 0x546   : > { %v10525_v44 = vsel %vm3180_vm13, %v10523_v59, %v10524_v19  ;;  %v11321_v26 = vpop.permute.xlu0 %11320  ;;  %vm19067_vm13 = vcmask 130048  }
 0x547   : > { %v10527_v25 = vadd.f32 %v10525_v44, %v10261_v21  ;;  %v11055_v27 = vpop.permute.xlu1 %11054  ;;  %v11322_v29 = vrot.slane %v11321_v26, 1 }
 0x548   : > { %v11056_v30 = vrot.slane %v11055_v27, 1 }
 0x549   : > { %v10793_v31 = vadd.f32 %v10791_v41, %v10527_v25  ;;  %v11323_v39 = vsel %vm19066_vm5, %v11321_v26, %v11322_v29 }
 0x54a   : > { %v11057_v32 = vsel %vm19065_vm0, %v11055_v27, %v11056_v30  ;;  %v11835_v36 = vpop.permute.xlu0 %11834  ;;  %vm19073_vm0 = vcmask 441344  }
 0x54b   : > { %v11059_v34 = vadd.f32 %v11057_v32, %v10793_v31  ;;  %v11569_v38 = vpop.permute.xlu1 %11568  ;;  %v11836_v49 = vrot.slane %v11835_v36, 7 }
 0x54c   : > { %v11570_v40 = vrot.slane %v11569_v38, 7 }
 0x54d   : > { %v11325_v42 = vadd.f32 %v11323_v39, %v11059_v34  ;;  %v11837_v52 = vsel %vm19067_vm13, %v11836_v49, %v11835_v36 }
 0x54e   : > { %v11571_v43 = vsel %vm4233_vm11, %v11570_v40, %v11569_v38  ;;  %v12367_v48 = vpop.permute.xlu0 %12366  ;;  %vm19070_vm11 = vcmask 48128  }
 0x54f   : > { %v11573_v46 = vadd.f32 %v11571_v43, %v11325_v42  ;;  %v12101_v50 = vpop.permute.xlu1 %12100  ;;  %v12368_v37 = vrot.slane %v12367_v48, 7 }
 0x550   : > { %v12102_v20 = vrot.slane %v12101_v50, 7 }
 0x551   : > { %v11839_v24 = vadd.f32 %v11837_v52, %v11573_v46  ;;  %v12369_v53 = vsel %vm19069_vm1, %v12368_v37, %v12367_v48 }
 0x552   : > { %v12103_v13 = vsel %vm19068_vm6, %v12102_v20, %v12101_v50  ;;  %v12899_v51 = vpop.permute.xlu0 %12898 }
 0x553   : > { %v12105_v14 = vadd.f32 %v12103_v13, %v11839_v24  ;;  %v12633_v33 = vpop.permute.xlu1 %12632  ;;  %v12900_v28 = vrot.slane %v12899_v51, 1 }
 0x554   : > { %v12634_v9 = vrot.slane %v12633_v33, 7  ;;  %v18788_v55 = vpop.f32.mrb[0].mxu1 }
 0x555   : > { %v12371_v47 = vadd.f32 %v12369_v53, %v12105_v14  ;;  %v18791_v56 = vpop.f32.mrb[1].mxu1  ;;  %v12901_v58 = vsel %vm19071_vm2, %v12899_v51, %v12900_v28 }
 0x556   : > { %v12635_v57 = vsel %vm19070_vm11, %v12634_v9, %v12633_v33  ;;  %v13431_v54 = vpop.permute.xlu0 %13430 }
 0x557   : > { %v12637_v35 = vadd.f32 %v12635_v57, %v12371_v47  ;;  %v13165_v45 = vpop.permute.xlu1 %13164  ;;  %v13432_v5 = vrot.slane %v13431_v54, 1 }
 0x558   : > { %v13166_v60 = vrot.slane %v13165_v45, 1  ;;  %v18794_v62 = vpop.f32.mrb[2].mxu1 }
 0x559   : > { %v12903_v61 = vadd.f32 %v12901_v58, %v12637_v35  ;;  %v18797_v1 = vpop.f32.mrb[3].mxu1  ;;  %v13433_v7 = vsel %vm19073_vm0, %v13431_v54, %v13432_v5 }
 0x55a   : > { %v13167_v63 = vsel %vm19072_vm3, %v13165_v45, %v13166_v60  ;;  %v13963_v4 = vpop.permute.xlu0 %13962 }
 0x55b   : > { %v13169_v3 = vadd.f32 %v13167_v63, %v12903_v61  ;;  %v13697_v6 = vpop.permute.xlu1 %13696  ;;  %v13964_v0 = vrot.slane %v13963_v4, 1 }
 0x55c   : > { %v13698_v15 = vrot.slane %v13697_v6, 1  ;;  %v18800_v16 = vpop.f32.mrb[4].mxu1 }
 0x55d   : > { %v13435_v59 = vadd.f32 %v13433_v7, %v13169_v3  ;;  %v16138_v19 = vpop.f32.mrb[5].mxu1  ;;  %v13965_v26 = vsel %vm6641_vm15, %v13963_v4, %v13964_v0 }
 0x55e   : > { %v13699_v17 = vsel %vm6374_vm8, %v13697_v6, %v13698_v15  ;;  %v14495_v44 = vpop.permute.xlu0 %14494 }
 0x55f   : > { %v13701_v21 = vadd.f32 %v13699_v17, %v13435_v59  ;;  %v14229_v25 = vpop.permute.xlu1 %14228  ;;  %v14496_v27 = vrot.slane %v14495_v44, 1 }
 0x560   : > { %v14230_v41 = vrot.slane %v14229_v25, 1 }
 0x561   : > { %v13967_v29 = vadd.f32 %v13965_v26, %v13701_v21  ;;  %v14497_v36 = vsel %vm7176_vm9, %v14495_v44, %v14496_v27 }
 0x562   : > { %v14231_v30 = vsel %vm6908_vm10, %v14229_v25, %v14230_v41  ;;  %v15027_v32 = vpop.permute.xlu0 %15026 }
 0x563   : > { %v14233_v31 = vadd.f32 %v14231_v30, %v13967_v29  ;;  %v14761_v34 = vpop.permute.xlu1 %14760  ;;  %v15028_v38 = vrot.slane %v15027_v32, 1 }
 0x564   : > { %v14762_v39 = vrot.slane %v14761_v34, 1 }
 0x565   : > { %v14499_v49 = vadd.f32 %v14497_v36, %v14233_v31  ;;  %v15029_v43 = vsel %vm7710_vm14, %v15027_v32, %v15028_v38 }
 0x566   : > { %v14763_v40 = vsel %vm7443_vm12, %v14761_v34, %v14762_v39 }
 0x567   : > { %v14765_v42 = vadd.f32 %v14763_v40, %v14499_v49 }
 0x569   : > { %v15031_v46 = vadd.f32 %v15029_v43, %v14765_v42 }
 0x56b   : > { %v15032_v48 = vmul.f32 4.0, %v15031_v46 }
 0x56d   : > { %v15035_v50 = vadd.f32 1e-08, %v15032_v48  ;;  %v15033_v20 = vmax.f32 %v15032_v48, 0.0 }
 0x56f   : > { %16545 = vrcp.f32 %v15035_v50  ;;  %v15034_v14 = vmin.f32 %v15033_v20, 1.0 }
 0x579   : > { %v16546_v52 = vpop.eup %16545 }
 0x57a   : > { %v15037_v37 = vmul.f32 %v16546_v52, %v15035_v50 }
 0x57c   : > { %v15038_v24 = vsub.f32 2.0, %v15037_v37 }
 0x57e   : > { %v15039_v13 = vmul.f32 %v16546_v52, %v15038_v24 }
 0x580   : > { %v15040_v51 = vmul.f32 108.0, %v15039_v13 }
 0x582   : > { %v15041_v33 = vmul.f32 %v15040_v51, %v15034_v14 }
 0x584   : > { %v15050_v53 = vrot.slane %v15041_v33, %v17745_v10  ;;  %v15046_v28 = vrot.slane %v15041_v33, %v17748_v8  ;;  %v15058_v9 = vrot.slane %v15041_v33, %v17754_v18  ;;  %v15054_v47 = vrot.slane %v15041_v33, %v17757_v11  ;;  %v15109_v10 = vpop.permute.xlu0 %15108  ;;  %v15098_v8 = vpop.permute.xlu1 %15097 }
 0x585   : > { %v15066_v57 = vrot.slane %v15041_v33, %v7746_v22  ;;  %v15062_v35 = vrot.slane %v15041_v33, %v17765_v23 }
 0x586   : > { %15069 = vrot.lane.b32.xlu0 %v15050_v53, %s16581_s24  ;;  %15067 = vrot.lane.b32.xlu1 %v15046_v28, %s16581_s24 }
 0x58a   : > { %15073 = vrot.lane.b32.xlu0 %v15058_v9, %s16581_s24  ;;  %15071 = vrot.lane.b32.xlu1 %v15054_v47, %s16581_s24 }
 0x58e   : > { %15077 = vrot.lane.b32.xlu0 %v15066_v57, %s16581_s24  ;;  %15075 = vrot.lane.b32.xlu1 %v15062_v35, %s16581_s24 }
 0x592   : > { %15163 = vrot.lane.b32.xlu1 %v15034_v14, %s16581_s24  ;;  %s16454_s24 = smul.u32 5, %s19075_s14 }
 0x594   : > { %s390_s21 = scalar_lea.vmem %s18856_s10, %s16454_s24 }
 0x5f8   : > { %v15070_v18 = vpop.permute.xlu0 %15069  ;;  %v15068_v54 = vpop.permute.xlu1 %15067 }
 0x5f9   : > { %v15079_v11 = vsel %vm800_vm4, %v15068_v54, %v15070_v18 }
 0x5fa   : > { %v15089_v45 = vmul.f32 %v15079_v11, %v18788_v55 }
 0x5fc   : > { %v15100_v58 = vmul.f32 %v15098_v8, %v15089_v45  ;;  %v15074_v12 = vpop.permute.xlu0 %15073  ;;  %v15072_v22 = vpop.permute.xlu1 %15071 }
 0x5fd   : > { %v15080_v23 = vsel %vm800_vm4, %v15070_v18, %v15072_v22  ;;  %v15081_v5 = vsel %vm800_vm4, %v15072_v22, %v15074_v12 }
 0x5fe   : > { %v15111_v60 = vadd.f32 %v15109_v10, %v15100_v58  ;;  %v15090_v61 = vmul.f32 %v15080_v23, %v18791_v56  ;;  %v15091_v63 = vmul.f32 %v15081_v5, %v18794_v62 }
 0x600   : > { %v15116_v3 = vsub.f32 0.0, %v15111_v60  ;;  %v15101_v4 = vmul.f32 %v15098_v8, %v15090_v61  ;;  %v15102_v6 = vmul.f32 %v15098_v8, %v15091_v63  ;;  %v15078_v7 = vpop.permute.xlu0 %15077  ;;  %v15076_v0 = vpop.permute.xlu1 %15075 }
 0x601   : > { %v15082_v55 = vsel %vm800_vm4, %v15074_v12, %v15076_v0  ;;  %v15083_v15 = vsel %vm800_vm4, %v15076_v0, %v15078_v7 }
 0x602   : > { %v15121_v59 = vmul.f32 1.442695, %v15116_v3  ;;  %v15112_v17 = vadd.f32 %v15109_v10, %v15101_v4  ;;  %v15113_v19 = vadd.f32 %v15109_v10, %v15102_v6  ;;  %v15092_v21 = vmul.f32 %v15082_v55, %v18797_v1 }
 0x603   : > { %v15093_v44 = vmul.f32 %v15083_v15, %v18800_v16 }
 0x604   : > { %16547 = vpow2.f32 %v15121_v59  ;;  %v15117_v56 = vsub.f32 0.0, %v15112_v17  ;;  %v15118_v62 = vsub.f32 0.0, %v15113_v19  ;;  %v15103_v25 = vmul.f32 %v15098_v8, %v15092_v21  ;;  %v15164_v26 = vpop.permute.xlu1 %15163 }
 0x605   : > { %v15104_v27 = vmul.f32 %v15098_v8, %v15093_v44  ;;  %v15165_v41 = vrot.slane %v15164_v26, 1 }
 0x606   : > { %v15123_v29 = vmul.f32 1.442695, %v15117_v56  ;;  %v15125_v30 = vmul.f32 1.442695, %v15118_v62  ;;  %v15114_v31 = vadd.f32 %v15109_v10, %v15103_v25 }
 0x607   : > { %v15115_v32 = vadd.f32 %v15109_v10, %v15104_v27  ;;  %v15166_v34 = vsel %vm800_vm4, %v15164_v26, %v15165_v41 }
 0x608   : > { %16549 = vpow2.f32 %v15123_v29  ;;  %v15119_v1 = vsub.f32 0.0, %v15114_v31  ;;  %15168 = vst.msk [vmem:[%s390_s21] sm:$0x1f] %vm18733_vm7, %v15166_v34 }
 0x609   : > { %16551 = vpow2.f32 %v15125_v30  ;;  %v15120_v16 = vsub.f32 0.0, %v15115_v32 }
 0x60a   : > { %v15127_v36 = vmul.f32 1.442695, %v15119_v1 }
 0x60b   : > { %v15129_v38 = vmul.f32 1.442695, %v15120_v16 }
 0x60c   : > { %16553 = vpow2.f32 %v15127_v36 }
 0x60d   : > { %16555 = vpow2.f32 %v15129_v38 }
 0x60e   : > { %v16548_v39 = vpop.eup %16547 }
 0x60f   : > { %v15131_v49 = vadd.f32 1.0, %v16548_v39 }
 0x611   : > { %16557 = vrcp.f32 %v15131_v49 }
 0x612   : > { %v16550_v40 = vpop.eup %16549 }
 0x613   : > { %v16552_v42 = vpop.eup %16551  ;;  %v15132_v43 = vadd.f32 1.0, %v16550_v40 }
 0x614   : > { %v15133_v46 = vadd.f32 1.0, %v16552_v42 }
 0x615   : > { %16559 = vrcp.f32 %v15132_v43 }
 0x616   : > { %v16554_v48 = vpop.eup %16553  ;;  %16561 = vrcp.f32 %v15133_v46 }
 0x617   : > { %v16556_v50 = vpop.eup %16555  ;;  %v15134_v2 = vadd.f32 1.0, %v16554_v48 }
 0x618   : > { %v15135_v52 = vadd.f32 1.0, %v16556_v50 }
 0x619   : > { %16563 = vrcp.f32 %v15134_v2 }
 0x61a   : > { %16565 = vrcp.f32 %v15135_v52 }
 0x61b   : > { %v16558_v37 = vpop.eup %16557 }
 0x61c   : > { %v15146_v24 = vmul.f32 %v16558_v37, %v15111_v60 }
 0x61f   : > { %v16560_v20 = vpop.eup %16559 }
 0x620   : > { %v15147_v13 = vmul.f32 %v16560_v20, %v15112_v17  ;;  %v16562_v14 = vpop.eup %16561 }
 0x621   : > { %v15148_v28 = vmul.f32 %v16562_v14, %v15113_v19 }
 0x622   : > { %v15155_v51 = vcombine.low %v15146_v24, %v15147_v13 }
 0x623   : > { %v16564_v33 = vpop.eup %16563 }
 0x624   : > { %v16566_v53 = vpop.eup %16565  ;;  %15159 = vst [vmem:[%s386_s23] sm:$0xff] %v15155_v51  ;;  %v15149_v9 = vmul.f32 %v16564_v33, %v15114_v31 }
 0x625   : > { %v15150_v47 = vmul.f32 %v16566_v53, %v15115_v32 }
 0x626   : > { %v15156_v57 = vcombine.low %v15148_v28, %v15149_v9 }
 0x627   : > { %15161 = vst [vmem:[%s386_s23 + $0x10] sm:$0xf] %v15150_v47 }
 0x628   : > { %15160 = vst [vmem:[%s386_s23 + $0x8] sm:$0xff] %v15156_v57 }
 0x629 PF: > { %s21_s13 = sadd.s32 1, %s16577_s13  }
 0x62a   : > { %p18_p4 = scmp.ge.s32.totalorder %s21_s13, 4  }
 0x62c   :  { %20 = sbr.rel (!%p18_p4) target bundleno = 1 (0x1), region = 153 }

</bundles_post_ra>
